<compile_context>
chip_gen: v7x
topology: tpu7x:2x2x1
jax: 0.10.0
libtpu: 0.0.40
codegen_flags: <defaults>
</compile_context>

<pallas_src>
import math

import jax
import jax.numpy as jnp
from jax.experimental import pallas as pl
from jax.experimental.pallas import tpu as pltpu

DTYPE = jnp.float32           # parameter / elementwise math dtype
MXU_DTYPE = jnp.bfloat16      # MXU operand dtype (bf16-native on v6e/v7x, fine on v5e);
                              # set to jnp.float32 to recover exact f32 matmul numerics.
EPS = 1e-5
PAD_BASE = 8                  # sublane-aligned row offset of x inside the zero-pad scratch
_VMEM = pl.BlockSpec(memory_space=pltpu.MemorySpace.VMEM)
_VMEM_LIMIT = 32 * 1024 * 1024  # explicit scoped-VMEM budget (actual use here is << 1 MiB)


def padding_same(input, kernel, stride=1, dilation=1):
    return int(0.5 * (stride * (input - 1) - input + kernel + (dilation - 1) * (kernel - 1)))


# --------------------------- in-kernel building blocks ---------------------------

def _bn_relu(x, gamma, beta):
    """Training-mode BatchNorm1d (batch stats over N*L, biased var) + ReLU.

    Centered two-pass variance (numerically safe).  x: (N, L, C) f32 value,
    gamma / beta: (1, C) f32 rows.
    TODO(synk): eval-mode (running-stats) BN would replace m/var with constants here.
    """
    n, l, c = x.shape
    x2 = x.reshape(n * l, c)
    m = jnp.mean(x2, axis=0, keepdims=True)
    xc = x2 - m
    var = jnp.mean(xc * xc, axis=0, keepdims=True)
    y = xc * (jax.lax.rsqrt(var + EPS) * gamma) + beta
    return jnp.maximum(y, 0.0).reshape(n, l, c)


def _matmul_1x1(x, w_ref, bias=None):
    """Pointwise (1x1) conv: one (N*L, Cin) @ (Cin, Cout) MXU matmul, f32 accumulate."""
    n, l, cin = x.shape
    cout = int(w_ref.shape[-1])
    y = jnp.dot(x.reshape(n * l, cin).astype(MXU_DTYPE), w_ref[...],
                preferred_element_type=jnp.float32)
    if bias is not None:
        y = y + bias
    return y.reshape(n, l, cout)


def _conv1d(x, w_ref, pad, dil, xpad_ref, col_ref, bias=None):
    """Stride-1 zero-padded (dilated) Conv1d as ONE fused im2col MXU matmul.

    x: (N, L, Cin) f32 value, w_ref: packed (K*Cin, Cout) weight.
      1. x is stored once at the aligned offset PAD_BASE of the shared zero-pad
         scratch; only the pad margins are zeroed (aligned stores - the x store
         below overwrites any overlap).
      2. The K dilated tap windows are read back and scattered into channel
         blocks of the shared im2col scratch.
      3. One (N*Lout, K*Cin) @ (K*Cin, Cout) matmul replaces K per-tap matmuls
         and K-1 VPU accumulation adds.
    """
    n, l, cin = x.shape
    kcin, cout = (int(d) for d in w_ref.shape)
    k = kcin // cin
    lout = l + 2 * pad - dil * (k - 1)
    base = PAD_BASE

    if pad > 0:
        # zero only the pad margins the tap windows can read (aligned starts)
        xpad_ref[:, 0:base, 0:cin] = jnp.zeros((n, base, cin), jnp.float32)
        tail = (base + l) // 8 * 8
        xpad_ref[:, tail:base + l + pad, 0:cin] = (
            jnp.zeros((n, base + l + pad - tail, cin), jnp.float32))
        xpad_ref[:, base:base + l, 0:cin] = x

        def tap(j):
            s = base - pad + j * dil
            return xpad_ref[:, s:s + lout, 0:cin]
    else:
        def tap(j):
            return x[:, j * dil:j * dil + lout, :]

    if k == 1:
        lhs = tap(0).reshape(n * lout, cin)
    else:
        for j in range(k):
            col_ref[:, 0:lout, j * cin:(j + 1) * cin] = tap(j)
        lhs = col_ref[:, 0:lout, 0:kcin].reshape(n * lout, kcin)

    y = jnp.dot(lhs.astype(MXU_DTYPE), w_ref[...], preferred_element_type=jnp.float32)
    if bias is not None:
        y = y + bias                      # (1, Cout), added once after all taps
    return y.reshape(n, lout, cout)


def _max_pool(x, kr, buf_ref):
    """MaxPool1d(kr, kr) on an in-VMEM value: park x in the shared scratch and
    take the max of kr strided window reads (no extra launch / HBM traffic)."""
    n, l, c = x.shape
    lout = l // kr
    buf_ref[:, 0:l, 0:c] = x
    acc = buf_ref[:, pl.ds(0, lout, stride=kr), :]
    for j in range(1, kr):
        acc = jnp.maximum(acc, buf_ref[:, pl.ds(j, lout, stride=kr), :])
    return acc[:, :, 0:c]                 # drop the scratch's unused trailing channels


# --------------------------- fused whole-network kernel ---------------------------

def _make_kernel(ops, n_params):
    """One fused kernel for the whole network.  Parameters are consumed in op
    order; every intermediate stays as a VMEM value / scratch slice."""

    def kernel(*refs):
        x_ref = refs[0]
        params = refs[1:1 + n_params]
        o_ref = refs[1 + n_params]
        feat_ref, xpad_ref, col_ref = refs[2 + n_params:5 + n_params]

        pi = 0

        def take(k):
            nonlocal pi
            out = params[pi:pi + k]
            pi += k
            return out

        cur = x_ref[...].astype(jnp.float32)      # (N, L, C) activation value
        cur_l = int(x_ref.shape[1])
        feat_c = None                             # width of the dense-block concat in feat_ref
        result = None

        for op in ops:
            kind = op['kind']
            if kind == 'low_conv':
                w_ref, vec_ref = take(2)          # vec rows: [bias; gamma; beta]
                y = _conv1d(cur, w_ref, op['pad'], op['dil'], xpad_ref, col_ref,
                            bias=vec_ref[0:1, :])
                cur = _bn_relu(y, vec_ref[1:2, :], vec_ref[2:3, :])
                cur_l = int(y.shape[1])
            elif kind == 'pool':
                cur = _max_pool(cur, op['kr'], xpad_ref)
                cur_l //= op['kr']
            elif kind == 'dense_sub':
                gb_ref, wpre_ref, pgb_ref, wconv_ref = take(4)
                if feat_c is None:                # first sub-layer: seed the concat buffer
                    feat_c = int(cur.shape[2])
                    feat_ref[:, 0:cur_l, 0:feat_c] = cur
                feat = feat_ref[:, 0:cur_l, 0:feat_c]     # == torch.cat(prev_features, 1)
                h = _bn_relu(feat, gb_ref[0:1, :], gb_ref[1:2, :])
                pre = _matmul_1x1(h, wpre_ref)            # 1x1 pre-conv (bias=False)
                pre = _bn_relu(pre, pgb_ref[0:1, :], pgb_ref[1:2, :])
                piece = _conv1d(pre, wconv_ref, op['pad'], op['dil'], xpad_ref, col_ref)
                cpk = int(piece.shape[2])
                feat_ref[:, 0:cur_l, feat_c:feat_c + cpk] = piece   # append: cat order kept
                feat_c += cpk
            elif kind == 'transition':
                gb_ref, w_ref = take(2)
                feat = feat_ref[:, 0:cur_l, 0:feat_c]
                feat_c = None
                h = _bn_relu(feat, gb_ref[0:1, :], gb_ref[1:2, :])
                cur = _matmul_1x1(h, w_ref)               # 1x1 (bias=False)
            elif kind == 'gap_linear':
                w_ref, b_ref = take(2)
                if feat_c is not None:            # skip_final_transition_blk path
                    cur = feat_ref[:, 0:cur_l, 0:feat_c]
                    feat_c = None
                gp = jnp.mean(cur, axis=1)        # AdaptiveAvgPool1d(1) + flatten
                result = jnp.dot(gp, w_ref[...],
                                 preferred_element_type=jnp.float32) + b_ref[...]
            else:
                raise ValueError(f'unexpected op kind {kind!r}')

        assert pi == n_params
        o_ref[...] = result.astype(o_ref.dtype)

    return kernel


# --------------------------- host-side parameter packing ---------------------------

def _pack_conv_w(w):
    """torch Conv1d weight (Cout, Cin, K) -> MXU-ready (K*Cin, Cout)."""
    cout, cin, k = (int(d) for d in w.shape)
    return jnp.transpose(w, (2, 1, 0)).reshape(k * cin, cout).astype(MXU_DTYPE)


def _pack_1x1_w(w):
    """torch Conv1d 1x1 weight (Cout, Cin, 1) -> (Cin, Cout)."""
    return jnp.transpose(w[:, :, 0], (1, 0)).astype(MXU_DTYPE)


def _bn_params(c):
    """Fresh BatchNorm1d affine params packed as rows [gamma; beta] -> (2, C)."""
    return jnp.stack([jnp.ones((c,), DTYPE), jnp.zeros((c,), DTYPE)])


# --------------------------------- model ---------------------------------

class DenseNetPallas:
    """Forward-pass equivalent of the PyTorch DenseNet as one fused Pallas TPU kernel."""

    def __init__(self, key, *, input_size, in_channels, kernels, layer_dilations,
                 channel_per_kernel, n_classes, low_conv_cfg, low_conv_kernels,
                 low_conv_strides, low_conv_pooling_kernels, n_blocks,
                 reduction, n_growth_rate, transition_pooling,
                 skip_final_transition_blk=False):
        self._key = key
        self.n_classes = n_classes
        self.skip_final_transition_blk = skip_final_transition_blk
        if low_conv_strides is None:
            low_conv_strides = [1 for x in low_conv_cfg if x != 'M']
        if low_conv_pooling_kernels is None:
            low_conv_pooling_kernels = [2 for x in low_conv_cfg if x == 'M']

        # --- low conv stack: Conv1d(bias=True) + BN + ReLU / MaxPool1d ---
        self.low_layers = []
        in_c = in_channels
        i_conv = i_pool = 0
        for x in low_conv_cfg:
            if x == 'M':
                self.low_layers.append(dict(kind='pool', kr=low_conv_pooling_kernels[i_pool]))
                i_pool += 1
            else:
                k = low_conv_kernels[i_conv]
                # TODO(synk): strided low convs (stride > 1) are not implemented.
                assert low_conv_strides[i_conv] == 1
                w = self._normal((x, in_c, k))
                b = self._normal((x,))
                self.low_layers.append(dict(
                    kind='conv', cin=in_c, cout=x, k=k, pad=int((k - 1) // 2), dil=1,
                    w=_pack_conv_w(w),
                    vecs=jnp.stack([b, jnp.ones((x,), DTYPE), jnp.zeros((x,), DTYPE)])))
                in_c = x
                i_conv += 1

        # --- dense blocks + transitions (replicates the PyTorch __init__ bookkeeping) ---
        self.dense_blocks, self.transitions = [], []
        in_ch = low_conv_cfg[-1] if isinstance(low_conv_cfg[-1], int) else low_conv_cfg[-2]
        out_channels = in_ch
        for i_block in range(len(layer_dilations)):
            kb, db = kernels[i_block], layer_dilations[i_block]
            cpk, nb = channel_per_kernel[i_block], n_blocks[i_block]
            blk, out_c = [], in_ch
            for _ in range(nb):
                pre_out = int(n_growth_rate * cpk)
                blk.append(dict(
                    cin=out_c, pre_out=pre_out, cpk=cpk, k=kb[0], dil=db[0],
                    pad=padding_same(input=input_size, kernel=kb[0], stride=1, dilation=db[0]),
                    bn_gb=_bn_params(out_c),
                    w_pre=_pack_1x1_w(self._normal((pre_out, out_c, 1))),        # bias=False
                    pre_gb=_bn_params(pre_out),
                    w_conv=_pack_conv_w(self._normal((cpk, pre_out, kb[0])))))   # bias=False
                out_c += len(kb) * len(db) * cpk
            self.dense_blocks.append(blk)
            in_ch += nb * len(db) * len(kb) * cpk
            if skip_final_transition_blk and i_block == len(layer_dilations) - 1:
                out_channels = in_ch
                break
            out_channels = int(math.floor(in_ch * reduction))
            self.transitions.append(dict(
                cin=in_ch, cout=out_channels, pool=transition_pooling[i_block],
                gb=_bn_params(in_ch),
                w=_pack_1x1_w(self._normal((out_channels, in_ch, 1)))))          # bias=False
            in_ch = out_channels

        # classifier head: AdaptiveAvgPool1d(1) + flatten + Linear(out_channels, n_classes)
        self.clf_w = jnp.transpose(self._normal((n_classes, out_channels)), (1, 0))
        self.clf_b = self._normal((n_classes,)).reshape(1, n_classes)

    def _normal(self, shape, scale=0.1):
        self._key, sub = jax.random.split(self._key)
        return scale * jax.random.normal(sub, shape, dtype=DTYPE)

    # ---------------------------------------------------------------- planning

    def _plan(self, n, l0, c0):
        """Flat op list + packed parameter list + max-sized shared scratch shapes."""
        ops, params = [], []
        l, c = l0, c0
        xpad_rows = xpad_ch = col_rows = col_ch = feat_rows = feat_ch = 8

        def need_conv(l_in, cin, k, pad, dil):
            nonlocal xpad_rows, xpad_ch, col_rows, col_ch
            assert 0 <= dil * (k - 1) - pad <= PAD_BASE, 'pad scratch base too small'
            lout = l_in + 2 * pad - dil * (k - 1)
            if pad > 0:
                xpad_rows = max(xpad_rows, PAD_BASE + max(l_in + pad, lout))
                xpad_ch = max(xpad_ch, cin)
            if k > 1:
                col_rows = max(col_rows, lout)
                col_ch = max(col_ch, k * cin)
            return lout

        def need_pool(l_in, c_in):
            nonlocal xpad_rows, xpad_ch
            xpad_rows = max(xpad_rows, l_in)
            xpad_ch = max(xpad_ch, c_in)

        # low conv stack
        for lay in self.low_layers:
            if lay['kind'] == 'pool':
                need_pool(l, c)
                ops.append(dict(kind='pool', kr=lay['kr']))
                l //= lay['kr']
            else:
                assert lay['cin'] == c
                lout = need_conv(l, lay['cin'], lay['k'], lay['pad'], lay['dil'])
                ops.append(dict(kind='low_conv', pad=lay['pad'], dil=lay['dil']))
                params += [lay['w'], lay['vecs']]
                l, c = lout, lay['cout']

        # dense blocks (+ transitions)
        for i_block, blk in enumerate(self.dense_blocks):
            for sub in blk:
                assert sub['cin'] == c
                lout = need_conv(l, sub['pre_out'], sub['k'], sub['pad'], sub['dil'])
                assert lout == l, 'dense-block convs must preserve length (same padding)'
                ops.append(dict(kind='dense_sub', pad=sub['pad'], dil=sub['dil']))
                params += [sub['bn_gb'], sub['w_pre'], sub['pre_gb'], sub['w_conv']]
                c += sub['cpk']
            feat_rows, feat_ch = max(feat_rows, l), max(feat_ch, c)
            if self.skip_final_transition_blk and i_block == len(self.dense_blocks) - 1:
                break
            tr = self.transitions[i_block]
            assert tr['cin'] == c
            ops.append(dict(kind='transition'))
            params += [tr['gb'], tr['w']]
            c = tr['cout']
            need_pool(l, c)
            ops.append(dict(kind='pool', kr=tr['pool']))
            l //= tr['pool']

        assert int(self.clf_w.shape[0]) == c
        ops.append(dict(kind='gap_linear'))
        params += [self.clf_w, self.clf_b]

        scratch = [
            pltpu.VMEM((n, feat_rows, feat_ch), jnp.float32),   # dense-block concat buffer
            pltpu.VMEM((n, xpad_rows, xpad_ch), jnp.float32),   # shared zero-pad / pool scratch
            pltpu.VMEM((n, col_rows, col_ch), jnp.float32),     # shared im2col scratch
        ]
        return ops, params, scratch

    # ---------------------------------------------------------------- forward

    def __call__(self, x_ncl):
        # x_ncl: (N, C, L) PyTorch layout -> (N, L, C) once at the model boundary.
        x = jnp.transpose(x_ncl, (0, 2, 1)).astype(DTYPE)
        n, l, c = (int(d) for d in x.shape)
        ops, params, scratch_shapes = self._plan(n, l, c)
        kernel = _make_kernel(ops, len(params))
        return pl.pallas_call(
            kernel,
            out_shape=jax.ShapeDtypeStruct((n, self.n_classes), DTYPE),
            in_specs=[_VMEM] * (1 + len(params)),
            out_specs=_VMEM,
            scratch_shapes=scratch_shapes,
            compiler_params=pltpu.CompilerParams(vmem_limit_bytes=_VMEM_LIMIT),
        )(x, *params)


if __name__ == "__main__":
    key = jax.random.PRNGKey(0)
    pkey, xkey = jax.random.split(key)
    model = DenseNetPallas(
        pkey,
        input_size=64,
        in_channels=1,
        kernels=[[3], [3]],
        layer_dilations=[[1], [2]],
        channel_per_kernel=[8, 8],
        n_classes=2,
        low_conv_cfg=[8, 'M', 16],
        low_conv_kernels=[5, 3],
        low_conv_strides=None,            # -> [1, 1]
        low_conv_pooling_kernels=None,    # -> [2]
        n_blocks=[2, 2],
        reduction=0.5,
        n_growth_rate=4,
        transition_pooling=[2, 2],
        skip_final_transition_blk=False,
    )
    # input in PyTorch NCL layout: (batch=2, channels=1, length=64)
    x = jax.random.normal(xkey, (2, 1, 64), dtype=DTYPE)
    out = jax.block_until_ready(jax.jit(model.__call__)(x))
    assert out.shape == (2, 2) and out.dtype == DTYPE
    assert bool(jnp.all(jnp.isfinite(out)))
    print("KERNEL_OK")
</pallas_src>

<mosaic_0001>
module attributes {stable_mosaic.version = 11 : i64} {
  func.func @kernel(%arg0: memref<2x64x1xf32, #tpu.memory_space<vmem>>, %arg1: memref<5x8xbf16, #tpu.memory_space<vmem>>, %arg2: memref<3x8xf32, #tpu.memory_space<vmem>>, %arg3: memref<24x16xbf16, #tpu.memory_space<vmem>>, %arg4: memref<3x16xf32, #tpu.memory_space<vmem>>, %arg5: memref<2x16xf32, #tpu.memory_space<vmem>>, %arg6: memref<16x32xbf16, #tpu.memory_space<vmem>>, %arg7: memref<2x32xf32, #tpu.memory_space<vmem>>, %arg8: memref<96x8xbf16, #tpu.memory_space<vmem>>, %arg9: memref<2x24xf32, #tpu.memory_space<vmem>>, %arg10: memref<24x32xbf16, #tpu.memory_space<vmem>>, %arg11: memref<2x32xf32, #tpu.memory_space<vmem>>, %arg12: memref<96x8xbf16, #tpu.memory_space<vmem>>, %arg13: memref<2x32xf32, #tpu.memory_space<vmem>>, %arg14: memref<32x16xbf16, #tpu.memory_space<vmem>>, %arg15: memref<2x16xf32, #tpu.memory_space<vmem>>, %arg16: memref<16x32xbf16, #tpu.memory_space<vmem>>, %arg17: memref<2x32xf32, #tpu.memory_space<vmem>>, %arg18: memref<96x8xbf16, #tpu.memory_space<vmem>>, %arg19: memref<2x24xf32, #tpu.memory_space<vmem>>, %arg20: memref<24x32xbf16, #tpu.memory_space<vmem>>, %arg21: memref<2x32xf32, #tpu.memory_space<vmem>>, %arg22: memref<96x8xbf16, #tpu.memory_space<vmem>>, %arg23: memref<2x32xf32, #tpu.memory_space<vmem>>, %arg24: memref<32x16xbf16, #tpu.memory_space<vmem>>, %arg25: memref<16x2xf32, #tpu.memory_space<vmem>>, %arg26: memref<1x2xf32, #tpu.memory_space<vmem>>, %arg27: memref<2x2xf32, #tpu.memory_space<vmem>>, %arg28: memref<2x32x32xf32, #tpu.memory_space<vmem>>, %arg29: memref<2x74x32xf32, #tpu.memory_space<vmem>>, %arg30: memref<2x64x96xf32, #tpu.memory_space<vmem>>) attributes {dimension_semantics = [], scalar_prefetch = 0 : i64, scratch_operands = 3 : i64, tpu.core_type = #tpu.core_type<tc>} {
    %c0 = arith.constant 0 : index
    %c0_0 = arith.constant 0 : index
    %c0_1 = arith.constant 0 : index
    %0 = vector.load %arg0[%c0, %c0_0, %c0_1] : memref<2x64x1xf32, #tpu.memory_space<vmem>>, vector<2x64x1xf32>
    %c0_2 = arith.constant 0 : index
    %c0_3 = arith.constant 0 : index
    %1 = vector.load %arg2[%c0_2, %c0_3] : memref<3x8xf32, #tpu.memory_space<vmem>>, vector<1x8xf32>
    %cst = arith.constant 0.000000e+00 : f32
    %2 = vector.broadcast %cst : f32 to vector<2x8x1xf32>
    %c0_4 = arith.constant 0 : index
    %c0_5 = arith.constant 0 : index
    %c0_6 = arith.constant 0 : index
    %3 = vector.load %arg29[%c0_4, %c0_5, %c0_6] : memref<2x74x32xf32, #tpu.memory_space<vmem>>, vector<2x8x1xf32>
    tpu.vector_store %arg29[%c0_4, %c0_5, %c0_6], %2 {strides = array<i32>} : memref<2x74x32xf32, #tpu.memory_space<vmem>>, vector<2x8x1xf32>,
    %cst_7 = arith.constant 0.000000e+00 : f32
    %4 = vector.broadcast %cst_7 : f32 to vector<2x2x1xf32>
    %c0_8 = arith.constant 0 : index
    %c72 = arith.constant 72 : index
    %c0_9 = arith.constant 0 : index
    %5 = vector.load %arg29[%c0_8, %c72, %c0_9] : memref<2x74x32xf32, #tpu.memory_space<vmem>>, vector<2x2x1xf32>
    tpu.vector_store %arg29[%c0_8, %c72, %c0_9], %4 {strides = array<i32>} : memref<2x74x32xf32, #tpu.memory_space<vmem>>, vector<2x2x1xf32>,
    %c0_10 = arith.constant 0 : index
    %c8 = arith.constant 8 : index
    %c0_11 = arith.constant 0 : index
    %6 = vector.load %arg29[%c0_10, %c8, %c0_11] : memref<2x74x32xf32, #tpu.memory_space<vmem>>, vector<2x64x1xf32>
    tpu.vector_store %arg29[%c0_10, %c8, %c0_11], %0 {strides = array<i32>} : memref<2x74x32xf32, #tpu.memory_space<vmem>>, vector<2x64x1xf32>,
    %c0_12 = arith.constant 0 : index
    %c6 = arith.constant 6 : index
    %c0_13 = arith.constant 0 : index
    %7 = vector.load %arg29[%c0_12, %c6, %c0_13] : memref<2x74x32xf32, #tpu.memory_space<vmem>>, vector<2x64x1xf32>
    %c0_14 = arith.constant 0 : index
    %c0_15 = arith.constant 0 : index
    %c0_16 = arith.constant 0 : index
    %8 = vector.load %arg30[%c0_14, %c0_15, %c0_16] : memref<2x64x96xf32, #tpu.memory_space<vmem>>, vector<2x64x1xf32>
    tpu.vector_store %arg30[%c0_14, %c0_15, %c0_16], %7 {strides = array<i32>} : memref<2x64x96xf32, #tpu.memory_space<vmem>>, vector<2x64x1xf32>,
    %c0_17 = arith.constant 0 : index
    %c7 = arith.constant 7 : index
    %c0_18 = arith.constant 0 : index
    %9 = vector.load %arg29[%c0_17, %c7, %c0_18] : memref<2x74x32xf32, #tpu.memory_space<vmem>>, vector<2x64x1xf32>
    %c0_19 = arith.constant 0 : index
    %c0_20 = arith.constant 0 : index
    %c1 = arith.constant 1 : index
    %10 = vector.load %arg30[%c0_19, %c0_20, %c1] : memref<2x64x96xf32, #tpu.memory_space<vmem>>, vector<2x64x1xf32>
    tpu.vector_store %arg30[%c0_19, %c0_20, %c1], %9 {strides = array<i32>} : memref<2x64x96xf32, #tpu.memory_space<vmem>>, vector<2x64x1xf32>,
    %c0_21 = arith.constant 0 : index
    %c8_22 = arith.constant 8 : index
    %c0_23 = arith.constant 0 : index
    %11 = vector.load %arg29[%c0_21, %c8_22, %c0_23] : memref<2x74x32xf32, #tpu.memory_space<vmem>>, vector<2x64x1xf32>
    %c0_24 = arith.constant 0 : index
    %c0_25 = arith.constant 0 : index
    %c2 = arith.constant 2 : index
    %12 = vector.load %arg30[%c0_24, %c0_25, %c2] : memref<2x64x96xf32, #tpu.memory_space<vmem>>, vector<2x64x1xf32>
    tpu.vector_store %arg30[%c0_24, %c0_25, %c2], %11 {strides = array<i32>} : memref<2x64x96xf32, #tpu.memory_space<vmem>>, vector<2x64x1xf32>,
    %c0_26 = arith.constant 0 : index
    %c9 = arith.constant 9 : index
    %c0_27 = arith.constant 0 : index
    %13 = vector.load %arg29[%c0_26, %c9, %c0_27] : memref<2x74x32xf32, #tpu.memory_space<vmem>>, vector<2x64x1xf32>
    %c0_28 = arith.constant 0 : index
    %c0_29 = arith.constant 0 : index
    %c3 = arith.constant 3 : index
    %14 = vector.load %arg30[%c0_28, %c0_29, %c3] : memref<2x64x96xf32, #tpu.memory_space<vmem>>, vector<2x64x1xf32>
    tpu.vector_store %arg30[%c0_28, %c0_29, %c3], %13 {strides = array<i32>} : memref<2x64x96xf32, #tpu.memory_space<vmem>>, vector<2x64x1xf32>,
    %c0_30 = arith.constant 0 : index
    %c10 = arith.constant 10 : index
    %c0_31 = arith.constant 0 : index
    %15 = vector.load %arg29[%c0_30, %c10, %c0_31] : memref<2x74x32xf32, #tpu.memory_space<vmem>>, vector<2x64x1xf32>
    %c0_32 = arith.constant 0 : index
    %c0_33 = arith.constant 0 : index
    %c4 = arith.constant 4 : index
    %16 = vector.load %arg30[%c0_32, %c0_33, %c4] : memref<2x64x96xf32, #tpu.memory_space<vmem>>, vector<2x64x1xf32>
    tpu.vector_store %arg30[%c0_32, %c0_33, %c4], %15 {strides = array<i32>} : memref<2x64x96xf32, #tpu.memory_space<vmem>>, vector<2x64x1xf32>,
    %c0_34 = arith.constant 0 : index
    %c0_35 = arith.constant 0 : index
    %c0_36 = arith.constant 0 : index
    %17 = vector.load %arg30[%c0_34, %c0_35, %c0_36] : memref<2x64x96xf32, #tpu.memory_space<vmem>>, vector<2x64x5xf32>
    %18 = vector.shape_cast %17 : vector<2x64x5xf32> to vector<128x5xf32>
    %19 = arith.truncf %18 : vector<128x5xf32> to vector<128x5xbf16>
    %c0_37 = arith.constant 0 : index
    %c0_38 = arith.constant 0 : index
    %20 = vector.load %arg1[%c0_37, %c0_38] : memref<5x8xbf16, #tpu.memory_space<vmem>>, vector<5x8xbf16>
    %cst_39 = arith.constant dense<0.000000e+00> : vector<128x8xf32>
    %21 = tpu.matmul %19, %20, %cst_39 {dimension_numbers = #tpu.dot_dimension_numbers<[1], [0], [0], [1], [0, 0, 1, 1], [], []>} : vector<128x5xbf16>, vector<5x8xbf16>, vector<128x8xf32> -> vector<128x8xf32>
    %22 = vector.broadcast %1 : vector<1x8xf32> to vector<128x8xf32>
    %23 = arith.addf %21, %22 : vector<128x8xf32>
    %24 = vector.shape_cast %23 : vector<128x8xf32> to vector<2x64x8xf32>
    %c1_40 = arith.constant 1 : index
    %c0_41 = arith.constant 0 : index
    %25 = vector.load %arg2[%c1_40, %c0_41] : memref<3x8xf32, #tpu.memory_space<vmem>>, vector<1x8xf32>
    %c2_42 = arith.constant 2 : index
    %c0_43 = arith.constant 0 : index
    %26 = vector.load %arg2[%c2_42, %c0_43] : memref<3x8xf32, #tpu.memory_space<vmem>>, vector<1x8xf32>
    %27 = vector.shape_cast %24 : vector<2x64x8xf32> to vector<128x8xf32>
    %cst_44 = arith.constant dense<0.000000e+00> : vector<8xf32>
    %28 = vector.multi_reduction <add>, %27, %cst_44 [0] : vector<128x8xf32> to vector<8xf32>
    %29 = vector.shape_cast %28 : vector<8xf32> to vector<1x8xf32>
    %cst_45 = arith.constant 1.280000e+02 : f32
    %30 = vector.broadcast %cst_45 : f32 to vector<1x8xf32>
    %31 = arith.divf %29, %30 : vector<1x8xf32>
    %32 = vector.broadcast %31 : vector<1x8xf32> to vector<128x8xf32>
    %33 = arith.subf %27, %32 : vector<128x8xf32>
    %34 = arith.mulf %33, %33 : vector<128x8xf32>
    %cst_46 = arith.constant dense<0.000000e+00> : vector<8xf32>
    %35 = vector.multi_reduction <add>, %34, %cst_46 [0] : vector<128x8xf32> to vector<8xf32>
    %36 = vector.shape_cast %35 : vector<8xf32> to vector<1x8xf32>
    %cst_47 = arith.constant 1.280000e+02 : f32
    %37 = vector.broadcast %cst_47 : f32 to vector<1x8xf32>
    %38 = arith.divf %36, %37 : vector<1x8xf32>
    %cst_48 = arith.constant 9.99999974E-6 : f32
    %39 = vector.broadcast %cst_48 : f32 to vector<1x8xf32>
    %40 = arith.addf %38, %39 : vector<1x8xf32>
    %41 = math.rsqrt %40 : vector<1x8xf32>
    %42 = arith.mulf %41, %25 : vector<1x8xf32>
    %43 = vector.broadcast %42 : vector<1x8xf32> to vector<128x8xf32>
    %44 = arith.mulf %33, %43 : vector<128x8xf32>
    %45 = vector.broadcast %26 : vector<1x8xf32> to vector<128x8xf32>
    %46 = arith.addf %44, %45 : vector<128x8xf32>
    %cst_49 = arith.constant 0.000000e+00 : f32
    %47 = vector.broadcast %cst_49 : f32 to vector<128x8xf32>
    %48 = arith.maximumf %46, %47 : vector<128x8xf32>
    %49 = vector.shape_cast %48 : vector<128x8xf32> to vector<2x64x8xf32>
    %c0_50 = arith.constant 0 : index
    %c0_51 = arith.constant 0 : index
    %c0_52 = arith.constant 0 : index
    %50 = vector.load %arg29[%c0_50, %c0_51, %c0_52] : memref<2x74x32xf32, #tpu.memory_space<vmem>>, vector<2x64x8xf32>
    tpu.vector_store %arg29[%c0_50, %c0_51, %c0_52], %49 {strides = array<i32>} : memref<2x74x32xf32, #tpu.memory_space<vmem>>, vector<2x64x8xf32>,
    %c0_53 = arith.constant 0 : index
    %c0_54 = arith.constant 0 : index
    %c0_55 = arith.constant 0 : index
    %51 = tpu.strided_load %arg29[%c0_53, %c0_54, %c0_55] {strides = array<i32: 1, 2, 1>} : memref<2x74x32xf32, #tpu.memory_space<vmem>>, vector<2x32x32xf32>
    %c0_56 = arith.constant 0 : index
    %c1_57 = arith.constant 1 : index
    %c0_58 = arith.constant 0 : index
    %52 = tpu.strided_load %arg29[%c0_56, %c1_57, %c0_58] {strides = array<i32: 1, 2, 1>} : memref<2x74x32xf32, #tpu.memory_space<vmem>>, vector<2x32x32xf32>
    %53 = arith.maximumf %51, %52 : vector<2x32x32xf32>
    %54 = vector.extract_strided_slice %53 {offsets = [0, 0, 0], sizes = [2, 32, 8], strides = [1, 1, 1]} : vector<2x32x32xf32> to vector<2x32x8xf32>
    %c0_59 = arith.constant 0 : index
    %c0_60 = arith.constant 0 : index
    %55 = vector.load %arg4[%c0_59, %c0_60] : memref<3x16xf32, #tpu.memory_space<vmem>>, vector<1x16xf32>
    %cst_61 = arith.constant 0.000000e+00 : f32
    %56 = vector.broadcast %cst_61 : f32 to vector<2x8x8xf32>
    %c0_62 = arith.constant 0 : index
    %c0_63 = arith.constant 0 : index
    %c0_64 = arith.constant 0 : index
    %57 = vector.load %arg29[%c0_62, %c0_63, %c0_64] : memref<2x74x32xf32, #tpu.memory_space<vmem>>, vector<2x8x8xf32>
    tpu.vector_store %arg29[%c0_62, %c0_63, %c0_64], %56 {strides = array<i32>} : memref<2x74x32xf32, #tpu.memory_space<vmem>>, vector<2x8x8xf32>,
    %cst_65 = arith.constant 0.000000e+00 : f32
    %58 = vector.broadcast %cst_65 : f32 to vector<2x1x8xf32>
    %c0_66 = arith.constant 0 : index
    %c40 = arith.constant 40 : index
    %c0_67 = arith.constant 0 : index
    %59 = vector.load %arg29[%c0_66, %c40, %c0_67] : memref<2x74x32xf32, #tpu.memory_space<vmem>>, vector<2x1x8xf32>
    tpu.vector_store %arg29[%c0_66, %c40, %c0_67], %58 {strides = array<i32>} : memref<2x74x32xf32, #tpu.memory_space<vmem>>, vector<2x1x8xf32>,
    %c0_68 = arith.constant 0 : index
    %c8_69 = arith.constant 8 : index
    %c0_70 = arith.constant 0 : index
    %60 = vector.load %arg29[%c0_68, %c8_69, %c0_70] : memref<2x74x32xf32, #tpu.memory_space<vmem>>, vector<2x32x8xf32>
    tpu.vector_store %arg29[%c0_68, %c8_69, %c0_70], %54 {strides = array<i32>} : memref<2x74x32xf32, #tpu.memory_space<vmem>>, vector<2x32x8xf32>,
    %c0_71 = arith.constant 0 : index
    %c7_72 = arith.constant 7 : index
    %c0_73 = arith.constant 0 : index
    %61 = vector.load %arg29[%c0_71, %c7_72, %c0_73] : memref<2x74x32xf32, #tpu.memory_space<vmem>>, vector<2x32x8xf32>
    %c0_74 = arith.constant 0 : index
    %c0_75 = arith.constant 0 : index
    %c0_76 = arith.constant 0 : index
    %62 = vector.load %arg30[%c0_74, %c0_75, %c0_76] : memref<2x64x96xf32, #tpu.memory_space<vmem>>, vector<2x32x8xf32>
    tpu.vector_store %arg30[%c0_74, %c0_75, %c0_76], %61 {strides = array<i32>} : memref<2x64x96xf32, #tpu.memory_space<vmem>>, vector<2x32x8xf32>,
    %c0_77 = arith.constant 0 : index
    %c8_78 = arith.constant 8 : index
    %c0_79 = arith.constant 0 : index
    %63 = vector.load %arg29[%c0_77, %c8_78, %c0_79] : memref<2x74x32xf32, #tpu.memory_space<vmem>>, vector<2x32x8xf32>
    %c0_80 = arith.constant 0 : index
    %c0_81 = arith.constant 0 : index
    %c8_82 = arith.constant 8 : index
    %64 = vector.load %arg30[%c0_80, %c0_81, %c8_82] : memref<2x64x96xf32, #tpu.memory_space<vmem>>, vector<2x32x8xf32>
    tpu.vector_store %arg30[%c0_80, %c0_81, %c8_82], %63 {strides = array<i32>} : memref<2x64x96xf32, #tpu.memory_space<vmem>>, vector<2x32x8xf32>,
    %c0_83 = arith.constant 0 : index
    %c9_84 = arith.constant 9 : index
    %c0_85 = arith.constant 0 : index
    %65 = vector.load %arg29[%c0_83, %c9_84, %c0_85] : memref<2x74x32xf32, #tpu.memory_space<vmem>>, vector<2x32x8xf32>
    %c0_86 = arith.constant 0 : index
    %c0_87 = arith.constant 0 : index
    %c16 = arith.constant 16 : index
    %66 = vector.load %arg30[%c0_86, %c0_87, %c16] : memref<2x64x96xf32, #tpu.memory_space<vmem>>, vector<2x32x8xf32>
    tpu.vector_store %arg30[%c0_86, %c0_87, %c16], %65 {strides = array<i32>} : memref<2x64x96xf32, #tpu.memory_space<vmem>>, vector<2x32x8xf32>,
    %c0_88 = arith.constant 0 : index
    %c0_89 = arith.constant 0 : index
    %c0_90 = arith.constant 0 : index
    %67 = vector.load %arg30[%c0_88, %c0_89, %c0_90] : memref<2x64x96xf32, #tpu.memory_space<vmem>>, vector<2x32x24xf32>
    %68 = vector.shape_cast %67 : vector<2x32x24xf32> to vector<64x24xf32>
    %69 = arith.truncf %68 : vector<64x24xf32> to vector<64x24xbf16>
    %c0_91 = arith.constant 0 : index
    %c0_92 = arith.constant 0 : index
    %70 = vector.load %arg3[%c0_91, %c0_92] : memref<24x16xbf16, #tpu.memory_space<vmem>>, vector<24x16xbf16>
    %cst_93 = arith.constant dense<0.000000e+00> : vector<64x16xf32>
    %71 = tpu.matmul %69, %70, %cst_93 {dimension_numbers = #tpu.dot_dimension_numbers<[1], [0], [0], [1], [0, 0, 1, 1], [], []>} : vector<64x24xbf16>, vector<24x16xbf16>, vector<64x16xf32> -> vector<64x16xf32>
    %72 = vector.broadcast %55 : vector<1x16xf32> to vector<64x16xf32>
    %73 = arith.addf %71, %72 : vector<64x16xf32>
    %74 = vector.shape_cast %73 : vector<64x16xf32> to vector<2x32x16xf32>
    %c1_94 = arith.constant 1 : index
    %c0_95 = arith.constant 0 : index
    %75 = vector.load %arg4[%c1_94, %c0_95] : memref<3x16xf32, #tpu.memory_space<vmem>>, vector<1x16xf32>
    %c2_96 = arith.constant 2 : index
    %c0_97 = arith.constant 0 : index
    %76 = vector.load %arg4[%c2_96, %c0_97] : memref<3x16xf32, #tpu.memory_space<vmem>>, vector<1x16xf32>
    %77 = vector.shape_cast %74 : vector<2x32x16xf32> to vector<64x16xf32>
    %cst_98 = arith.constant dense<0.000000e+00> : vector<16xf32>
    %78 = vector.multi_reduction <add>, %77, %cst_98 [0] : vector<64x16xf32> to vector<16xf32>
    %79 = vector.shape_cast %78 : vector<16xf32> to vector<1x16xf32>
    %cst_99 = arith.constant 6.400000e+01 : f32
    %80 = vector.broadcast %cst_99 : f32 to vector<1x16xf32>
    %81 = arith.divf %79, %80 : vector<1x16xf32>
    %82 = vector.broadcast %81 : vector<1x16xf32> to vector<64x16xf32>
    %83 = arith.subf %77, %82 : vector<64x16xf32>
    %84 = arith.mulf %83, %83 : vector<64x16xf32>
    %cst_100 = arith.constant dense<0.000000e+00> : vector<16xf32>
    %85 = vector.multi_reduction <add>, %84, %cst_100 [0] : vector<64x16xf32> to vector<16xf32>
    %86 = vector.shape_cast %85 : vector<16xf32> to vector<1x16xf32>
    %cst_101 = arith.constant 6.400000e+01 : f32
    %87 = vector.broadcast %cst_101 : f32 to vector<1x16xf32>
    %88 = arith.divf %86, %87 : vector<1x16xf32>
    %cst_102 = arith.constant 9.99999974E-6 : f32
    %89 = vector.broadcast %cst_102 : f32 to vector<1x16xf32>
    %90 = arith.addf %88, %89 : vector<1x16xf32>
    %91 = math.rsqrt %90 : vector<1x16xf32>
    %92 = arith.mulf %91, %75 : vector<1x16xf32>
    %93 = vector.broadcast %92 : vector<1x16xf32> to vector<64x16xf32>
    %94 = arith.mulf %83, %93 : vector<64x16xf32>
    %95 = vector.broadcast %76 : vector<1x16xf32> to vector<64x16xf32>
    %96 = arith.addf %94, %95 : vector<64x16xf32>
    %cst_103 = arith.constant 0.000000e+00 : f32
    %97 = vector.broadcast %cst_103 : f32 to vector<64x16xf32>
    %98 = arith.maximumf %96, %97 : vector<64x16xf32>
    %99 = vector.shape_cast %98 : vector<64x16xf32> to vector<2x32x16xf32>
    %c0_104 = arith.constant 0 : index
    %c0_105 = arith.constant 0 : index
    %c0_106 = arith.constant 0 : index
    %100 = vector.load %arg28[%c0_104, %c0_105, %c0_106] : memref<2x32x32xf32, #tpu.memory_space<vmem>>, vector<2x32x16xf32>
    tpu.vector_store %arg28[%c0_104, %c0_105, %c0_106], %99 {strides = array<i32>} : memref<2x32x32xf32, #tpu.memory_space<vmem>>, vector<2x32x16xf32>,
    %c0_107 = arith.constant 0 : index
    %c0_108 = arith.constant 0 : index
    %c0_109 = arith.constant 0 : index
    %101 = vector.load %arg28[%c0_107, %c0_108, %c0_109] : memref<2x32x32xf32, #tpu.memory_space<vmem>>, vector<2x32x16xf32>
    %c0_110 = arith.constant 0 : index
    %c0_111 = arith.constant 0 : index
    %102 = vector.load %arg5[%c0_110, %c0_111] : memref<2x16xf32, #tpu.memory_space<vmem>>, vector<1x16xf32>
    %c1_112 = arith.constant 1 : index
    %c0_113 = arith.constant 0 : index
    %103 = vector.load %arg5[%c1_112, %c0_113] : memref<2x16xf32, #tpu.memory_space<vmem>>, vector<1x16xf32>
    %104 = vector.shape_cast %101 : vector<2x32x16xf32> to vector<64x16xf32>
    %cst_114 = arith.constant dense<0.000000e+00> : vector<16xf32>
    %105 = vector.multi_reduction <add>, %104, %cst_114 [0] : vector<64x16xf32> to vector<16xf32>
    %106 = vector.shape_cast %105 : vector<16xf32> to vector<1x16xf32>
    %cst_115 = arith.constant 6.400000e+01 : f32
    %107 = vector.broadcast %cst_115 : f32 to vector<1x16xf32>
    %108 = arith.divf %106, %107 : vector<1x16xf32>
    %109 = vector.broadcast %108 : vector<1x16xf32> to vector<64x16xf32>
    %110 = arith.subf %104, %109 : vector<64x16xf32>
    %111 = arith.mulf %110, %110 : vector<64x16xf32>
    %cst_116 = arith.constant dense<0.000000e+00> : vector<16xf32>
    %112 = vector.multi_reduction <add>, %111, %cst_116 [0] : vector<64x16xf32> to vector<16xf32>
    %113 = vector.shape_cast %112 : vector<16xf32> to vector<1x16xf32>
    %cst_117 = arith.constant 6.400000e+01 : f32
    %114 = vector.broadcast %cst_117 : f32 to vector<1x16xf32>
    %115 = arith.divf %113, %114 : vector<1x16xf32>
    %cst_118 = arith.constant 9.99999974E-6 : f32
    %116 = vector.broadcast %cst_118 : f32 to vector<1x16xf32>
    %117 = arith.addf %115, %116 : vector<1x16xf32>
    %118 = math.rsqrt %117 : vector<1x16xf32>
    %119 = arith.mulf %118, %102 : vector<1x16xf32>
    %120 = vector.broadcast %119 : vector<1x16xf32> to vector<64x16xf32>
    %121 = arith.mulf %110, %120 : vector<64x16xf32>
    %122 = vector.broadcast %103 : vector<1x16xf32> to vector<64x16xf32>
    %123 = arith.addf %121, %122 : vector<64x16xf32>
    %cst_119 = arith.constant 0.000000e+00 : f32
    %124 = vector.broadcast %cst_119 : f32 to vector<64x16xf32>
    %125 = arith.maximumf %123, %124 : vector<64x16xf32>
    %126 = vector.shape_cast %125 : vector<64x16xf32> to vector<2x32x16xf32>
    %127 = vector.shape_cast %126 : vector<2x32x16xf32> to vector<64x16xf32>
    %128 = arith.truncf %127 : vector<64x16xf32> to vector<64x16xbf16>
    %c0_120 = arith.constant 0 : index
    %c0_121 = arith.constant 0 : index
    %129 = vector.load %arg6[%c0_120, %c0_121] : memref<16x32xbf16, #tpu.memory_space<vmem>>, vector<16x32xbf16>
    %cst_122 = arith.constant dense<0.000000e+00> : vector<64x32xf32>
    %130 = tpu.matmul %128, %129, %cst_122 {dimension_numbers = #tpu.dot_dimension_numbers<[1], [0], [0], [1], [0, 0, 1, 1], [], []>} : vector<64x16xbf16>, vector<16x32xbf16>, vector<64x32xf32> -> vector<64x32xf32>
    %131 = vector.shape_cast %130 : vector<64x32xf32> to vector<2x32x32xf32>
    %c0_123 = arith.constant 0 : index
    %c0_124 = arith.constant 0 : index
    %132 = vector.load %arg7[%c0_123, %c0_124] : memref<2x32xf32, #tpu.memory_space<vmem>>, vector<1x32xf32>
    %c1_125 = arith.constant 1 : index
    %c0_126 = arith.constant 0 : index
    %133 = vector.load %arg7[%c1_125, %c0_126] : memref<2x32xf32, #tpu.memory_space<vmem>>, vector<1x32xf32>
    %134 = vector.shape_cast %131 : vector<2x32x32xf32> to vector<64x32xf32>
    %cst_127 = arith.constant dense<0.000000e+00> : vector<32xf32>
    %135 = vector.multi_reduction <add>, %134, %cst_127 [0] : vector<64x32xf32> to vector<32xf32>
    %136 = vector.shape_cast %135 : vector<32xf32> to vector<1x32xf32>
    %cst_128 = arith.constant 6.400000e+01 : f32
    %137 = vector.broadcast %cst_128 : f32 to vector<1x32xf32>
    %138 = arith.divf %136, %137 : vector<1x32xf32>
    %139 = vector.broadcast %138 : vector<1x32xf32> to vector<64x32xf32>
    %140 = arith.subf %134, %139 : vector<64x32xf32>
    %141 = arith.mulf %140, %140 : vector<64x32xf32>
    %cst_129 = arith.constant dense<0.000000e+00> : vector<32xf32>
    %142 = vector.multi_reduction <add>, %141, %cst_129 [0] : vector<64x32xf32> to vector<32xf32>
    %143 = vector.shape_cast %142 : vector<32xf32> to vector<1x32xf32>
    %cst_130 = arith.constant 6.400000e+01 : f32
    %144 = vector.broadcast %cst_130 : f32 to vector<1x32xf32>
    %145 = arith.divf %143, %144 : vector<1x32xf32>
    %cst_131 = arith.constant 9.99999974E-6 : f32
    %146 = vector.broadcast %cst_131 : f32 to vector<1x32xf32>
    %147 = arith.addf %145, %146 : vector<1x32xf32>
    %148 = math.rsqrt %147 : vector<1x32xf32>
    %149 = arith.mulf %148, %132 : vector<1x32xf32>
    %150 = vector.broadcast %149 : vector<1x32xf32> to vector<64x32xf32>
    %151 = arith.mulf %140, %150 : vector<64x32xf32>
    %152 = vector.broadcast %133 : vector<1x32xf32> to vector<64x32xf32>
    %153 = arith.addf %151, %152 : vector<64x32xf32>
    %cst_132 = arith.constant 0.000000e+00 : f32
    %154 = vector.broadcast %cst_132 : f32 to vector<64x32xf32>
    %155 = arith.maximumf %153, %154 : vector<64x32xf32>
    %156 = vector.shape_cast %155 : vector<64x32xf32> to vector<2x32x32xf32>
    %cst_133 = arith.constant 0.000000e+00 : f32
    %157 = vector.broadcast %cst_133 : f32 to vector<2x8x32xf32>
    %c0_134 = arith.constant 0 : index
    %c0_135 = arith.constant 0 : index
    %c0_136 = arith.constant 0 : index
    %158 = vector.load %arg29[%c0_134, %c0_135, %c0_136] : memref<2x74x32xf32, #tpu.memory_space<vmem>>, vector<2x8x32xf32>
    tpu.vector_store %arg29[%c0_134, %c0_135, %c0_136], %157 {strides = array<i32>} : memref<2x74x32xf32, #tpu.memory_space<vmem>>, vector<2x8x32xf32>,
    %cst_137 = arith.constant 0.000000e+00 : f32
    %159 = vector.broadcast %cst_137 : f32 to vector<2x1x32xf32>
    %c0_138 = arith.constant 0 : index
    %c40_139 = arith.constant 40 : index
    %c0_140 = arith.constant 0 : index
    %160 = vector.load %arg29[%c0_138, %c40_139, %c0_140] : memref<2x74x32xf32, #tpu.memory_space<vmem>>, vector<2x1x32xf32>
    tpu.vector_store %arg29[%c0_138, %c40_139, %c0_140], %159 {strides = array<i32>} : memref<2x74x32xf32, #tpu.memory_space<vmem>>, vector<2x1x32xf32>,
    %c0_141 = arith.constant 0 : index
    %c8_142 = arith.constant 8 : index
    %c0_143 = arith.constant 0 : index
    %161 = vector.load %arg29[%c0_141, %c8_142, %c0_143] : memref<2x74x32xf32, #tpu.memory_space<vmem>>, vector<2x32x32xf32>
    tpu.vector_store %arg29[%c0_141, %c8_142, %c0_143], %156 {strides = array<i32>} : memref<2x74x32xf32, #tpu.memory_space<vmem>>, vector<2x32x32xf32>,
    %c0_144 = arith.constant 0 : index
    %c7_145 = arith.constant 7 : index
    %c0_146 = arith.constant 0 : index
    %162 = vector.load %arg29[%c0_144, %c7_145, %c0_146] : memref<2x74x32xf32, #tpu.memory_space<vmem>>, vector<2x32x32xf32>
    %c0_147 = arith.constant 0 : index
    %c0_148 = arith.constant 0 : index
    %c0_149 = arith.constant 0 : index
    %163 = vector.load %arg30[%c0_147, %c0_148, %c0_149] : memref<2x64x96xf32, #tpu.memory_space<vmem>>, vector<2x32x32xf32>
    tpu.vector_store %arg30[%c0_147, %c0_148, %c0_149], %162 {strides = array<i32>} : memref<2x64x96xf32, #tpu.memory_space<vmem>>, vector<2x32x32xf32>,
    %c0_150 = arith.constant 0 : index
    %c8_151 = arith.constant 8 : index
    %c0_152 = arith.constant 0 : index
    %164 = vector.load %arg29[%c0_150, %c8_151, %c0_152] : memref<2x74x32xf32, #tpu.memory_space<vmem>>, vector<2x32x32xf32>
    %c0_153 = arith.constant 0 : index
    %c0_154 = arith.constant 0 : index
    %c32 = arith.constant 32 : index
    %165 = vector.load %arg30[%c0_153, %c0_154, %c32] : memref<2x64x96xf32, #tpu.memory_space<vmem>>, vector<2x32x32xf32>
    tpu.vector_store %arg30[%c0_153, %c0_154, %c32], %164 {strides = array<i32>} : memref<2x64x96xf32, #tpu.memory_space<vmem>>, vector<2x32x32xf32>,
    %c0_155 = arith.constant 0 : index
    %c9_156 = arith.constant 9 : index
    %c0_157 = arith.constant 0 : index
    %166 = vector.load %arg29[%c0_155, %c9_156, %c0_157] : memref<2x74x32xf32, #tpu.memory_space<vmem>>, vector<2x32x32xf32>
    %c0_158 = arith.constant 0 : index
    %c0_159 = arith.constant 0 : index
    %c64 = arith.constant 64 : index
    %167 = vector.load %arg30[%c0_158, %c0_159, %c64] : memref<2x64x96xf32, #tpu.memory_space<vmem>>, vector<2x32x32xf32>
    tpu.vector_store %arg30[%c0_158, %c0_159, %c64], %166 {strides = array<i32>} : memref<2x64x96xf32, #tpu.memory_space<vmem>>, vector<2x32x32xf32>,
    %c0_160 = arith.constant 0 : index
    %c0_161 = arith.constant 0 : index
    %c0_162 = arith.constant 0 : index
    %168 = vector.load %arg30[%c0_160, %c0_161, %c0_162] : memref<2x64x96xf32, #tpu.memory_space<vmem>>, vector<2x32x96xf32>
    %169 = vector.shape_cast %168 : vector<2x32x96xf32> to vector<64x96xf32>
    %170 = arith.truncf %169 : vector<64x96xf32> to vector<64x96xbf16>
    %c0_163 = arith.constant 0 : index
    %c0_164 = arith.constant 0 : index
    %171 = vector.load %arg8[%c0_163, %c0_164] : memref<96x8xbf16, #tpu.memory_space<vmem>>, vector<96x8xbf16>
    %cst_165 = arith.constant dense<0.000000e+00> : vector<64x8xf32>
    %172 = tpu.matmul %170, %171, %cst_165 {dimension_numbers = #tpu.dot_dimension_numbers<[1], [0], [0], [1], [0, 0, 1, 1], [], []>} : vector<64x96xbf16>, vector<96x8xbf16>, vector<64x8xf32> -> vector<64x8xf32>
    %173 = vector.shape_cast %172 : vector<64x8xf32> to vector<2x32x8xf32>
    %c0_166 = arith.constant 0 : index
    %c0_167 = arith.constant 0 : index
    %c16_168 = arith.constant 16 : index
    %174 = vector.load %arg28[%c0_166, %c0_167, %c16_168] : memref<2x32x32xf32, #tpu.memory_space<vmem>>, vector<2x32x8xf32>
    tpu.vector_store %arg28[%c0_166, %c0_167, %c16_168], %173 {strides = array<i32>} : memref<2x32x32xf32, #tpu.memory_space<vmem>>, vector<2x32x8xf32>,
    %c0_169 = arith.constant 0 : index
    %c0_170 = arith.constant 0 : index
    %c0_171 = arith.constant 0 : index
    %175 = vector.load %arg28[%c0_169, %c0_170, %c0_171] : memref<2x32x32xf32, #tpu.memory_space<vmem>>, vector<2x32x24xf32>
    %c0_172 = arith.constant 0 : index
    %c0_173 = arith.constant 0 : index
    %176 = vector.load %arg9[%c0_172, %c0_173] : memref<2x24xf32, #tpu.memory_space<vmem>>, vector<1x24xf32>
    %c1_174 = arith.constant 1 : index
    %c0_175 = arith.constant 0 : index
    %177 = vector.load %arg9[%c1_174, %c0_175] : memref<2x24xf32, #tpu.memory_space<vmem>>, vector<1x24xf32>
    %178 = vector.shape_cast %175 : vector<2x32x24xf32> to vector<64x24xf32>
    %cst_176 = arith.constant dense<0.000000e+00> : vector<24xf32>
    %179 = vector.multi_reduction <add>, %178, %cst_176 [0] : vector<64x24xf32> to vector<24xf32>
    %180 = vector.shape_cast %179 : vector<24xf32> to vector<1x24xf32>
    %cst_177 = arith.constant 6.400000e+01 : f32
    %181 = vector.broadcast %cst_177 : f32 to vector<1x24xf32>
    %182 = arith.divf %180, %181 : vector<1x24xf32>
    %183 = vector.broadcast %182 : vector<1x24xf32> to vector<64x24xf32>
    %184 = arith.subf %178, %183 : vector<64x24xf32>
    %185 = arith.mulf %184, %184 : vector<64x24xf32>
    %cst_178 = arith.constant dense<0.000000e+00> : vector<24xf32>
    %186 = vector.multi_reduction <add>, %185, %cst_178 [0] : vector<64x24xf32> to vector<24xf32>
    %187 = vector.shape_cast %186 : vector<24xf32> to vector<1x24xf32>
    %cst_179 = arith.constant 6.400000e+01 : f32
    %188 = vector.broadcast %cst_179 : f32 to vector<1x24xf32>
    %189 = arith.divf %187, %188 : vector<1x24xf32>
    %cst_180 = arith.constant 9.99999974E-6 : f32
    %190 = vector.broadcast %cst_180 : f32 to vector<1x24xf32>
    %191 = arith.addf %189, %190 : vector<1x24xf32>
    %192 = math.rsqrt %191 : vector<1x24xf32>
    %193 = arith.mulf %192, %176 : vector<1x24xf32>
    %194 = vector.broadcast %193 : vector<1x24xf32> to vector<64x24xf32>
    %195 = arith.mulf %184, %194 : vector<64x24xf32>
    %196 = vector.broadcast %177 : vector<1x24xf32> to vector<64x24xf32>
    %197 = arith.addf %195, %196 : vector<64x24xf32>
    %cst_181 = arith.constant 0.000000e+00 : f32
    %198 = vector.broadcast %cst_181 : f32 to vector<64x24xf32>
    %199 = arith.maximumf %197, %198 : vector<64x24xf32>
    %200 = vector.shape_cast %199 : vector<64x24xf32> to vector<2x32x24xf32>
    %201 = vector.shape_cast %200 : vector<2x32x24xf32> to vector<64x24xf32>
    %202 = arith.truncf %201 : vector<64x24xf32> to vector<64x24xbf16>
    %c0_182 = arith.constant 0 : index
    %c0_183 = arith.constant 0 : index
    %203 = vector.load %arg10[%c0_182, %c0_183] : memref<24x32xbf16, #tpu.memory_space<vmem>>, vector<24x32xbf16>
    %cst_184 = arith.constant dense<0.000000e+00> : vector<64x32xf32>
    %204 = tpu.matmul %202, %203, %cst_184 {dimension_numbers = #tpu.dot_dimension_numbers<[1], [0], [0], [1], [0, 0, 1, 1], [], []>} : vector<64x24xbf16>, vector<24x32xbf16>, vector<64x32xf32> -> vector<64x32xf32>
    %205 = vector.shape_cast %204 : vector<64x32xf32> to vector<2x32x32xf32>
    %c0_185 = arith.constant 0 : index
    %c0_186 = arith.constant 0 : index
    %206 = vector.load %arg11[%c0_185, %c0_186] : memref<2x32xf32, #tpu.memory_space<vmem>>, vector<1x32xf32>
    %c1_187 = arith.constant 1 : index
    %c0_188 = arith.constant 0 : index
    %207 = vector.load %arg11[%c1_187, %c0_188] : memref<2x32xf32, #tpu.memory_space<vmem>>, vector<1x32xf32>
    %208 = vector.shape_cast %205 : vector<2x32x32xf32> to vector<64x32xf32>
    %cst_189 = arith.constant dense<0.000000e+00> : vector<32xf32>
    %209 = vector.multi_reduction <add>, %208, %cst_189 [0] : vector<64x32xf32> to vector<32xf32>
    %210 = vector.shape_cast %209 : vector<32xf32> to vector<1x32xf32>
    %cst_190 = arith.constant 6.400000e+01 : f32
    %211 = vector.broadcast %cst_190 : f32 to vector<1x32xf32>
    %212 = arith.divf %210, %211 : vector<1x32xf32>
    %213 = vector.broadcast %212 : vector<1x32xf32> to vector<64x32xf32>
    %214 = arith.subf %208, %213 : vector<64x32xf32>
    %215 = arith.mulf %214, %214 : vector<64x32xf32>
    %cst_191 = arith.constant dense<0.000000e+00> : vector<32xf32>
    %216 = vector.multi_reduction <add>, %215, %cst_191 [0] : vector<64x32xf32> to vector<32xf32>
    %217 = vector.shape_cast %216 : vector<32xf32> to vector<1x32xf32>
    %cst_192 = arith.constant 6.400000e+01 : f32
    %218 = vector.broadcast %cst_192 : f32 to vector<1x32xf32>
    %219 = arith.divf %217, %218 : vector<1x32xf32>
    %cst_193 = arith.constant 9.99999974E-6 : f32
    %220 = vector.broadcast %cst_193 : f32 to vector<1x32xf32>
    %221 = arith.addf %219, %220 : vector<1x32xf32>
    %222 = math.rsqrt %221 : vector<1x32xf32>
    %223 = arith.mulf %222, %206 : vector<1x32xf32>
    %224 = vector.broadcast %223 : vector<1x32xf32> to vector<64x32xf32>
    %225 = arith.mulf %214, %224 : vector<64x32xf32>
    %226 = vector.broadcast %207 : vector<1x32xf32> to vector<64x32xf32>
    %227 = arith.addf %225, %226 : vector<64x32xf32>
    %cst_194 = arith.constant 0.000000e+00 : f32
    %228 = vector.broadcast %cst_194 : f32 to vector<64x32xf32>
    %229 = arith.maximumf %227, %228 : vector<64x32xf32>
    %230 = vector.shape_cast %229 : vector<64x32xf32> to vector<2x32x32xf32>
    %cst_195 = arith.constant 0.000000e+00 : f32
    %231 = vector.broadcast %cst_195 : f32 to vector<2x8x32xf32>
    %c0_196 = arith.constant 0 : index
    %c0_197 = arith.constant 0 : index
    %c0_198 = arith.constant 0 : index
    %232 = vector.load %arg29[%c0_196, %c0_197, %c0_198] : memref<2x74x32xf32, #tpu.memory_space<vmem>>, vector<2x8x32xf32>
    tpu.vector_store %arg29[%c0_196, %c0_197, %c0_198], %231 {strides = array<i32>} : memref<2x74x32xf32, #tpu.memory_space<vmem>>, vector<2x8x32xf32>,
    %cst_199 = arith.constant 0.000000e+00 : f32
    %233 = vector.broadcast %cst_199 : f32 to vector<2x1x32xf32>
    %c0_200 = arith.constant 0 : index
    %c40_201 = arith.constant 40 : index
    %c0_202 = arith.constant 0 : index
    %234 = vector.load %arg29[%c0_200, %c40_201, %c0_202] : memref<2x74x32xf32, #tpu.memory_space<vmem>>, vector<2x1x32xf32>
    tpu.vector_store %arg29[%c0_200, %c40_201, %c0_202], %233 {strides = array<i32>} : memref<2x74x32xf32, #tpu.memory_space<vmem>>, vector<2x1x32xf32>,
    %c0_203 = arith.constant 0 : index
    %c8_204 = arith.constant 8 : index
    %c0_205 = arith.constant 0 : index
    %235 = vector.load %arg29[%c0_203, %c8_204, %c0_205] : memref<2x74x32xf32, #tpu.memory_space<vmem>>, vector<2x32x32xf32>
    tpu.vector_store %arg29[%c0_203, %c8_204, %c0_205], %230 {strides = array<i32>} : memref<2x74x32xf32, #tpu.memory_space<vmem>>, vector<2x32x32xf32>,
    %c0_206 = arith.constant 0 : index
    %c7_207 = arith.constant 7 : index
    %c0_208 = arith.constant 0 : index
    %236 = vector.load %arg29[%c0_206, %c7_207, %c0_208] : memref<2x74x32xf32, #tpu.memory_space<vmem>>, vector<2x32x32xf32>
    %c0_209 = arith.constant 0 : index
    %c0_210 = arith.constant 0 : index
    %c0_211 = arith.constant 0 : index
    %237 = vector.load %arg30[%c0_209, %c0_210, %c0_211] : memref<2x64x96xf32, #tpu.memory_space<vmem>>, vector<2x32x32xf32>
    tpu.vector_store %arg30[%c0_209, %c0_210, %c0_211], %236 {strides = array<i32>} : memref<2x64x96xf32, #tpu.memory_space<vmem>>, vector<2x32x32xf32>,
    %c0_212 = arith.constant 0 : index
    %c8_213 = arith.constant 8 : index
    %c0_214 = arith.constant 0 : index
    %238 = vector.load %arg29[%c0_212, %c8_213, %c0_214] : memref<2x74x32xf32, #tpu.memory_space<vmem>>, vector<2x32x32xf32>
    %c0_215 = arith.constant 0 : index
    %c0_216 = arith.constant 0 : index
    %c32_217 = arith.constant 32 : index
    %239 = vector.load %arg30[%c0_215, %c0_216, %c32_217] : memref<2x64x96xf32, #tpu.memory_space<vmem>>, vector<2x32x32xf32>
    tpu.vector_store %arg30[%c0_215, %c0_216, %c32_217], %238 {strides = array<i32>} : memref<2x64x96xf32, #tpu.memory_space<vmem>>, vector<2x32x32xf32>,
    %c0_218 = arith.constant 0 : index
    %c9_219 = arith.constant 9 : index
    %c0_220 = arith.constant 0 : index
    %240 = vector.load %arg29[%c0_218, %c9_219, %c0_220] : memref<2x74x32xf32, #tpu.memory_space<vmem>>, vector<2x32x32xf32>
    %c0_221 = arith.constant 0 : index
    %c0_222 = arith.constant 0 : index
    %c64_223 = arith.constant 64 : index
    %241 = vector.load %arg30[%c0_221, %c0_222, %c64_223] : memref<2x64x96xf32, #tpu.memory_space<vmem>>, vector<2x32x32xf32>
    tpu.vector_store %arg30[%c0_221, %c0_222, %c64_223], %240 {strides = array<i32>} : memref<2x64x96xf32, #tpu.memory_space<vmem>>, vector<2x32x32xf32>,
    %c0_224 = arith.constant 0 : index
    %c0_225 = arith.constant 0 : index
    %c0_226 = arith.constant 0 : index
    %242 = vector.load %arg30[%c0_224, %c0_225, %c0_226] : memref<2x64x96xf32, #tpu.memory_space<vmem>>, vector<2x32x96xf32>
    %243 = vector.shape_cast %242 : vector<2x32x96xf32> to vector<64x96xf32>
    %244 = arith.truncf %243 : vector<64x96xf32> to vector<64x96xbf16>
    %c0_227 = arith.constant 0 : index
    %c0_228 = arith.constant 0 : index
    %245 = vector.load %arg12[%c0_227, %c0_228] : memref<96x8xbf16, #tpu.memory_space<vmem>>, vector<96x8xbf16>
    %cst_229 = arith.constant dense<0.000000e+00> : vector<64x8xf32>
    %246 = tpu.matmul %244, %245, %cst_229 {dimension_numbers = #tpu.dot_dimension_numbers<[1], [0], [0], [1], [0, 0, 1, 1], [], []>} : vector<64x96xbf16>, vector<96x8xbf16>, vector<64x8xf32> -> vector<64x8xf32>
    %247 = vector.shape_cast %246 : vector<64x8xf32> to vector<2x32x8xf32>
    %c0_230 = arith.constant 0 : index
    %c0_231 = arith.constant 0 : index
    %c24 = arith.constant 24 : index
    %248 = vector.load %arg28[%c0_230, %c0_231, %c24] : memref<2x32x32xf32, #tpu.memory_space<vmem>>, vector<2x32x8xf32>
    tpu.vector_store %arg28[%c0_230, %c0_231, %c24], %247 {strides = array<i32>} : memref<2x32x32xf32, #tpu.memory_space<vmem>>, vector<2x32x8xf32>,
    %c0_232 = arith.constant 0 : index
    %c0_233 = arith.constant 0 : index
    %c0_234 = arith.constant 0 : index
    %249 = vector.load %arg28[%c0_232, %c0_233, %c0_234] : memref<2x32x32xf32, #tpu.memory_space<vmem>>, vector<2x32x32xf32>
    %c0_235 = arith.constant 0 : index
    %c0_236 = arith.constant 0 : index
    %250 = vector.load %arg13[%c0_235, %c0_236] : memref<2x32xf32, #tpu.memory_space<vmem>>, vector<1x32xf32>
    %c1_237 = arith.constant 1 : index
    %c0_238 = arith.constant 0 : index
    %251 = vector.load %arg13[%c1_237, %c0_238] : memref<2x32xf32, #tpu.memory_space<vmem>>, vector<1x32xf32>
    %252 = vector.shape_cast %249 : vector<2x32x32xf32> to vector<64x32xf32>
    %cst_239 = arith.constant dense<0.000000e+00> : vector<32xf32>
    %253 = vector.multi_reduction <add>, %252, %cst_239 [0] : vector<64x32xf32> to vector<32xf32>
    %254 = vector.shape_cast %253 : vector<32xf32> to vector<1x32xf32>
    %cst_240 = arith.constant 6.400000e+01 : f32
    %255 = vector.broadcast %cst_240 : f32 to vector<1x32xf32>
    %256 = arith.divf %254, %255 : vector<1x32xf32>
    %257 = vector.broadcast %256 : vector<1x32xf32> to vector<64x32xf32>
    %258 = arith.subf %252, %257 : vector<64x32xf32>
    %259 = arith.mulf %258, %258 : vector<64x32xf32>
    %cst_241 = arith.constant dense<0.000000e+00> : vector<32xf32>
    %260 = vector.multi_reduction <add>, %259, %cst_241 [0] : vector<64x32xf32> to vector<32xf32>
    %261 = vector.shape_cast %260 : vector<32xf32> to vector<1x32xf32>
    %cst_242 = arith.constant 6.400000e+01 : f32
    %262 = vector.broadcast %cst_242 : f32 to vector<1x32xf32>
    %263 = arith.divf %261, %262 : vector<1x32xf32>
    %cst_243 = arith.constant 9.99999974E-6 : f32
    %264 = vector.broadcast %cst_243 : f32 to vector<1x32xf32>
    %265 = arith.addf %263, %264 : vector<1x32xf32>
    %266 = math.rsqrt %265 : vector<1x32xf32>
    %267 = arith.mulf %266, %250 : vector<1x32xf32>
    %268 = vector.broadcast %267 : vector<1x32xf32> to vector<64x32xf32>
    %269 = arith.mulf %258, %268 : vector<64x32xf32>
    %270 = vector.broadcast %251 : vector<1x32xf32> to vector<64x32xf32>
    %271 = arith.addf %269, %270 : vector<64x32xf32>
    %cst_244 = arith.constant 0.000000e+00 : f32
    %272 = vector.broadcast %cst_244 : f32 to vector<64x32xf32>
    %273 = arith.maximumf %271, %272 : vector<64x32xf32>
    %274 = vector.shape_cast %273 : vector<64x32xf32> to vector<2x32x32xf32>
    %275 = vector.shape_cast %274 : vector<2x32x32xf32> to vector<64x32xf32>
    %276 = arith.truncf %275 : vector<64x32xf32> to vector<64x32xbf16>
    %c0_245 = arith.constant 0 : index
    %c0_246 = arith.constant 0 : index
    %277 = vector.load %arg14[%c0_245, %c0_246] : memref<32x16xbf16, #tpu.memory_space<vmem>>, vector<32x16xbf16>
    %cst_247 = arith.constant dense<0.000000e+00> : vector<64x16xf32>
    %278 = tpu.matmul %276, %277, %cst_247 {dimension_numbers = #tpu.dot_dimension_numbers<[1], [0], [0], [1], [0, 0, 1, 1], [], []>} : vector<64x32xbf16>, vector<32x16xbf16>, vector<64x16xf32> -> vector<64x16xf32>
    %279 = vector.shape_cast %278 : vector<64x16xf32> to vector<2x32x16xf32>
    %c0_248 = arith.constant 0 : index
    %c0_249 = arith.constant 0 : index
    %c0_250 = arith.constant 0 : index
    %280 = vector.load %arg29[%c0_248, %c0_249, %c0_250] : memref<2x74x32xf32, #tpu.memory_space<vmem>>, vector<2x32x16xf32>
    tpu.vector_store %arg29[%c0_248, %c0_249, %c0_250], %279 {strides = array<i32>} : memref<2x74x32xf32, #tpu.memory_space<vmem>>, vector<2x32x16xf32>,
    %c0_251 = arith.constant 0 : index
    %c0_252 = arith.constant 0 : index
    %c0_253 = arith.constant 0 : index
    %281 = tpu.strided_load %arg29[%c0_251, %c0_252, %c0_253] {strides = array<i32: 1, 2, 1>} : memref<2x74x32xf32, #tpu.memory_space<vmem>>, vector<2x16x32xf32>
    %c0_254 = arith.constant 0 : index
    %c1_255 = arith.constant 1 : index
    %c0_256 = arith.constant 0 : index
    %282 = tpu.strided_load %arg29[%c0_254, %c1_255, %c0_256] {strides = array<i32: 1, 2, 1>} : memref<2x74x32xf32, #tpu.memory_space<vmem>>, vector<2x16x32xf32>
    %283 = arith.maximumf %281, %282 : vector<2x16x32xf32>
    %284 = vector.extract_strided_slice %283 {offsets = [0, 0, 0], sizes = [2, 16, 16], strides = [1, 1, 1]} : vector<2x16x32xf32> to vector<2x16x16xf32>
    %c0_257 = arith.constant 0 : index
    %c0_258 = arith.constant 0 : index
    %c0_259 = arith.constant 0 : index
    %285 = vector.load %arg28[%c0_257, %c0_258, %c0_259] : memref<2x32x32xf32, #tpu.memory_space<vmem>>, vector<2x16x16xf32>
    tpu.vector_store %arg28[%c0_257, %c0_258, %c0_259], %284 {strides = array<i32>} : memref<2x32x32xf32, #tpu.memory_space<vmem>>, vector<2x16x16xf32>,
    %c0_260 = arith.constant 0 : index
    %c0_261 = arith.constant 0 : index
    %c0_262 = arith.constant 0 : index
    %286 = vector.load %arg28[%c0_260, %c0_261, %c0_262] : memref<2x32x32xf32, #tpu.memory_space<vmem>>, vector<2x16x16xf32>
    %c0_263 = arith.constant 0 : index
    %c0_264 = arith.constant 0 : index
    %287 = vector.load %arg15[%c0_263, %c0_264] : memref<2x16xf32, #tpu.memory_space<vmem>>, vector<1x16xf32>
    %c1_265 = arith.constant 1 : index
    %c0_266 = arith.constant 0 : index
    %288 = vector.load %arg15[%c1_265, %c0_266] : memref<2x16xf32, #tpu.memory_space<vmem>>, vector<1x16xf32>
    %289 = vector.shape_cast %286 : vector<2x16x16xf32> to vector<32x16xf32>
    %cst_267 = arith.constant dense<0.000000e+00> : vector<16xf32>
    %290 = vector.multi_reduction <add>, %289, %cst_267 [0] : vector<32x16xf32> to vector<16xf32>
    %291 = vector.shape_cast %290 : vector<16xf32> to vector<1x16xf32>
    %cst_268 = arith.constant 3.200000e+01 : f32
    %292 = vector.broadcast %cst_268 : f32 to vector<1x16xf32>
    %293 = arith.divf %291, %292 : vector<1x16xf32>
    %294 = vector.broadcast %293 : vector<1x16xf32> to vector<32x16xf32>
    %295 = arith.subf %289, %294 : vector<32x16xf32>
    %296 = arith.mulf %295, %295 : vector<32x16xf32>
    %cst_269 = arith.constant dense<0.000000e+00> : vector<16xf32>
    %297 = vector.multi_reduction <add>, %296, %cst_269 [0] : vector<32x16xf32> to vector<16xf32>
    %298 = vector.shape_cast %297 : vector<16xf32> to vector<1x16xf32>
    %cst_270 = arith.constant 3.200000e+01 : f32
    %299 = vector.broadcast %cst_270 : f32 to vector<1x16xf32>
    %300 = arith.divf %298, %299 : vector<1x16xf32>
    %cst_271 = arith.constant 9.99999974E-6 : f32
    %301 = vector.broadcast %cst_271 : f32 to vector<1x16xf32>
    %302 = arith.addf %300, %301 : vector<1x16xf32>
    %303 = math.rsqrt %302 : vector<1x16xf32>
    %304 = arith.mulf %303, %287 : vector<1x16xf32>
    %305 = vector.broadcast %304 : vector<1x16xf32> to vector<32x16xf32>
    %306 = arith.mulf %295, %305 : vector<32x16xf32>
    %307 = vector.broadcast %288 : vector<1x16xf32> to vector<32x16xf32>
    %308 = arith.addf %306, %307 : vector<32x16xf32>
    %cst_272 = arith.constant 0.000000e+00 : f32
    %309 = vector.broadcast %cst_272 : f32 to vector<32x16xf32>
    %310 = arith.maximumf %308, %309 : vector<32x16xf32>
    %311 = vector.shape_cast %310 : vector<32x16xf32> to vector<2x16x16xf32>
    %312 = vector.shape_cast %311 : vector<2x16x16xf32> to vector<32x16xf32>
    %313 = arith.truncf %312 : vector<32x16xf32> to vector<32x16xbf16>
    %c0_273 = arith.constant 0 : index
    %c0_274 = arith.constant 0 : index
    %314 = vector.load %arg16[%c0_273, %c0_274] : memref<16x32xbf16, #tpu.memory_space<vmem>>, vector<16x32xbf16>
    %cst_275 = arith.constant dense<0.000000e+00> : vector<32x32xf32>
    %315 = tpu.matmul %313, %314, %cst_275 {dimension_numbers = #tpu.dot_dimension_numbers<[1], [0], [0], [1], [0, 0, 1, 1], [], []>} : vector<32x16xbf16>, vector<16x32xbf16>, vector<32x32xf32> -> vector<32x32xf32>
    %316 = vector.shape_cast %315 : vector<32x32xf32> to vector<2x16x32xf32>
    %c0_276 = arith.constant 0 : index
    %c0_277 = arith.constant 0 : index
    %317 = vector.load %arg17[%c0_276, %c0_277] : memref<2x32xf32, #tpu.memory_space<vmem>>, vector<1x32xf32>
    %c1_278 = arith.constant 1 : index
    %c0_279 = arith.constant 0 : index
    %318 = vector.load %arg17[%c1_278, %c0_279] : memref<2x32xf32, #tpu.memory_space<vmem>>, vector<1x32xf32>
    %319 = vector.shape_cast %316 : vector<2x16x32xf32> to vector<32x32xf32>
    %cst_280 = arith.constant dense<0.000000e+00> : vector<32xf32>
    %320 = vector.multi_reduction <add>, %319, %cst_280 [0] : vector<32x32xf32> to vector<32xf32>
    %321 = vector.shape_cast %320 : vector<32xf32> to vector<1x32xf32>
    %cst_281 = arith.constant 3.200000e+01 : f32
    %322 = vector.broadcast %cst_281 : f32 to vector<1x32xf32>
    %323 = arith.divf %321, %322 : vector<1x32xf32>
    %324 = vector.broadcast %323 : vector<1x32xf32> to vector<32x32xf32>
    %325 = arith.subf %319, %324 : vector<32x32xf32>
    %326 = arith.mulf %325, %325 : vector<32x32xf32>
    %cst_282 = arith.constant dense<0.000000e+00> : vector<32xf32>
    %327 = vector.multi_reduction <add>, %326, %cst_282 [0] : vector<32x32xf32> to vector<32xf32>
    %328 = vector.shape_cast %327 : vector<32xf32> to vector<1x32xf32>
    %cst_283 = arith.constant 3.200000e+01 : f32
    %329 = vector.broadcast %cst_283 : f32 to vector<1x32xf32>
    %330 = arith.divf %328, %329 : vector<1x32xf32>
    %cst_284 = arith.constant 9.99999974E-6 : f32
    %331 = vector.broadcast %cst_284 : f32 to vector<1x32xf32>
    %332 = arith.addf %330, %331 : vector<1x32xf32>
    %333 = math.rsqrt %332 : vector<1x32xf32>
    %334 = arith.mulf %333, %317 : vector<1x32xf32>
    %335 = vector.broadcast %334 : vector<1x32xf32> to vector<32x32xf32>
    %336 = arith.mulf %325, %335 : vector<32x32xf32>
    %337 = vector.broadcast %318 : vector<1x32xf32> to vector<32x32xf32>
    %338 = arith.addf %336, %337 : vector<32x32xf32>
    %cst_285 = arith.constant 0.000000e+00 : f32
    %339 = vector.broadcast %cst_285 : f32 to vector<32x32xf32>
    %340 = arith.maximumf %338, %339 : vector<32x32xf32>
    %341 = vector.shape_cast %340 : vector<32x32xf32> to vector<2x16x32xf32>
    %cst_286 = arith.constant 0.000000e+00 : f32
    %342 = vector.broadcast %cst_286 : f32 to vector<2x8x32xf32>
    %c0_287 = arith.constant 0 : index
    %c0_288 = arith.constant 0 : index
    %c0_289 = arith.constant 0 : index
    %343 = vector.load %arg29[%c0_287, %c0_288, %c0_289] : memref<2x74x32xf32, #tpu.memory_space<vmem>>, vector<2x8x32xf32>
    tpu.vector_store %arg29[%c0_287, %c0_288, %c0_289], %342 {strides = array<i32>} : memref<2x74x32xf32, #tpu.memory_space<vmem>>, vector<2x8x32xf32>,
    %cst_290 = arith.constant 0.000000e+00 : f32
    %344 = vector.broadcast %cst_290 : f32 to vector<2x2x32xf32>
    %c0_291 = arith.constant 0 : index
    %c24_292 = arith.constant 24 : index
    %c0_293 = arith.constant 0 : index
    %345 = vector.load %arg29[%c0_291, %c24_292, %c0_293] : memref<2x74x32xf32, #tpu.memory_space<vmem>>, vector<2x2x32xf32>
    tpu.vector_store %arg29[%c0_291, %c24_292, %c0_293], %344 {strides = array<i32>} : memref<2x74x32xf32, #tpu.memory_space<vmem>>, vector<2x2x32xf32>,
    %c0_294 = arith.constant 0 : index
    %c8_295 = arith.constant 8 : index
    %c0_296 = arith.constant 0 : index
    %346 = vector.load %arg29[%c0_294, %c8_295, %c0_296] : memref<2x74x32xf32, #tpu.memory_space<vmem>>, vector<2x16x32xf32>
    tpu.vector_store %arg29[%c0_294, %c8_295, %c0_296], %341 {strides = array<i32>} : memref<2x74x32xf32, #tpu.memory_space<vmem>>, vector<2x16x32xf32>,
    %c0_297 = arith.constant 0 : index
    %c6_298 = arith.constant 6 : index
    %c0_299 = arith.constant 0 : index
    %347 = vector.load %arg29[%c0_297, %c6_298, %c0_299] : memref<2x74x32xf32, #tpu.memory_space<vmem>>, vector<2x16x32xf32>
    %c0_300 = arith.constant 0 : index
    %c0_301 = arith.constant 0 : index
    %c0_302 = arith.constant 0 : index
    %348 = vector.load %arg30[%c0_300, %c0_301, %c0_302] : memref<2x64x96xf32, #tpu.memory_space<vmem>>, vector<2x16x32xf32>
    tpu.vector_store %arg30[%c0_300, %c0_301, %c0_302], %347 {strides = array<i32>} : memref<2x64x96xf32, #tpu.memory_space<vmem>>, vector<2x16x32xf32>,
    %c0_303 = arith.constant 0 : index
    %c8_304 = arith.constant 8 : index
    %c0_305 = arith.constant 0 : index
    %349 = vector.load %arg29[%c0_303, %c8_304, %c0_305] : memref<2x74x32xf32, #tpu.memory_space<vmem>>, vector<2x16x32xf32>
    %c0_306 = arith.constant 0 : index
    %c0_307 = arith.constant 0 : index
    %c32_308 = arith.constant 32 : index
    %350 = vector.load %arg30[%c0_306, %c0_307, %c32_308] : memref<2x64x96xf32, #tpu.memory_space<vmem>>, vector<2x16x32xf32>
    tpu.vector_store %arg30[%c0_306, %c0_307, %c32_308], %349 {strides = array<i32>} : memref<2x64x96xf32, #tpu.memory_space<vmem>>, vector<2x16x32xf32>,
    %c0_309 = arith.constant 0 : index
    %c10_310 = arith.constant 10 : index
    %c0_311 = arith.constant 0 : index
    %351 = vector.load %arg29[%c0_309, %c10_310, %c0_311] : memref<2x74x32xf32, #tpu.memory_space<vmem>>, vector<2x16x32xf32>
    %c0_312 = arith.constant 0 : index
    %c0_313 = arith.constant 0 : index
    %c64_314 = arith.constant 64 : index
    %352 = vector.load %arg30[%c0_312, %c0_313, %c64_314] : memref<2x64x96xf32, #tpu.memory_space<vmem>>, vector<2x16x32xf32>
    tpu.vector_store %arg30[%c0_312, %c0_313, %c64_314], %351 {strides = array<i32>} : memref<2x64x96xf32, #tpu.memory_space<vmem>>, vector<2x16x32xf32>,
    %c0_315 = arith.constant 0 : index
    %c0_316 = arith.constant 0 : index
    %c0_317 = arith.constant 0 : index
    %353 = vector.load %arg30[%c0_315, %c0_316, %c0_317] : memref<2x64x96xf32, #tpu.memory_space<vmem>>, vector<2x16x96xf32>
    %354 = vector.shape_cast %353 : vector<2x16x96xf32> to vector<32x96xf32>
    %355 = arith.truncf %354 : vector<32x96xf32> to vector<32x96xbf16>
    %c0_318 = arith.constant 0 : index
    %c0_319 = arith.constant 0 : index
    %356 = vector.load %arg18[%c0_318, %c0_319] : memref<96x8xbf16, #tpu.memory_space<vmem>>, vector<96x8xbf16>
    %cst_320 = arith.constant dense<0.000000e+00> : vector<32x8xf32>
    %357 = tpu.matmul %355, %356, %cst_320 {dimension_numbers = #tpu.dot_dimension_numbers<[1], [0], [0], [1], [0, 0, 1, 1], [], []>} : vector<32x96xbf16>, vector<96x8xbf16>, vector<32x8xf32> -> vector<32x8xf32>
    %358 = vector.shape_cast %357 : vector<32x8xf32> to vector<2x16x8xf32>
    %c0_321 = arith.constant 0 : index
    %c0_322 = arith.constant 0 : index
    %c16_323 = arith.constant 16 : index
    %359 = vector.load %arg28[%c0_321, %c0_322, %c16_323] : memref<2x32x32xf32, #tpu.memory_space<vmem>>, vector<2x16x8xf32>
    tpu.vector_store %arg28[%c0_321, %c0_322, %c16_323], %358 {strides = array<i32>} : memref<2x32x32xf32, #tpu.memory_space<vmem>>, vector<2x16x8xf32>,
    %c0_324 = arith.constant 0 : index
    %c0_325 = arith.constant 0 : index
    %c0_326 = arith.constant 0 : index
    %360 = vector.load %arg28[%c0_324, %c0_325, %c0_326] : memref<2x32x32xf32, #tpu.memory_space<vmem>>, vector<2x16x24xf32>
    %c0_327 = arith.constant 0 : index
    %c0_328 = arith.constant 0 : index
    %361 = vector.load %arg19[%c0_327, %c0_328] : memref<2x24xf32, #tpu.memory_space<vmem>>, vector<1x24xf32>
    %c1_329 = arith.constant 1 : index
    %c0_330 = arith.constant 0 : index
    %362 = vector.load %arg19[%c1_329, %c0_330] : memref<2x24xf32, #tpu.memory_space<vmem>>, vector<1x24xf32>
    %363 = vector.shape_cast %360 : vector<2x16x24xf32> to vector<32x24xf32>
    %cst_331 = arith.constant dense<0.000000e+00> : vector<24xf32>
    %364 = vector.multi_reduction <add>, %363, %cst_331 [0] : vector<32x24xf32> to vector<24xf32>
    %365 = vector.shape_cast %364 : vector<24xf32> to vector<1x24xf32>
    %cst_332 = arith.constant 3.200000e+01 : f32
    %366 = vector.broadcast %cst_332 : f32 to vector<1x24xf32>
    %367 = arith.divf %365, %366 : vector<1x24xf32>
    %368 = vector.broadcast %367 : vector<1x24xf32> to vector<32x24xf32>
    %369 = arith.subf %363, %368 : vector<32x24xf32>
    %370 = arith.mulf %369, %369 : vector<32x24xf32>
    %cst_333 = arith.constant dense<0.000000e+00> : vector<24xf32>
    %371 = vector.multi_reduction <add>, %370, %cst_333 [0] : vector<32x24xf32> to vector<24xf32>
    %372 = vector.shape_cast %371 : vector<24xf32> to vector<1x24xf32>
    %cst_334 = arith.constant 3.200000e+01 : f32
    %373 = vector.broadcast %cst_334 : f32 to vector<1x24xf32>
    %374 = arith.divf %372, %373 : vector<1x24xf32>
    %cst_335 = arith.constant 9.99999974E-6 : f32
    %375 = vector.broadcast %cst_335 : f32 to vector<1x24xf32>
    %376 = arith.addf %374, %375 : vector<1x24xf32>
    %377 = math.rsqrt %376 : vector<1x24xf32>
    %378 = arith.mulf %377, %361 : vector<1x24xf32>
    %379 = vector.broadcast %378 : vector<1x24xf32> to vector<32x24xf32>
    %380 = arith.mulf %369, %379 : vector<32x24xf32>
    %381 = vector.broadcast %362 : vector<1x24xf32> to vector<32x24xf32>
    %382 = arith.addf %380, %381 : vector<32x24xf32>
    %cst_336 = arith.constant 0.000000e+00 : f32
    %383 = vector.broadcast %cst_336 : f32 to vector<32x24xf32>
    %384 = arith.maximumf %382, %383 : vector<32x24xf32>
    %385 = vector.shape_cast %384 : vector<32x24xf32> to vector<2x16x24xf32>
    %386 = vector.shape_cast %385 : vector<2x16x24xf32> to vector<32x24xf32>
    %387 = arith.truncf %386 : vector<32x24xf32> to vector<32x24xbf16>
    %c0_337 = arith.constant 0 : index
    %c0_338 = arith.constant 0 : index
    %388 = vector.load %arg20[%c0_337, %c0_338] : memref<24x32xbf16, #tpu.memory_space<vmem>>, vector<24x32xbf16>
    %cst_339 = arith.constant dense<0.000000e+00> : vector<32x32xf32>
    %389 = tpu.matmul %387, %388, %cst_339 {dimension_numbers = #tpu.dot_dimension_numbers<[1], [0], [0], [1], [0, 0, 1, 1], [], []>} : vector<32x24xbf16>, vector<24x32xbf16>, vector<32x32xf32> -> vector<32x32xf32>
    %390 = vector.shape_cast %389 : vector<32x32xf32> to vector<2x16x32xf32>
    %c0_340 = arith.constant 0 : index
    %c0_341 = arith.constant 0 : index
    %391 = vector.load %arg21[%c0_340, %c0_341] : memref<2x32xf32, #tpu.memory_space<vmem>>, vector<1x32xf32>
    %c1_342 = arith.constant 1 : index
    %c0_343 = arith.constant 0 : index
    %392 = vector.load %arg21[%c1_342, %c0_343] : memref<2x32xf32, #tpu.memory_space<vmem>>, vector<1x32xf32>
    %393 = vector.shape_cast %390 : vector<2x16x32xf32> to vector<32x32xf32>
    %cst_344 = arith.constant dense<0.000000e+00> : vector<32xf32>
    %394 = vector.multi_reduction <add>, %393, %cst_344 [0] : vector<32x32xf32> to vector<32xf32>
    %395 = vector.shape_cast %394 : vector<32xf32> to vector<1x32xf32>
    %cst_345 = arith.constant 3.200000e+01 : f32
    %396 = vector.broadcast %cst_345 : f32 to vector<1x32xf32>
    %397 = arith.divf %395, %396 : vector<1x32xf32>
    %398 = vector.broadcast %397 : vector<1x32xf32> to vector<32x32xf32>
    %399 = arith.subf %393, %398 : vector<32x32xf32>
    %400 = arith.mulf %399, %399 : vector<32x32xf32>
    %cst_346 = arith.constant dense<0.000000e+00> : vector<32xf32>
    %401 = vector.multi_reduction <add>, %400, %cst_346 [0] : vector<32x32xf32> to vector<32xf32>
    %402 = vector.shape_cast %401 : vector<32xf32> to vector<1x32xf32>
    %cst_347 = arith.constant 3.200000e+01 : f32
    %403 = vector.broadcast %cst_347 : f32 to vector<1x32xf32>
    %404 = arith.divf %402, %403 : vector<1x32xf32>
    %cst_348 = arith.constant 9.99999974E-6 : f32
    %405 = vector.broadcast %cst_348 : f32 to vector<1x32xf32>
    %406 = arith.addf %404, %405 : vector<1x32xf32>
    %407 = math.rsqrt %406 : vector<1x32xf32>
    %408 = arith.mulf %407, %391 : vector<1x32xf32>
    %409 = vector.broadcast %408 : vector<1x32xf32> to vector<32x32xf32>
    %410 = arith.mulf %399, %409 : vector<32x32xf32>
    %411 = vector.broadcast %392 : vector<1x32xf32> to vector<32x32xf32>
    %412 = arith.addf %410, %411 : vector<32x32xf32>
    %cst_349 = arith.constant 0.000000e+00 : f32
    %413 = vector.broadcast %cst_349 : f32 to vector<32x32xf32>
    %414 = arith.maximumf %412, %413 : vector<32x32xf32>
    %415 = vector.shape_cast %414 : vector<32x32xf32> to vector<2x16x32xf32>
    %cst_350 = arith.constant 0.000000e+00 : f32
    %416 = vector.broadcast %cst_350 : f32 to vector<2x8x32xf32>
    %c0_351 = arith.constant 0 : index
    %c0_352 = arith.constant 0 : index
    %c0_353 = arith.constant 0 : index
    %417 = vector.load %arg29[%c0_351, %c0_352, %c0_353] : memref<2x74x32xf32, #tpu.memory_space<vmem>>, vector<2x8x32xf32>
    tpu.vector_store %arg29[%c0_351, %c0_352, %c0_353], %416 {strides = array<i32>} : memref<2x74x32xf32, #tpu.memory_space<vmem>>, vector<2x8x32xf32>,
    %cst_354 = arith.constant 0.000000e+00 : f32
    %418 = vector.broadcast %cst_354 : f32 to vector<2x2x32xf32>
    %c0_355 = arith.constant 0 : index
    %c24_356 = arith.constant 24 : index
    %c0_357 = arith.constant 0 : index
    %419 = vector.load %arg29[%c0_355, %c24_356, %c0_357] : memref<2x74x32xf32, #tpu.memory_space<vmem>>, vector<2x2x32xf32>
    tpu.vector_store %arg29[%c0_355, %c24_356, %c0_357], %418 {strides = array<i32>} : memref<2x74x32xf32, #tpu.memory_space<vmem>>, vector<2x2x32xf32>,
    %c0_358 = arith.constant 0 : index
    %c8_359 = arith.constant 8 : index
    %c0_360 = arith.constant 0 : index
    %420 = vector.load %arg29[%c0_358, %c8_359, %c0_360] : memref<2x74x32xf32, #tpu.memory_space<vmem>>, vector<2x16x32xf32>
    tpu.vector_store %arg29[%c0_358, %c8_359, %c0_360], %415 {strides = array<i32>} : memref<2x74x32xf32, #tpu.memory_space<vmem>>, vector<2x16x32xf32>,
    %c0_361 = arith.constant 0 : index
    %c6_362 = arith.constant 6 : index
    %c0_363 = arith.constant 0 : index
    %421 = vector.load %arg29[%c0_361, %c6_362, %c0_363] : memref<2x74x32xf32, #tpu.memory_space<vmem>>, vector<2x16x32xf32>
    %c0_364 = arith.constant 0 : index
    %c0_365 = arith.constant 0 : index
    %c0_366 = arith.constant 0 : index
    %422 = vector.load %arg30[%c0_364, %c0_365, %c0_366] : memref<2x64x96xf32, #tpu.memory_space<vmem>>, vector<2x16x32xf32>
    tpu.vector_store %arg30[%c0_364, %c0_365, %c0_366], %421 {strides = array<i32>} : memref<2x64x96xf32, #tpu.memory_space<vmem>>, vector<2x16x32xf32>,
    %c0_367 = arith.constant 0 : index
    %c8_368 = arith.constant 8 : index
    %c0_369 = arith.constant 0 : index
    %423 = vector.load %arg29[%c0_367, %c8_368, %c0_369] : memref<2x74x32xf32, #tpu.memory_space<vmem>>, vector<2x16x32xf32>
    %c0_370 = arith.constant 0 : index
    %c0_371 = arith.constant 0 : index
    %c32_372 = arith.constant 32 : index
    %424 = vector.load %arg30[%c0_370, %c0_371, %c32_372] : memref<2x64x96xf32, #tpu.memory_space<vmem>>, vector<2x16x32xf32>
    tpu.vector_store %arg30[%c0_370, %c0_371, %c32_372], %423 {strides = array<i32>} : memref<2x64x96xf32, #tpu.memory_space<vmem>>, vector<2x16x32xf32>,
    %c0_373 = arith.constant 0 : index
    %c10_374 = arith.constant 10 : index
    %c0_375 = arith.constant 0 : index
    %425 = vector.load %arg29[%c0_373, %c10_374, %c0_375] : memref<2x74x32xf32, #tpu.memory_space<vmem>>, vector<2x16x32xf32>
    %c0_376 = arith.constant 0 : index
    %c0_377 = arith.constant 0 : index
    %c64_378 = arith.constant 64 : index
    %426 = vector.load %arg30[%c0_376, %c0_377, %c64_378] : memref<2x64x96xf32, #tpu.memory_space<vmem>>, vector<2x16x32xf32>
    tpu.vector_store %arg30[%c0_376, %c0_377, %c64_378], %425 {strides = array<i32>} : memref<2x64x96xf32, #tpu.memory_space<vmem>>, vector<2x16x32xf32>,
    %c0_379 = arith.constant 0 : index
    %c0_380 = arith.constant 0 : index
    %c0_381 = arith.constant 0 : index
    %427 = vector.load %arg30[%c0_379, %c0_380, %c0_381] : memref<2x64x96xf32, #tpu.memory_space<vmem>>, vector<2x16x96xf32>
    %428 = vector.shape_cast %427 : vector<2x16x96xf32> to vector<32x96xf32>
    %429 = arith.truncf %428 : vector<32x96xf32> to vector<32x96xbf16>
    %c0_382 = arith.constant 0 : index
    %c0_383 = arith.constant 0 : index
    %430 = vector.load %arg22[%c0_382, %c0_383] : memref<96x8xbf16, #tpu.memory_space<vmem>>, vector<96x8xbf16>
    %cst_384 = arith.constant dense<0.000000e+00> : vector<32x8xf32>
    %431 = tpu.matmul %429, %430, %cst_384 {dimension_numbers = #tpu.dot_dimension_numbers<[1], [0], [0], [1], [0, 0, 1, 1], [], []>} : vector<32x96xbf16>, vector<96x8xbf16>, vector<32x8xf32> -> vector<32x8xf32>
    %432 = vector.shape_cast %431 : vector<32x8xf32> to vector<2x16x8xf32>
    %c0_385 = arith.constant 0 : index
    %c0_386 = arith.constant 0 : index
    %c24_387 = arith.constant 24 : index
    %433 = vector.load %arg28[%c0_385, %c0_386, %c24_387] : memref<2x32x32xf32, #tpu.memory_space<vmem>>, vector<2x16x8xf32>
    tpu.vector_store %arg28[%c0_385, %c0_386, %c24_387], %432 {strides = array<i32>} : memref<2x32x32xf32, #tpu.memory_space<vmem>>, vector<2x16x8xf32>,
    %c0_388 = arith.constant 0 : index
    %c0_389 = arith.constant 0 : index
    %c0_390 = arith.constant 0 : index
    %434 = vector.load %arg28[%c0_388, %c0_389, %c0_390] : memref<2x32x32xf32, #tpu.memory_space<vmem>>, vector<2x16x32xf32>
    %c0_391 = arith.constant 0 : index
    %c0_392 = arith.constant 0 : index
    %435 = vector.load %arg23[%c0_391, %c0_392] : memref<2x32xf32, #tpu.memory_space<vmem>>, vector<1x32xf32>
    %c1_393 = arith.constant 1 : index
    %c0_394 = arith.constant 0 : index
    %436 = vector.load %arg23[%c1_393, %c0_394] : memref<2x32xf32, #tpu.memory_space<vmem>>, vector<1x32xf32>
    %437 = vector.shape_cast %434 : vector<2x16x32xf32> to vector<32x32xf32>
    %cst_395 = arith.constant dense<0.000000e+00> : vector<32xf32>
    %438 = vector.multi_reduction <add>, %437, %cst_395 [0] : vector<32x32xf32> to vector<32xf32>
    %439 = vector.shape_cast %438 : vector<32xf32> to vector<1x32xf32>
    %cst_396 = arith.constant 3.200000e+01 : f32
    %440 = vector.broadcast %cst_396 : f32 to vector<1x32xf32>
    %441 = arith.divf %439, %440 : vector<1x32xf32>
    %442 = vector.broadcast %441 : vector<1x32xf32> to vector<32x32xf32>
    %443 = arith.subf %437, %442 : vector<32x32xf32>
    %444 = arith.mulf %443, %443 : vector<32x32xf32>
    %cst_397 = arith.constant dense<0.000000e+00> : vector<32xf32>
    %445 = vector.multi_reduction <add>, %444, %cst_397 [0] : vector<32x32xf32> to vector<32xf32>
    %446 = vector.shape_cast %445 : vector<32xf32> to vector<1x32xf32>
    %cst_398 = arith.constant 3.200000e+01 : f32
    %447 = vector.broadcast %cst_398 : f32 to vector<1x32xf32>
    %448 = arith.divf %446, %447 : vector<1x32xf32>
    %cst_399 = arith.constant 9.99999974E-6 : f32
    %449 = vector.broadcast %cst_399 : f32 to vector<1x32xf32>
    %450 = arith.addf %448, %449 : vector<1x32xf32>
    %451 = math.rsqrt %450 : vector<1x32xf32>
    %452 = arith.mulf %451, %435 : vector<1x32xf32>
    %453 = vector.broadcast %452 : vector<1x32xf32> to vector<32x32xf32>
    %454 = arith.mulf %443, %453 : vector<32x32xf32>
    %455 = vector.broadcast %436 : vector<1x32xf32> to vector<32x32xf32>
    %456 = arith.addf %454, %455 : vector<32x32xf32>
    %cst_400 = arith.constant 0.000000e+00 : f32
    %457 = vector.broadcast %cst_400 : f32 to vector<32x32xf32>
    %458 = arith.maximumf %456, %457 : vector<32x32xf32>
    %459 = vector.shape_cast %458 : vector<32x32xf32> to vector<2x16x32xf32>
    %460 = vector.shape_cast %459 : vector<2x16x32xf32> to vector<32x32xf32>
    %461 = arith.truncf %460 : vector<32x32xf32> to vector<32x32xbf16>
    %c0_401 = arith.constant 0 : index
    %c0_402 = arith.constant 0 : index
    %462 = vector.load %arg24[%c0_401, %c0_402] : memref<32x16xbf16, #tpu.memory_space<vmem>>, vector<32x16xbf16>
    %cst_403 = arith.constant dense<0.000000e+00> : vector<32x16xf32>
    %463 = tpu.matmul %461, %462, %cst_403 {dimension_numbers = #tpu.dot_dimension_numbers<[1], [0], [0], [1], [0, 0, 1, 1], [], []>} : vector<32x32xbf16>, vector<32x16xbf16>, vector<32x16xf32> -> vector<32x16xf32>
    %464 = vector.shape_cast %463 : vector<32x16xf32> to vector<2x16x16xf32>
    %c0_404 = arith.constant 0 : index
    %c0_405 = arith.constant 0 : index
    %c0_406 = arith.constant 0 : index
    %465 = vector.load %arg29[%c0_404, %c0_405, %c0_406] : memref<2x74x32xf32, #tpu.memory_space<vmem>>, vector<2x16x16xf32>
    tpu.vector_store %arg29[%c0_404, %c0_405, %c0_406], %464 {strides = array<i32>} : memref<2x74x32xf32, #tpu.memory_space<vmem>>, vector<2x16x16xf32>,
    %c0_407 = arith.constant 0 : index
    %c0_408 = arith.constant 0 : index
    %c0_409 = arith.constant 0 : index
    %466 = tpu.strided_load %arg29[%c0_407, %c0_408, %c0_409] {strides = array<i32: 1, 2, 1>} : memref<2x74x32xf32, #tpu.memory_space<vmem>>, vector<2x8x32xf32>
    %c0_410 = arith.constant 0 : index
    %c1_411 = arith.constant 1 : index
    %c0_412 = arith.constant 0 : index
    %467 = tpu.strided_load %arg29[%c0_410, %c1_411, %c0_412] {strides = array<i32: 1, 2, 1>} : memref<2x74x32xf32, #tpu.memory_space<vmem>>, vector<2x8x32xf32>
    %468 = arith.maximumf %466, %467 : vector<2x8x32xf32>
    %469 = vector.extract_strided_slice %468 {offsets = [0, 0, 0], sizes = [2, 8, 16], strides = [1, 1, 1]} : vector<2x8x32xf32> to vector<2x8x16xf32>
    %cst_413 = arith.constant dense<0.000000e+00> : vector<2x16xf32>
    %470 = vector.multi_reduction <add>, %469, %cst_413 [1] : vector<2x8x16xf32> to vector<2x16xf32>
    %cst_414 = arith.constant 8.000000e+00 : f32
    %471 = vector.broadcast %cst_414 : f32 to vector<2x16xf32>
    %472 = arith.divf %470, %471 : vector<2x16xf32>
    %c0_415 = arith.constant 0 : index
    %c0_416 = arith.constant 0 : index
    %473 = vector.load %arg25[%c0_415, %c0_416] : memref<16x2xf32, #tpu.memory_space<vmem>>, vector<16x2xf32>
    %cst_417 = arith.constant dense<0.000000e+00> : vector<2x2xf32>
    %474 = tpu.matmul %472, %473, %cst_417 {dimension_numbers = #tpu.dot_dimension_numbers<[1], [0], [0], [1], [0, 0, 1, 1], [], []>} : vector<2x16xf32>, vector<16x2xf32>, vector<2x2xf32> -> vector<2x2xf32>
    %c0_418 = arith.constant 0 : index
    %c0_419 = arith.constant 0 : index
    %475 = vector.load %arg26[%c0_418, %c0_419] : memref<1x2xf32, #tpu.memory_space<vmem>>, vector<1x2xf32>
    %476 = vector.broadcast %475 : vector<1x2xf32> to vector<2x2xf32>
    %477 = arith.addf %474, %476 : vector<2x2xf32>
    %c0_420 = arith.constant 0 : index
    %c0_421 = arith.constant 0 : index
    %478 = vector.load %arg27[%c0_420, %c0_421] : memref<2x2xf32, #tpu.memory_space<vmem>>, vector<2x2xf32>
    tpu.vector_store %arg27[%c0_420, %c0_421], %477 {strides = array<i32>} : memref<2x2xf32, #tpu.memory_space<vmem>>, vector<2x2xf32>,
    return
  }
}

</mosaic_0001>

<bundles_post_ra>
// kernel: a_call__.1
= control target key start
LH: loop header
LB: loop body
LE: loop exit
PB: predicated region body
PF: predicated region fallthrough
CT: control target
= control target key end

     0   :  { %s6027_s0 = inlined_call_operand.vmem [shape: f32[2,64,1], index: 0, kind: input, shape index: {}]   ;;  %s6028_s1 = inlined_call_operand.hbm [shape: bf16[5,8], index: 1, kind: input, shape index: {}]   ;;  %s6029_s2 = inlined_call_operand.hbm [shape: f32[3,8], index: 2, kind: input, shape index: {}]   ;;  %s6030_s3 = inlined_call_operand.hbm [shape: bf16[24,16], index: 3, kind: input, shape index: {}]   ;;  %s6031_s4 = inlined_call_operand.hbm [shape: f32[3,16], index: 4, kind: input, shape index: {}]   ;;  %s6032_s5 = inlined_call_operand.hbm [shape: f32[2,16], index: 5, kind: input, shape index: {}, may-alias: {5,15}]   ;;  %s6033_s6 = inlined_call_operand.hbm [shape: bf16[16,32], index: 6, kind: input, shape index: {}]   ;;  %s6034_s7 = inlined_call_operand.vmem [shape: f32[2,32], index: 7, kind: input, shape index: {}, may-alias: {7,11,13,17,21,23}]   ;;  %s6035_s8 = inlined_call_operand.vmem [shape: bf16[96,8], index: 8, kind: input, shape index: {}]   ;;  %s6036_s9 = inlined_call_operand.hbm [shape: f32[2,24], index: 9, kind: input, shape index: {}, may-alias: {9,19}]   ;;  %s6037_s10 = inlined_call_operand.hbm [shape: bf16[24,32], index: 10, kind: input, shape index: {}]   ;;  %s6038_s11 = inlined_call_operand.vmem [shape: f32[2,32], index: 11, kind: input, shape index: {}, may-alias: {7,11,13,17,21,23}]   ;;  %s6039_s12 = inlined_call_operand.vmem [shape: bf16[96,8], index: 12, kind: input, shape index: {}]   ;;  %s6040_s13 = inlined_call_operand.vmem [shape: f32[2,32], index: 13, kind: input, shape index: {}, may-alias: {7,11,13,17,21,23}]   ;;  %s6041_s14 = inlined_call_operand.hbm [shape: bf16[32,16], index: 14, kind: input, shape index: {}]   ;;  %s6042_s15 = inlined_call_operand.hbm [shape: f32[2,16], index: 15, kind: input, shape index: {}, may-alias: {5,15}]   ;;  %s6043_s16 = inlined_call_operand.vmem [shape: bf16[16,32], index: 16, kind: input, shape index: {}]   ;;  %s6044_s17 = inlined_call_operand.vmem [shape: f32[2,32], index: 17, kind: input, shape index: {}, may-alias: {7,11,13,17,21,23}]   ;;  %s6045_s18 = inlined_call_operand.vmem [shape: bf16[96,8], index: 18, kind: input, shape index: {}]   ;;  %s6046_s19 = inlined_call_operand.hbm [shape: f32[2,24], index: 19, kind: input, shape index: {}, may-alias: {9,19}]   ;;  %s6047_s20 = inlined_call_operand.hbm [shape: bf16[24,32], index: 20, kind: input, shape index: {}]   ;;  %s6048_s21 = inlined_call_operand.vmem [shape: f32[2,32], index: 21, kind: input, shape index: {}, may-alias: {7,11,13,17,21,23}]   ;;  %s6049_s22 = inlined_call_operand.vmem [shape: bf16[96,8], index: 22, kind: input, shape index: {}]   ;;  %s6050_s23 = inlined_call_operand.vmem [shape: f32[2,32], index: 23, kind: input, shape index: {}, may-alias: {7,11,13,17,21,23}]   ;;  %s6051_s24 = inlined_call_operand.vmem [shape: bf16[32,16], index: 24, kind: input, shape index: {}]   ;;  %s6052_s25 = inlined_call_operand.hbm [shape: f32[16,2], index: 25, kind: input, shape index: {}]   ;;  %s6053_s26 = inlined_call_operand.vmem [shape: f32[1,2], index: 26, kind: input, shape index: {}]   ;;  %s6054_s27 = inlined_call_operand.hbm [shape: f32[2,2], index: 27, kind: output, shape index: {}]  }
   0x1   :  { %6068 = sst [smem:[#allocation35_spill]] %s6027_s0 }
   0x2   :  { %6069 = sst [smem:[#allocation36_spill]] %s6028_s1 }
   0x3   :  { %6070 = sst [smem:[#allocation37_spill]] %s6029_s2 }
   0x4   :  { %6071 = sst [smem:[#allocation38_spill]] %s6030_s3 }
   0x5   :  { %6072 = sst [smem:[#allocation39_spill]] %s6031_s4 }
   0x6   :  { %6073 = sst [smem:[#allocation40_spill]] %s6032_s5 }
   0x7   :  { %6074 = sst [smem:[#allocation41_spill]] %s6033_s6 }
   0x8   :  { %6075 = sst [smem:[#allocation42_spill]] %s6034_s7 }
   0x9   :  { %6076 = sst [smem:[#allocation43_spill]] %s6035_s8 }
   0xa   :  { %6077 = sst [smem:[#allocation44_spill]] %s6036_s9 }
   0xb   :  { %6078 = sst [smem:[#allocation45_spill]] %s6037_s10 }
   0xc   :  { %6079 = sst [smem:[#allocation46_spill]] %s6038_s11 }
   0xd   :  { %6080 = sst [smem:[#allocation47_spill]] %s6053_s26 }
   0xe   :  { %6081 = sst [smem:[#allocation48_spill]] %s6054_s27 }
   0xf   :  { %32 = vsyncpa [#allocation6], 0 }
  0x10   :  { %33 = vsyncpa [#allocation9], 0 }
  0x11   :  { %34 = vsyncpa [#allocation12], 0 }
  0x12   :  { %35 = vsyncpa [#allocation15], 0 }
  0x13   :  { %36 = vsyncpa [#allocation18], 0 }
  0x14   :  { %37 = vsyncpa [#allocation21], 0 }
  0x15   :  { %38 = vsyncpa [#allocation24], 0 }
  0x16   :  { %39 = vsyncpa [#allocation7], 0  ;;  %s4670_s7 = smov [#allocation8]   ;;  %s4671_s8 = smov [#allocation11]  }
  0x17   :  { %s58_s4 = sshll.u32 %s4670_s7, 4  ;;  %s80_s30 = sshll.u32 %s4671_s8, 4  ;;  %s59_s4 = int_to_ptr.vmem [resolvable:$true] %s58_s4  ;;  %s81_s30 = int_to_ptr.vmem [resolvable:$true] %s80_s30 }
  0x18   :  { %s6082_s28 = sld [smem:[#allocation37_spill]] }
  0x1e   :  { %s4346_s0 = scalar_lea.hbm %s6082_s28, 64 }
  0x1f   :  { %p4347_p0 = scmp.ne.s32.totalorder %s6082_s28, %s4346_s0  ;;  %p4350_p1 = scmp.lt.u32.totalorder %s4346_s0, %s6082_s28 }
  0x21   :  { %p4352_p2 = pnand %p4350_p1, %p4347_p0 }
  0x23   :  { %4355 = shalt.err (!%p4352_p2)
}
  0x24   :  { %s4356_s11 = scalar_lea.vmem %s59_s4, 64  ;;  %p4361_p4 = scmp.lt.s32.totalorder %s59_s4, %s59_s4 }
  0x25   :  { %p4357_p3 = scmp.ne.s32.totalorder %s59_s4, %s4356_s11  ;;  %p4362_p5 = scmp.lt.s32.totalorder %s4356_s11, %s4356_s11 }
  0x27   :  { %p4363_p6 = por %p4362_p5, %p4361_p4 }
  0x29   :  { %p4364_p7 = pnand %p4363_p6, %p4357_p3 }
  0x2b   :  { %4367 = shalt.err (!%p4364_p7)
}
  0x2c   :  { %61 = dma.hbm_to_vmem [thread:$0]  %s6082_s28, 64, %s59_s4, [#allocation9]  }
  0x2d   :  { %s6083_s9 = sld [smem:[#allocation39_spill]] }
  0x33   :  { %s4368_s5 = scalar_lea.hbm %s6083_s9, 64 }
  0x34   :  { %p4369_p8 = scmp.ne.s32.totalorder %s6083_s9, %s4368_s5  ;;  %p4372_p9 = scmp.lt.u32.totalorder %s4368_s5, %s6083_s9 }
  0x36   :  { %p4374_p10 = pnand %p4372_p9, %p4369_p8 }
  0x38   :  { %4377 = shalt.err (!%p4374_p10)
}
  0x39   :  { %s4378_s6 = scalar_lea.vmem %s81_s30, 64  ;;  %p4383_p12 = scmp.lt.s32.totalorder %s81_s30, %s81_s30 }
  0x3a   :  { %p4379_p11 = scmp.ne.s32.totalorder %s81_s30, %s4378_s6  ;;  %p4384_p13 = scmp.lt.s32.totalorder %s4378_s6, %s4378_s6 }
  0x3c   :  { %p4385_p0 = por %p4384_p13, %p4383_p12 }
  0x3e   :  { %p4386_p1 = pnand %p4385_p0, %p4379_p11 }
  0x40   :  { %4389 = shalt.err (!%p4386_p1)
}
  0x41   :  { %83 = dma.hbm_to_vmem [thread:$0]  %s6083_s9, 64, %s81_s30, [#allocation12]  }
  0x42   :  { %s4672_s11 = smov [#allocation14]   ;;  %s4673_s3 = smov [#allocation17]  }
  0x43   :  { %s99_s2 = sshll.u32 %s4672_s11, 4  ;;  %s125_s7 = sshll.u32 %s4673_s3, 4  ;;  %s100_s2 = int_to_ptr.vmem [resolvable:$true] %s99_s2  ;;  %s4862_s7 = int_to_ptr.vmem [resolvable:$true] %s125_s7 }
  0x44   :  { %s6084_s10 = sld [smem:[#allocation41_spill]] }
  0x4a   :  { %s4390_s29 = scalar_lea.hbm %s6084_s10, 128 }
  0x4b   :  { %p4391_p2 = scmp.ne.s32.totalorder %s6084_s10, %s4390_s29  ;;  %p4394_p3 = scmp.lt.u32.totalorder %s4390_s29, %s6084_s10 }
  0x4d   :  { %p4396_p4 = pnand %p4394_p3, %p4391_p2 }
  0x4f   :  { %4399 = shalt.err (!%p4396_p4)
}
  0x50   :  { %s4400_s30 = scalar_lea.vmem %s100_s2, 128  ;;  %p4405_p6 = scmp.lt.s32.totalorder %s100_s2, %s100_s2 }
  0x51   :  { %p4401_p5 = scmp.ne.s32.totalorder %s100_s2, %s4400_s30  ;;  %p4406_p7 = scmp.lt.s32.totalorder %s4400_s30, %s4400_s30 }
  0x53   :  { %p4407_p8 = por %p4406_p7, %p4405_p6 }
  0x55   :  { %p4408_p9 = pnand %p4407_p8, %p4401_p5 }
  0x57   :  { %4411 = shalt.err (!%p4408_p9)
}
  0x58   :  { %s4674_s9 = smov 64   ;;  %s4675_s4 = smov 4  }
  0x59   :  { %105 = dma.hbm_to_vmem [thread:$0]  %s6084_s10, 128, %s100_s2, [#allocation15], %s4674_s9, %s4674_s9, %s4675_s4  }
  0x5a   :  { %s6085_s8 = sld [smem:[#allocation45_spill]] }
  0x60   :  { %s4412_s5 = scalar_lea.hbm %s6085_s8, 192 }
  0x61   :  { %p4413_p10 = scmp.ne.s32.totalorder %s6085_s8, %s4412_s5  ;;  %p4416_p11 = scmp.lt.u32.totalorder %s4412_s5, %s6085_s8 }
  0x63   :  { %p4418_p12 = pnand %p4416_p11, %p4413_p10 }
  0x65   :  { %4421 = shalt.err (!%p4418_p12)
}
  0x66   :  { %s4422_s30 = scalar_lea.vmem %s4862_s7, 192  ;;  %p4427_p0 = scmp.lt.s32.totalorder %s4862_s7, %s4862_s7 }
  0x67   :  { %p4423_p13 = scmp.ne.s32.totalorder %s4862_s7, %s4422_s30  ;;  %p4428_p1 = scmp.lt.s32.totalorder %s4422_s30, %s4422_s30 }
  0x69   :  { %p4429_p2 = por %p4428_p1, %p4427_p0 }
  0x6b   :  { %p4430_p3 = pnand %p4429_p2, %p4423_p13 }
  0x6d   :  { %4433 = shalt.err (!%p4430_p3)
}
  0x6e   :  { %131 = dma.hbm_to_vmem [thread:$0]  %s6085_s8, 192, %s4862_s7, [#allocation18], %s4674_s9, %s4674_s9, %s4675_s4  }
  0x6f   :  { %s4676_s28 = smov [#allocation20]   ;;  %s4677_s27 = smov [#allocation23]  }
  0x70   :  { %s156_s11 = sshll.u32 %s4676_s28, 4  ;;  %s181_s3 = sshll.u32 %s4677_s27, 4  ;;  %s157_s11 = int_to_ptr.vmem [resolvable:$true] %s156_s11  ;;  %s4899_s3 = int_to_ptr.vmem [resolvable:$true] %s181_s3 }
  0x71   :  { %s4434_s0 = scalar_lea.hbm %s6042_s15, 32 }
  0x72   :  { %p4435_p4 = scmp.ne.s32.totalorder %s6042_s15, %s4434_s0  ;;  %p4438_p5 = scmp.lt.u32.totalorder %s4434_s0, %s6042_s15 }
  0x74   :  { %p4440_p6 = pnand %p4438_p5, %p4435_p4 }
  0x76   :  { %4443 = shalt.err (!%p4440_p6)
}
  0x77   :  { %s4444_s7 = scalar_lea.vmem %s157_s11, 32  ;;  %p4449_p8 = scmp.lt.s32.totalorder %s157_s11, %s157_s11 }
  0x78   :  { %p4445_p7 = scmp.ne.s32.totalorder %s157_s11, %s4444_s7  ;;  %p4450_p9 = scmp.lt.s32.totalorder %s4444_s7, %s4444_s7 }
  0x7a   :  { %p4451_p10 = por %p4450_p9, %p4449_p8 }
  0x7c   :  { %p4452_p11 = pnand %p4451_p10, %p4445_p7 }
  0x7e   :  { %4455 = shalt.err (!%p4452_p11)
}
  0x7f   :  { %159 = dma.hbm_to_vmem [thread:$0]  %s6042_s15, 32, %s157_s11, [#allocation21]  }
  0x80   :  { %s4456_s27 = scalar_lea.hbm %s6047_s20, 192 }
  0x81   :  { %p4457_p12 = scmp.ne.s32.totalorder %s6047_s20, %s4456_s27  ;;  %p4460_p13 = scmp.lt.u32.totalorder %s4456_s27, %s6047_s20 }
  0x83   :  { %p4462_p0 = pnand %p4460_p13, %p4457_p12 }
  0x85   :  { %4465 = shalt.err (!%p4462_p0)
}
  0x86   :  { %s4466_s1 = scalar_lea.vmem %s4899_s3, 192  ;;  %p4471_p2 = scmp.lt.s32.totalorder %s4899_s3, %s4899_s3 }
  0x87   :  { %p4467_p1 = scmp.ne.s32.totalorder %s4899_s3, %s4466_s1  ;;  %p4472_p3 = scmp.lt.s32.totalorder %s4466_s1, %s4466_s1 }
  0x89   :  { %p4473_p4 = por %p4472_p3, %p4471_p2 }
  0x8b   :  { %p4474_p5 = pnand %p4473_p4, %p4467_p1 }
  0x8d   :  { %4477 = shalt.err (!%p4474_p5)
}
  0x8e   :  { %187 = dma.hbm_to_vmem [thread:$0]  %s6047_s20, 192, %s4899_s3, [#allocation24], %s4674_s9, %s4674_s9, %s4675_s4  }
  0x8f   :  { %s4678_s6 = smov [#allocation5]   ;;  %s4679_s7 = smov [#allocation10]  }
  0x90   :  { %s48_s30 = sshll.u32 %s4678_s6, 4  ;;  %s67_s8 = sshll.u32 %s4679_s7, 4  ;;  %s49_s30 = int_to_ptr.vmem [resolvable:$true] %s48_s30  ;;  %s4933_s8 = int_to_ptr.vmem [resolvable:$true] %s67_s8 }
  0x91   :  { %s6086_s28 = sld [smem:[#allocation36_spill]] }
  0x97   :  { %s4478_s27 = scalar_lea.hbm %s6086_s28, 64 }
  0x98   :  { %p4479_p6 = scmp.ne.s32.totalorder %s6086_s28, %s4478_s27  ;;  %p4482_p7 = scmp.lt.u32.totalorder %s4478_s27, %s6086_s28 }
  0x9a   :  { %p4484_p8 = pnand %p4482_p7, %p4479_p6 }
  0x9c   :  { %4487 = shalt.err (!%p4484_p8)
}
  0x9d   :  { %s4488_s20 = scalar_lea.vmem %s49_s30, 64  ;;  %p4493_p10 = scmp.lt.s32.totalorder %s49_s30, %s49_s30 }
  0x9e   :  { %p4489_p9 = scmp.ne.s32.totalorder %s49_s30, %s4488_s20  ;;  %p4494_p11 = scmp.lt.s32.totalorder %s4488_s20, %s4488_s20 }
  0xa0   :  { %p4495_p12 = por %p4494_p11, %p4493_p10 }
  0xa2   :  { %p4496_p13 = pnand %p4495_p12, %p4489_p9 }
  0xa4   :  { %4499 = shalt.err (!%p4496_p13)
}
  0xa5   :  { %51 = dma.hbm_to_vmem [thread:$0]  %s6086_s28, 64, %s49_s30, [#allocation6]  }
  0xa6   :  { %s6087_s6 = sld [smem:[#allocation38_spill]] }
  0xac   :  { %s4500_s7 = scalar_lea.hbm %s6087_s6, 192 }
  0xad   :  { %p4501_p0 = scmp.ne.s32.totalorder %s6087_s6, %s4500_s7  ;;  %p4504_p1 = scmp.lt.u32.totalorder %s4500_s7, %s6087_s6 }
  0xaf   :  { %p4506_p2 = pnand %p4504_p1, %p4501_p0 }
  0xb1   :  { %4509 = shalt.err (!%p4506_p2)
}
  0xb2   :  { %s4510_s26 = scalar_lea.vmem %s4933_s8, 192  ;;  %p4515_p4 = scmp.lt.s32.totalorder %s4933_s8, %s4933_s8 }
  0xb3   :  { %p4511_p3 = scmp.ne.s32.totalorder %s4933_s8, %s4510_s26  ;;  %p4516_p5 = scmp.lt.s32.totalorder %s4510_s26, %s4510_s26 }
  0xb5   :  { %p4517_p6 = por %p4516_p5, %p4515_p4 }
  0xb7   :  { %p4518_p7 = pnand %p4517_p6, %p4511_p3 }
  0xb9   :  { %4521 = shalt.err (!%p4518_p7)
}
  0xba   :  { %73 = dma.hbm_to_vmem [thread:$0]  %s6087_s6, 192, %s4933_s8, [#allocation9], %s4674_s9, %s4674_s9, %s4675_s4  }
  0xbb   :  { %s4680_s29 = smov [#allocation13]   ;;  %s4681_s20 = smov [#allocation16]  }
  0xbc   :  { %s90_s0 = sshll.u32 %s4680_s29, 4  ;;  %s116_s3 = sshll.u32 %s4681_s20, 4  ;;  %s91_s0 = int_to_ptr.vmem [resolvable:$true] %s90_s0  ;;  %s117_s3 = int_to_ptr.vmem [resolvable:$true] %s116_s3 }
  0xbd   :  { %s6088_s11 = sld [smem:[#allocation40_spill]] }
  0xc3   :  { %s4522_s7 = scalar_lea.hbm %s6088_s11, 32 }
  0xc4   :  { %p4523_p8 = scmp.ne.s32.totalorder %s6088_s11, %s4522_s7  ;;  %p4526_p9 = scmp.lt.u32.totalorder %s4522_s7, %s6088_s11 }
  0xc6   :  { %p4528_p10 = pnand %p4526_p9, %p4523_p8 }
  0xc8   :  { %4531 = shalt.err (!%p4528_p10)
}
  0xc9   :  { %s4532_s8 = scalar_lea.vmem %s91_s0, 32  ;;  %p4537_p12 = scmp.lt.s32.totalorder %s91_s0, %s91_s0 }
  0xca   :  { %p4533_p11 = scmp.ne.s32.totalorder %s91_s0, %s4532_s8  ;;  %p4538_p13 = scmp.lt.s32.totalorder %s4532_s8, %s4532_s8 }
  0xcc   :  { %p4539_p0 = por %p4538_p13, %p4537_p12 }
  0xce   :  { %p4540_p1 = pnand %p4539_p0, %p4533_p11 }
  0xd0   :  { %4543 = shalt.err (!%p4540_p1)
}
  0xd1   :  { %93 = dma.hbm_to_vmem [thread:$0]  %s6088_s11, 32, %s91_s0, [#allocation12]  }
  0xd2   :  { %s6089_s29 = sld [smem:[#allocation44_spill]] }
  0xd8   :  { %s4544_s20 = scalar_lea.hbm %s6089_s29, 32 }
  0xd9   :  { %p4545_p2 = scmp.ne.s32.totalorder %s6089_s29, %s4544_s20  ;;  %p4548_p3 = scmp.lt.u32.totalorder %s4544_s20, %s6089_s29 }
  0xdb   :  { %p4550_p4 = pnand %p4548_p3, %p4545_p2 }
  0xdd   :  { %4553 = shalt.err (!%p4550_p4)
}
  0xde   :  { %s4554_s10 = scalar_lea.vmem %s117_s3, 32  ;;  %p4559_p6 = scmp.lt.s32.totalorder %s117_s3, %s117_s3 }
  0xdf   :  { %p4555_p5 = scmp.ne.s32.totalorder %s117_s3, %s4554_s10  ;;  %p4560_p7 = scmp.lt.s32.totalorder %s4554_s10, %s4554_s10 }
  0xe1   :  { %p4561_p8 = por %p4560_p7, %p4559_p6 }
  0xe3   :  { %p4562_p9 = pnand %p4561_p8, %p4555_p5 }
  0xe5   :  { %4565 = shalt.err (!%p4562_p9)
}
  0xe6   :  { %119 = dma.hbm_to_vmem [thread:$0]  %s6089_s29, 32, %s117_s3, [#allocation15]  }
  0xe7   :  { %s4682_s27 = smov [#allocation19]   ;;  %s4683_s8 = smov [#allocation22]  }
  0xe8   :  { %s143_s5 = sshll.u32 %s4682_s27, 4  ;;  %s172_s6 = sshll.u32 %s4683_s8, 4  ;;  %s144_s5 = int_to_ptr.vmem [resolvable:$true] %s143_s5  ;;  %s173_s6 = int_to_ptr.vmem [resolvable:$true] %s172_s6 }
  0xe9   :  { %s4566_s28 = scalar_lea.hbm %s6041_s14, 256 }
  0xea   :  { %p4567_p10 = scmp.ne.s32.totalorder %s6041_s14, %s4566_s28  ;;  %p4570_p11 = scmp.lt.u32.totalorder %s4566_s28, %s6041_s14 }
  0xec   :  { %p4572_p12 = pnand %p4570_p11, %p4567_p10 }
  0xee   :  { %4575 = shalt.err (!%p4572_p12)
}
  0xef   :  { %s4576_s3 = scalar_lea.vmem %s144_s5, 256  ;;  %p4581_p0 = scmp.lt.s32.totalorder %s144_s5, %s144_s5 }
  0xf0   :  { %p4577_p13 = scmp.ne.s32.totalorder %s144_s5, %s4576_s3  ;;  %p4582_p1 = scmp.lt.s32.totalorder %s4576_s3, %s4576_s3 }
  0xf2   :  { %p4583_p2 = por %p4582_p1, %p4581_p0 }
  0xf4   :  { %p4584_p3 = pnand %p4583_p2, %p4577_p13 }
  0xf6   :  { %4587 = shalt.err (!%p4584_p3)
}
  0xf7   :  { %149 = dma.hbm_to_vmem [thread:$0]  %s6041_s14, 256, %s144_s5, [#allocation18], %s4674_s9, %s4674_s9, %s4675_s4  }
  0xf8   :  { %s4588_s11 = scalar_lea.hbm %s6046_s19, 32 }
  0xf9   :  { %p4589_p4 = scmp.ne.s32.totalorder %s6046_s19, %s4588_s11  ;;  %p4592_p5 = scmp.lt.u32.totalorder %s4588_s11, %s6046_s19 }
  0xfb   :  { %p4594_p6 = pnand %p4592_p5, %p4589_p4 }
  0xfd   :  { %4597 = shalt.err (!%p4594_p6)
}
  0xfe   :  { %s4598_s28 = scalar_lea.vmem %s173_s6, 32  ;;  %p4603_p8 = scmp.lt.s32.totalorder %s173_s6, %s173_s6 }
  0xff   :  { %p4599_p7 = scmp.ne.s32.totalorder %s173_s6, %s4598_s28  ;;  %p4604_p9 = scmp.lt.s32.totalorder %s4598_s28, %s4598_s28 }
 0x101   :  { %p4605_p10 = por %p4604_p9, %p4603_p8 }
 0x103   :  { %p4606_p11 = pnand %p4605_p10, %p4599_p7 }
 0x105   :  { %4609 = shalt.err (!%p4606_p11)
}
 0x106   :  { %175 = dma.hbm_to_vmem [thread:$0]  %s6046_s19, 32, %s173_s6, [#allocation21]  }
 0x107   :  { %s4684_s20 = smov [#allocation25]   ;;  %s4610_s3 = scalar_lea.hbm %s6052_s25, 256 }
 0x108   :  { %s201_s1 = sshll.u32 %s4684_s20, 4  ;;  %p4611_p12 = scmp.ne.s32.totalorder %s6052_s25, %s4610_s3  ;;  %s202_s1 = int_to_ptr.vmem [resolvable:$true] %s201_s1 }
 0x109   :  { %p4614_p13 = scmp.lt.u32.totalorder %s4610_s3, %s6052_s25 }
 0x10b   :  { %p4616_p0 = pnand %p4614_p13, %p4611_p12 }
 0x10d   :  { %4619 = shalt.err (!%p4616_p0)
}
 0x10e   :  { %s4620_s11 = scalar_lea.vmem %s202_s1, 256  ;;  %p4625_p2 = scmp.lt.s32.totalorder %s202_s1, %s202_s1 }
 0x10f   :  { %p4621_p1 = scmp.ne.s32.totalorder %s202_s1, %s4620_s11  ;;  %p4626_p3 = scmp.lt.s32.totalorder %s4620_s11, %s4620_s11 }
 0x111   :  { %p4627_p4 = por %p4626_p3, %p4625_p2 }
 0x113   :  { %p4628_p5 = pnand %p4627_p4, %p4621_p1 }
 0x115   :  { %4631 = shalt.err (!%p4628_p5)
}
 0x116   :  { %s4685_s19 = smov 128   ;;  %s4686_s6 = smov 8  }
 0x117   :  { %207 = dma.hbm_to_vmem [thread:$0]  %s6052_s25, 256, %s202_s1, [#allocation24], %s4685_s19, %s4685_s19, %s4686_s6  }
 0x118   :  { %4654 = dma.done.wait [#allocation6], 64  }
 0x119   :  { %4655 = vsyncadd [#allocation6], 4294967232 }
 0x11a   :  { %4656 = dma.done.wait [#allocation9], 256  }
 0x11b   :  { %4657 = vsyncadd [#allocation9], 4294967040 }
 0x11c   :  { %4658 = dma.done.wait [#allocation12], 96  }
 0x11d   :  { %4659 = vsyncadd [#allocation12], 4294967200 }
 0x11e   :  { %4660 = dma.done.wait [#allocation15], 160  }
 0x11f   :  { %4661 = vsyncadd [#allocation15], 4294967136 }
 0x120   :  { %4662 = dma.done.wait [#allocation18], 448  }
 0x121   :  { %4663 = vsyncadd [#allocation18], 4294966848 }
 0x122   :  { %4664 = dma.done.wait [#allocation21], 64  }
 0x123   :  { %4665 = vsyncadd [#allocation21], 4294967232 }
 0x124   :  { %4666 = dma.done.wait [#allocation24], 448  }
 0x125   :  { %4667 = vsyncadd [#allocation24], 4294966848  ;;  %vm267_vm0 = vcmask 7168   ;;  %v4687_v0 = vmov 0.0   ;;  %vm270_vm1 = vcmask 1024   ;;  %s6090_s30 = sld [smem:[#allocation35_spill]] }
 0x126   :  { %268 = vst.msk [vmem:[#allocation3] sm:$0xff] %vm267_vm0, %v4687_v0  ;;  %269 = vst.msk [vmem:[#allocation3 + $0x50] sm:$0xff] %vm267_vm0, %v4687_v0  ;;  %s4688_s11 = smov 1   ;;  %s4690_s19 = smov 3   ;;  %vm763_vm2 = vcmask 1041408   ;;  %vm764_vm3 = vcmask 1042432  }
 0x127   :  { %271 = vst.msk [vmem:[#allocation3 + $0x48] sm:$0x3] %vm270_vm1, %v4687_v0  ;;  %272 = vst.msk [vmem:[#allocation3 + $0x98] sm:$0x3] %vm270_vm1, %v4687_v0  ;;  %v4691_v29 = vmov 65535   ;;  %vm401_vm4 = vcmask 15368  }
 0x128   :  { %v765_v30 = vsel %vm763_vm2, 4294967295, %v4691_v29  ;;  %v733_v40 = vld [vmem:[#allocation5] sm:$0x7]  ;;  %vm498_vm5 = vcmask 23568   ;;  %vm595_vm6 = vcmask 31768   ;;  %vm692_vm7 = vcmask 39968  }
 0x129   :  { %v766_v35 = vsel %vm764_vm3, %v765_v30, 0  ;;  %vm738_vm8 = vcmask 39936   ;;  %vm869_vm9 = vcmask 64512   ;;  %vm1096_vm10 = vcmask 57344   ;;  %s6091_s8 = sld [smem:[#allocation43_spill]]  ;;  %s6092_s28 = sld [smem:[#allocation42_spill]] }
 0x12a   :  { %v768_v44 = vand.u32 %v766_v35, %v733_v40  ;;  %vm1732_vm11 = vcmask 253952   ;;  %vm1262_vm12 = vcmask 1043456   ;;  %vm1163_vm13 = vcmask 130112   ;;  %s4693_s2 = smov 32   ;;  %s6093_s25 = sld [smem:[#allocation46_spill]] }
 0x12b   :  { %v251_v1 = vld [vmem:[%s6090_s30 + $0x8] sm:$0xff]  ;;  %v252_v2 = vld [vmem:[%s6090_s30 + $0x10] sm:$0xff]  ;;  %v250_v3 = vld [vmem:[%s6090_s30] sm:$0xff]  ;;  %vm1212_vm14 = vcmask 195712   ;;  %vm1249_vm15 = vcmask 195584   ;;  %vm1634_vm1 = vcmask 261120  }
 0x12c   :  { %274 = vst.msk [vmem:[#allocation3 + $0x10] sm:$0xff] %vm267_vm0, %v251_v1  ;;  %275 = vst.msk [vmem:[#allocation3 + $0x18] sm:$0xff] %vm267_vm0, %v252_v2  ;;  %v253_v4 = vld [vmem:[%s6090_s30 + $0x18] sm:$0xff]  ;;  %v254_v5 = vld [vmem:[%s6090_s30 + $0x20] sm:$0xff]  ;;  %4087 = vmatprep.subr.bf16.mxu0 %v768_v44  ;;  %vm1799_vm2 = vcmask 523520   ;;  %vm1848_vm3 = vcmask 785920  }
 0x12d   :  { %273 = vst.msk [vmem:[#allocation3 + $0x8] sm:$0xff] %vm267_vm0, %v250_v3  ;;  %v255_v6 = vld [vmem:[%s6090_s30 + $0x28] sm:$0xff]  ;;  %276 = vst.msk [vmem:[#allocation3 + $0x20] sm:$0xff] %vm267_vm0, %v253_v4  ;;  %v256_v7 = vld [vmem:[%s6090_s30 + $0x30] sm:$0xff]  ;;  %4088 = vmatpush3.bf16.msra.mxu0 %v768_v44  ;;  %s6094_s7 = sld [smem:[#allocation47_spill]]  ;;  %s4697_s3 = smov [#allocation26]  }
 0x12e   :  { %277 = vst.msk [vmem:[#allocation3 + $0x28] sm:$0xff] %vm267_vm0, %v254_v5  ;;  %278 = vst.msk [vmem:[#allocation3 + $0x30] sm:$0xff] %vm267_vm0, %v255_v6  ;;  %v257_v8 = vld [vmem:[%s6090_s30 + $0x38] sm:$0xff]  ;;  %v258_v9 = vld [vmem:[%s6090_s30 + $0x40] sm:$0xff]  ;;  %s3896_s29 = sshll.u32 %s4697_s3, 4  ;;  %s3897_s29 = int_to_ptr.vmem [resolvable:$true] %s3896_s29 }
 0x12f   :  { %279 = vst.msk [vmem:[#allocation3 + $0x38] sm:$0xff] %vm267_vm0, %v256_v7  ;;  %280 = vst.msk [vmem:[#allocation3 + $0x40] sm:$0xff] %vm267_vm0, %v257_v8  ;;  %v259_v10 = vld [vmem:[%s6090_s30 + $0x48] sm:$0xff]  ;;  %v260_v11 = vld [vmem:[%s6090_s30 + $0x50] sm:$0xff]  ;;  %s4632_s10 = scalar_lea.vmem %s3897_s29, 32  ;;  %p4637_p7 = scmp.lt.s32.totalorder %s3897_s29, %s3897_s29 }
 0x130   :  { %281 = vst.msk [vmem:[#allocation3 + $0x58] sm:$0xff] %vm267_vm0, %v258_v9  ;;  %v261_v12 = vld [vmem:[%s6090_s30 + $0x58] sm:$0xff]  ;;  %282 = vst.msk [vmem:[#allocation3 + $0x60] sm:$0xff] %vm267_vm0, %v259_v10  ;;  %v262_v13 = vld [vmem:[%s6090_s30 + $0x60] sm:$0xff]  ;;  %p4633_p6 = scmp.ne.s32.totalorder %s3897_s29, %s4632_s10  ;;  %p4638_p8 = scmp.lt.s32.totalorder %s4632_s10, %s4632_s10 }
 0x131   :  { %283 = vst.msk [vmem:[#allocation3 + $0x68] sm:$0xff] %vm267_vm0, %v260_v11  ;;  %284 = vst.msk [vmem:[#allocation3 + $0x70] sm:$0xff] %vm267_vm0, %v261_v12  ;;  %v263_v14 = vld [vmem:[%s6090_s30 + $0x68] sm:$0xff]  ;;  %v264_v15 = vld [vmem:[%s6090_s30 + $0x70] sm:$0xff] }
 0x132   :  { %285 = vst.msk [vmem:[#allocation3 + $0x78] sm:$0xff] %vm267_vm0, %v262_v13  ;;  %286 = vst.msk [vmem:[#allocation3 + $0x80] sm:$0xff] %vm267_vm0, %v263_v14  ;;  %v265_v16 = vld [vmem:[%s6090_s30 + $0x78] sm:$0xff]  ;;  %s4689_s30 = smov 2   ;;  %p4639_p9 = por %p4638_p8, %p4637_p7 }
 0x133   :  { %287 = vst.msk [vmem:[#allocation3 + $0x88] sm:$0xff] %vm267_vm0, %v264_v15  ;;  %288 = vst.msk [vmem:[#allocation3 + $0x90] sm:$0xff] %vm267_vm0, %v265_v16  ;;  %v323_v17 = vld [vmem:[#allocation3 + $0x17] sm:$0xff] }
 0x134   :  { %v321_v18 = vld [vmem:[#allocation3 + $0x7] sm:$0xff]  ;;  %357 = vrot.lane.b32.xlu1 %v323_v17, %s4688_s11  ;;  %v324_v19 = vld [vmem:[#allocation3 + $0x1f] sm:$0xff]  ;;  %v322_v20 = vld [vmem:[#allocation3 + $0xf] sm:$0xff]  ;;  %p4640_p10 = pnand %p4639_p9, %p4633_p6 }
 0x135   :  { %353 = vrot.lane.b32.xlu0 %v321_v18, %s4688_s11  ;;  %v419_v21 = vld [vmem:[#allocation3 + $0x10] sm:$0xff]  ;;  %v418_v22 = vld [vmem:[#allocation3 + $0x8] sm:$0xff]  ;;  %v421_v23 = vld [vmem:[#allocation3 + $0x20] sm:$0xff] }
 0x136   :  { %v420_v24 = vld [vmem:[#allocation3 + $0x18] sm:$0xff]  ;;  %v515_v26 = vld [vmem:[#allocation3 + $0x9] sm:$0xff]  ;;  %v518_v27 = vld [vmem:[#allocation3 + $0x21] sm:$0xff] }
 0x137   :  { %v516_v25 = vld [vmem:[#allocation3 + $0x11] sm:$0xff]  ;;  %v517_v28 = vld [vmem:[#allocation3 + $0x19] sm:$0xff]  ;;  %v289_v32 = vld [vmem:[#allocation3 + $0x6] sm:$0xff] }
 0x138   :  { %359 = vrot.lane.b32.xlu1 %v324_v19, %s4688_s11  ;;  %v291_v31 = vld [vmem:[#allocation3 + $0x16] sm:$0xff]  ;;  %305 = vst.msk [vmem:[#allocation4] sm:$0xff] %vm267_vm0, %v289_v32  ;;  %v292_v33 = vld [vmem:[#allocation3 + $0x1e] sm:$0xff]  ;;  %v290_v34 = vld [vmem:[#allocation3 + $0xe] sm:$0xff] }
 0x139   :  { %355 = vrot.lane.b32.xlu0 %v322_v20, %s4688_s11  ;;  %307 = vst.msk [vmem:[#allocation4 + $0x10] sm:$0xff] %vm267_vm0, %v291_v31  ;;  %308 = vst.msk [vmem:[#allocation4 + $0x18] sm:$0xff] %vm267_vm0, %v292_v33  ;;  %v613_v36 = vld [vmem:[#allocation3 + $0x12] sm:$0xff]  ;;  %v612_v37 = vld [vmem:[#allocation3 + $0xa] sm:$0xff] }
 0x13a   :  { %306 = vst.msk [vmem:[#allocation4 + $0x8] sm:$0xff] %vm267_vm0, %v290_v34  ;;  %v294_v38 = vld [vmem:[#allocation3 + $0x2e] sm:$0xff]  ;;  %v293_v39 = vld [vmem:[#allocation3 + $0x26] sm:$0xff]  ;;  %v296_v41 = vld [vmem:[#allocation3 + $0x3e] sm:$0xff] }
 0x13b   :  { %310 = vst.msk [vmem:[#allocation4 + $0x28] sm:$0xff] %vm267_vm0, %v294_v38  ;;  %v615_v42 = vld [vmem:[#allocation3 + $0x22] sm:$0xff]  ;;  %v614_v43 = vld [vmem:[#allocation3 + $0x1a] sm:$0xff]  ;;  %309 = vst.msk [vmem:[#allocation4 + $0x20] sm:$0xff] %vm267_vm0, %v293_v39 }
 0x13c   :  { %452 = vrot.lane.b32.xlu1 %v419_v21, %s4689_s30  ;;  %312 = vst.msk [vmem:[#allocation4 + $0x38] sm:$0xff] %vm267_vm0, %v296_v41  ;;  %v295_v45 = vld [vmem:[#allocation3 + $0x36] sm:$0xff]  ;;  %v325_v47 = vld [vmem:[#allocation3 + $0x27] sm:$0xff]  ;;  %v328_v48 = vld [vmem:[#allocation3 + $0x3f] sm:$0xff] }
 0x13d   :  { %450 = vrot.lane.b32.xlu0 %v418_v22, %s4689_s30  ;;  %311 = vst.msk [vmem:[#allocation4 + $0x30] sm:$0xff] %vm267_vm0, %v295_v45  ;;  %v326_v46 = vld [vmem:[#allocation3 + $0x2f] sm:$0xff]  ;;  %v327_v49 = vld [vmem:[#allocation3 + $0x37] sm:$0xff]  ;;  %v425_v52 = vld [vmem:[#allocation3 + $0x40] sm:$0xff] }
 0x13e   :  { %v423_v50 = vld [vmem:[#allocation3 + $0x30] sm:$0xff]  ;;  %v422_v51 = vld [vmem:[#allocation3 + $0x28] sm:$0xff]  ;;  %v424_v53 = vld [vmem:[#allocation3 + $0x38] sm:$0xff] }
 0x13f   :  { %v520_v54 = vld [vmem:[#allocation3 + $0x31] sm:$0xff]  ;;  %v519_v55 = vld [vmem:[#allocation3 + $0x29] sm:$0xff]  ;;  %v298_v56 = vld [vmem:[#allocation3 + $0x5e] sm:$0xff] }
 0x140   :  { %456 = vrot.lane.b32.xlu1 %v421_v23, %s4689_s30  ;;  %314 = vst.msk [vmem:[#allocation4 + $0x48] sm:$0xff] %vm267_vm0, %v298_v56  ;;  %v522_v57 = vld [vmem:[#allocation3 + $0x41] sm:$0xff]  ;;  %v521_v58 = vld [vmem:[#allocation3 + $0x39] sm:$0xff]  ;;  %v616_v61 = vld [vmem:[#allocation3 + $0x2a] sm:$0xff] }
 0x141   :  { %454 = vrot.lane.b32.xlu0 %v420_v24, %s4689_s30  ;;  %v297_v59 = vld [vmem:[#allocation3 + $0x56] sm:$0xff]  ;;  %v300_v62 = vld [vmem:[#allocation3 + $0x6e] sm:$0xff]  ;;  %v299_v63 = vld [vmem:[#allocation3 + $0x66] sm:$0xff] }
 0x142   :  { %313 = vst.msk [vmem:[#allocation4 + $0x40] sm:$0xff] %vm267_vm0, %v297_v59  ;;  %v617_v60 = vld [vmem:[#allocation3 + $0x32] sm:$0xff]  ;;  %316 = vst.msk [vmem:[#allocation4 + $0x58] sm:$0xff] %vm267_vm0, %v300_v62  ;;  %v619_v1 = vld [vmem:[#allocation3 + $0x42] sm:$0xff] }
 0x143   :  { %315 = vst.msk [vmem:[#allocation4 + $0x50] sm:$0xff] %vm267_vm0, %v299_v63  ;;  %v618_v2 = vld [vmem:[#allocation3 + $0x3a] sm:$0xff]  ;;  %v332_v5 = vld [vmem:[#allocation3 + $0x6f] sm:$0xff]  ;;  %v331_v6 = vld [vmem:[#allocation3 + $0x67] sm:$0xff] }
 0x144   :  { %549 = vrot.lane.b32.xlu1 %v516_v25, %s4690_s19  ;;  %v330_v3 = vld [vmem:[#allocation3 + $0x5f] sm:$0xff]  ;;  %v329_v4 = vld [vmem:[#allocation3 + $0x57] sm:$0xff]  ;;  %v428_v10 = vld [vmem:[#allocation3 + $0x68] sm:$0xff] }
 0x145   :  { %547 = vrot.lane.b32.xlu0 %v515_v26, %s4690_s19  ;;  %v427_v7 = vld [vmem:[#allocation3 + $0x60] sm:$0xff]  ;;  %v426_v8 = vld [vmem:[#allocation3 + $0x58] sm:$0xff]  ;;  %v429_v9 = vld [vmem:[#allocation3 + $0x70] sm:$0xff] }
 0x146   :  { %v524_v11 = vld [vmem:[#allocation3 + $0x61] sm:$0xff]  ;;  %v523_v12 = vld [vmem:[#allocation3 + $0x59] sm:$0xff]  ;;  %v526_v14 = vld [vmem:[#allocation3 + $0x71] sm:$0xff] }
 0x147   :  { %v302_v13 = vld [vmem:[#allocation3 + $0x7e] sm:$0xff]  ;;  %v525_v15 = vld [vmem:[#allocation3 + $0x69] sm:$0xff]  ;;  %v301_v16 = vld [vmem:[#allocation3 + $0x76] sm:$0xff] }
 0x148   :  { %553 = vrot.lane.b32.xlu1 %v518_v27, %s4690_s19  ;;  %318 = vst.msk [vmem:[#allocation4 + $0x68] sm:$0xff] %vm267_vm0, %v302_v13  ;;  %317 = vst.msk [vmem:[#allocation4 + $0x60] sm:$0xff] %vm267_vm0, %v301_v16  ;;  %v621_v17 = vld [vmem:[#allocation3 + $0x62] sm:$0xff]  ;;  %v620_v18 = vld [vmem:[#allocation3 + $0x5a] sm:$0xff] }
 0x149   :  { %551 = vrot.lane.b32.xlu0 %v517_v28, %s4690_s19  ;;  %v304_v19 = vld [vmem:[#allocation3 + $0x8e] sm:$0xff]  ;;  %v303_v20 = vld [vmem:[#allocation3 + $0x86] sm:$0xff]  ;;  %v333_v24 = vld [vmem:[#allocation3 + $0x77] sm:$0xff] }
 0x14a   :  { %320 = vst.msk [vmem:[#allocation4 + $0x78] sm:$0xff] %vm267_vm0, %v304_v19  ;;  %319 = vst.msk [vmem:[#allocation4 + $0x70] sm:$0xff] %vm267_vm0, %v303_v20  ;;  %v623_v21 = vld [vmem:[#allocation3 + $0x72] sm:$0xff]  ;;  %v622_v22 = vld [vmem:[#allocation3 + $0x6a] sm:$0xff]  ;;  %vm1333_vm0 = vcmask 130048  }
 0x14b   :  { %v334_v23 = vld [vmem:[#allocation3 + $0x7f] sm:$0xff]  ;;  %v336_v25 = vld [vmem:[#allocation3 + $0x8f] sm:$0xff]  ;;  %v335_v26 = vld [vmem:[#allocation3 + $0x87] sm:$0xff] }
 0x14c   :  { %646 = vrot.lane.b32.xlu1 %v613_v36, %s4675_s4  ;;  %v431_v27 = vld [vmem:[#allocation3 + $0x80] sm:$0xff]  ;;  %v430_v28 = vld [vmem:[#allocation3 + $0x78] sm:$0xff]  ;;  %v433_v29 = vld [vmem:[#allocation3 + $0x90] sm:$0xff] }
 0x14d   :  { %644 = vrot.lane.b32.xlu0 %v612_v37, %s4675_s4  ;;  %v432_v30 = vld [vmem:[#allocation3 + $0x88] sm:$0xff]  ;;  %v527_v32 = vld [vmem:[#allocation3 + $0x79] sm:$0xff]  ;;  %v530_v33 = vld [vmem:[#allocation3 + $0x91] sm:$0xff] }
 0x14e   :  { %v528_v31 = vld [vmem:[#allocation3 + $0x81] sm:$0xff]  ;;  %v529_v34 = vld [vmem:[#allocation3 + $0x89] sm:$0xff]  ;;  %v627_v41 = vld [vmem:[#allocation3 + $0x92] sm:$0xff] }
 0x14f   :  { %v625_v37 = vld [vmem:[#allocation3 + $0x82] sm:$0xff]  ;;  %v624_v38 = vld [vmem:[#allocation3 + $0x7a] sm:$0xff] }
 0x150   :  { %650 = vrot.lane.b32.xlu1 %v615_v42, %s4675_s4  ;;  %v626_v42 = vld [vmem:[#allocation3 + $0x8a] sm:$0xff] }
 0x151   :  { %648 = vrot.lane.b32.xlu0 %v614_v43, %s4675_s4 }
 0x154   :  { %363 = vrot.lane.b32.xlu1 %v326_v46, %s4688_s11 }
 0x155   :  { %361 = vrot.lane.b32.xlu0 %v325_v47, %s4688_s11 }
 0x158   :  { %367 = vrot.lane.b32.xlu1 %v328_v48, %s4688_s11 }
 0x159   :  { %365 = vrot.lane.b32.xlu0 %v327_v49, %s4688_s11 }
 0x15c   :  { %460 = vrot.lane.b32.xlu1 %v423_v50, %s4689_s30 }
 0x15d   :  { %458 = vrot.lane.b32.xlu0 %v422_v51, %s4689_s30 }
 0x160   :  { %464 = vrot.lane.b32.xlu1 %v425_v52, %s4689_s30 }
 0x161   :  { %462 = vrot.lane.b32.xlu0 %v424_v53, %s4689_s30 }
 0x164   :  { %557 = vrot.lane.b32.xlu1 %v520_v54, %s4690_s19 }
 0x165   :  { %555 = vrot.lane.b32.xlu0 %v519_v55, %s4690_s19 }
 0x168   :  { %561 = vrot.lane.b32.xlu1 %v522_v57, %s4690_s19 }
 0x169   :  { %559 = vrot.lane.b32.xlu0 %v521_v58, %s4690_s19 }
 0x16c   :  { %654 = vrot.lane.b32.xlu1 %v617_v60, %s4675_s4 }
 0x16d   :  { %652 = vrot.lane.b32.xlu0 %v616_v61, %s4675_s4 }
 0x170   :  { %658 = vrot.lane.b32.xlu1 %v619_v1, %s4675_s4 }
 0x171   :  { %656 = vrot.lane.b32.xlu0 %v618_v2, %s4675_s4 }
 0x174   :  { %371 = vrot.lane.b32.xlu1 %v330_v3, %s4688_s11 }
 0x175   :  { %369 = vrot.lane.b32.xlu0 %v329_v4, %s4688_s11 }
 0x178   :  { %375 = vrot.lane.b32.xlu1 %v332_v5, %s4688_s11 }
 0x179   :  { %373 = vrot.lane.b32.xlu0 %v331_v6, %s4688_s11 }
 0x17c   :  { %468 = vrot.lane.b32.xlu1 %v427_v7, %s4689_s30 }
 0x17d   :  { %466 = vrot.lane.b32.xlu0 %v426_v8, %s4689_s30 }
 0x180   :  { %472 = vrot.lane.b32.xlu1 %v429_v9, %s4689_s30 }
 0x181   :  { %470 = vrot.lane.b32.xlu0 %v428_v10, %s4689_s30 }
 0x184   :  { %565 = vrot.lane.b32.xlu1 %v524_v11, %s4690_s19 }
 0x185   :  { %563 = vrot.lane.b32.xlu0 %v523_v12, %s4690_s19 }
 0x188   :  { %569 = vrot.lane.b32.xlu1 %v526_v14, %s4690_s19 }
 0x189   :  { %567 = vrot.lane.b32.xlu0 %v525_v15, %s4690_s19 }
 0x18c   :  { %662 = vrot.lane.b32.xlu1 %v621_v17, %s4675_s4 }
 0x18d   :  { %660 = vrot.lane.b32.xlu0 %v620_v18, %s4675_s4 }
 0x190   :  { %666 = vrot.lane.b32.xlu1 %v623_v21, %s4675_s4 }
 0x191   :  { %664 = vrot.lane.b32.xlu0 %v622_v22, %s4675_s4 }
 0x194   :  { %379 = vrot.lane.b32.xlu1 %v334_v23, %s4688_s11 }
 0x195   :  { %377 = vrot.lane.b32.xlu0 %v333_v24, %s4688_s11 }
 0x198   :  { %383 = vrot.lane.b32.xlu1 %v336_v25, %s4688_s11 }
 0x199   :  { %381 = vrot.lane.b32.xlu0 %v335_v26, %s4688_s11 }
 0x19c   :  { %476 = vrot.lane.b32.xlu1 %v431_v27, %s4689_s30 }
 0x19d   :  { %474 = vrot.lane.b32.xlu0 %v430_v28, %s4689_s30 }
 0x1a0   :  { %480 = vrot.lane.b32.xlu1 %v433_v29, %s4689_s30 }
 0x1a1   :  { %478 = vrot.lane.b32.xlu0 %v432_v30, %s4689_s30 }
 0x1a4   :  { %573 = vrot.lane.b32.xlu1 %v528_v31, %s4690_s19 }
 0x1a5   :  { %571 = vrot.lane.b32.xlu0 %v527_v32, %s4690_s19 }
 0x1a6   :  { %v358_v35 = vpop.permute.xlu1 %357 }
 0x1a7   :  { %v354_v36 = vpop.permute.xlu0 %353  ;;  %404 = vst.msk [vmem:[#allocation4 + $0x10] sm:$0xff] %vm401_vm4, %v358_v35 }
 0x1a8   :  { %402 = vst.msk [vmem:[#allocation4] sm:$0xff] %vm401_vm4, %v354_v36  ;;  %577 = vrot.lane.b32.xlu1 %v530_v33, %s4690_s19 }
 0x1a9   :  { %575 = vrot.lane.b32.xlu0 %v529_v34, %s4690_s19 }
 0x1aa   :  { %v360_v39 = vpop.permute.xlu1 %359 }
 0x1ab   :  { %v356_v40 = vpop.permute.xlu0 %355  ;;  %405 = vst.msk [vmem:[#allocation4 + $0x18] sm:$0xff] %vm401_vm4, %v360_v39 }
 0x1ac   :  { %403 = vst.msk [vmem:[#allocation4 + $0x8] sm:$0xff] %vm401_vm4, %v356_v40  ;;  %670 = vrot.lane.b32.xlu1 %v625_v37, %s4675_s4 }
 0x1ad   :  { %668 = vrot.lane.b32.xlu0 %v624_v38, %s4675_s4 }
 0x1ae   :  { %v453_v43 = vpop.permute.xlu1 %452 }
 0x1af   :  { %v451_v44 = vpop.permute.xlu0 %450  ;;  %500 = vst.msk [vmem:[#allocation4 + $0x8] sm:$0xff] %vm498_vm5, %v453_v43 }
 0x1b0   :  { %499 = vst.msk [vmem:[#allocation4] sm:$0xff] %vm498_vm5, %v451_v44  ;;  %674 = vrot.lane.b32.xlu1 %v627_v41, %s4675_s4 }
 0x1b1   :  { %672 = vrot.lane.b32.xlu0 %v626_v42, %s4675_s4  ;;  %s4692_s4 = smov 16  }
 0x1b2   :  { %v457_v45 = vpop.permute.xlu1 %456 }
 0x1b3   :  { %v455_v46 = vpop.permute.xlu0 %454  ;;  %502 = vst.msk [vmem:[#allocation4 + $0x18] sm:$0xff] %vm498_vm5, %v457_v45 }
 0x1b4   :  { %501 = vst.msk [vmem:[#allocation4 + $0x10] sm:$0xff] %vm498_vm5, %v455_v46 }
 0x1b6   :  { %v550_v47 = vpop.permute.xlu1 %549 }
 0x1b7   :  { %v548_v48 = vpop.permute.xlu0 %547  ;;  %597 = vst.msk [vmem:[#allocation4 + $0x8] sm:$0xff] %vm595_vm6, %v550_v47 }
 0x1b8   :  { %596 = vst.msk [vmem:[#allocation4] sm:$0xff] %vm595_vm6, %v548_v48 }
 0x1ba   :  { %v554_v49 = vpop.permute.xlu1 %553 }
 0x1bb   :  { %v552_v50 = vpop.permute.xlu0 %551  ;;  %599 = vst.msk [vmem:[#allocation4 + $0x18] sm:$0xff] %vm595_vm6, %v554_v49 }
 0x1bc   :  { %598 = vst.msk [vmem:[#allocation4 + $0x10] sm:$0xff] %vm595_vm6, %v552_v50 }
 0x1be   :  { %v647_v51 = vpop.permute.xlu1 %646 }
 0x1bf   :  { %v645_v52 = vpop.permute.xlu0 %644  ;;  %694 = vst.msk [vmem:[#allocation4 + $0x8] sm:$0xff] %vm692_vm7, %v647_v51 }
 0x1c0   :  { %693 = vst.msk [vmem:[#allocation4] sm:$0xff] %vm692_vm7, %v645_v52 }
 0x1c2   :  { %v651_v53 = vpop.permute.xlu1 %650 }
 0x1c3   :  { %v649_v54 = vpop.permute.xlu0 %648  ;;  %696 = vst.msk [vmem:[#allocation4 + $0x18] sm:$0xff] %vm692_vm7, %v651_v53 }
 0x1c4   :  { %695 = vst.msk [vmem:[#allocation4 + $0x10] sm:$0xff] %vm692_vm7, %v649_v54 }
 0x1c6   :  { %v364_v55 = vpop.permute.xlu1 %363  ;;  %v710_v58 = vld [vmem:[#allocation4 + $0x8] sm:$0xff] }
 0x1c7   :  { %v362_v56 = vpop.permute.xlu0 %361  ;;  %v709_v57 = vld [vmem:[#allocation4] sm:$0xff]  ;;  %407 = vst.msk [vmem:[#allocation4 + $0x28] sm:$0xff] %vm401_vm4, %v364_v55 }
 0x1c8   :  { %406 = vst.msk [vmem:[#allocation4 + $0x20] sm:$0xff] %vm401_vm4, %v362_v56  ;;  %v725_v59 = vpack.c.bf16 %v710_v58, %v709_v57 }
 0x1ca   :  { %4089 = vmatprep.mubr.msk.bf16.mxu0 %vm738_vm8, %v725_v59  ;;  %v368_v60 = vpop.permute.xlu1 %367  ;;  %v712_v63 = vld [vmem:[#allocation4 + $0x18] sm:$0xff] }
 0x1cb   :  { %v366_v61 = vpop.permute.xlu0 %365  ;;  %v711_v62 = vld [vmem:[#allocation4 + $0x10] sm:$0xff]  ;;  %409 = vst.msk [vmem:[#allocation4 + $0x38] sm:$0xff] %vm401_vm4, %v368_v60 }
 0x1cc   :  { %408 = vst.msk [vmem:[#allocation4 + $0x30] sm:$0xff] %vm401_vm4, %v366_v61  ;;  %v726_v1 = vpack.c.bf16 %v712_v63, %v711_v62 }
 0x1ce   :  { %4090 = vmatmul.mubr.msk.bf16.vlgmr.msra.gmra.mrb[0].mxu0 %vm738_vm8, %v726_v1  ;;  %v461_v2 = vpop.permute.xlu1 %460  ;;  %v3911_v1 = vld [vmem:[#allocation8] ss:$0 sm:$0xff] }
 0x1cf   :  { %v459_v3 = vpop.permute.xlu0 %458  ;;  %504 = vst.msk [vmem:[#allocation4 + $0x28] sm:$0xff] %vm498_vm5, %v461_v2 }
 0x1d0   :  { %503 = vst.msk [vmem:[#allocation4 + $0x20] sm:$0xff] %vm498_vm5, %v459_v3 }
 0x1d2   :  { %v465_v4 = vpop.permute.xlu1 %464 }
 0x1d3   :  { %v463_v5 = vpop.permute.xlu0 %462  ;;  %506 = vst.msk [vmem:[#allocation4 + $0x38] sm:$0xff] %vm498_vm5, %v465_v4 }
 0x1d4   :  { %505 = vst.msk [vmem:[#allocation4 + $0x30] sm:$0xff] %vm498_vm5, %v463_v5 }
 0x1d6   :  { %v558_v6 = vpop.permute.xlu1 %557 }
 0x1d7   :  { %v556_v7 = vpop.permute.xlu0 %555  ;;  %601 = vst.msk [vmem:[#allocation4 + $0x28] sm:$0xff] %vm595_vm6, %v558_v6 }
 0x1d8   :  { %600 = vst.msk [vmem:[#allocation4 + $0x20] sm:$0xff] %vm595_vm6, %v556_v7 }
 0x1da   :  { %v562_v8 = vpop.permute.xlu1 %561 }
 0x1db   :  { %v560_v9 = vpop.permute.xlu0 %559  ;;  %603 = vst.msk [vmem:[#allocation4 + $0x38] sm:$0xff] %vm595_vm6, %v562_v8 }
 0x1dc   :  { %602 = vst.msk [vmem:[#allocation4 + $0x30] sm:$0xff] %vm595_vm6, %v560_v9 }
 0x1de   :  { %v655_v10 = vpop.permute.xlu1 %654 }
 0x1df   :  { %v653_v11 = vpop.permute.xlu0 %652  ;;  %698 = vst.msk [vmem:[#allocation4 + $0x28] sm:$0xff] %vm692_vm7, %v655_v10 }
 0x1e0   :  { %697 = vst.msk [vmem:[#allocation4 + $0x20] sm:$0xff] %vm692_vm7, %v653_v11 }
 0x1e2   :  { %v659_v12 = vpop.permute.xlu1 %658 }
 0x1e3   :  { %v657_v13 = vpop.permute.xlu0 %656  ;;  %700 = vst.msk [vmem:[#allocation4 + $0x38] sm:$0xff] %vm692_vm7, %v659_v12 }
 0x1e4   :  { %699 = vst.msk [vmem:[#allocation4 + $0x30] sm:$0xff] %vm692_vm7, %v657_v13 }
 0x1e6   :  { %v372_v14 = vpop.permute.xlu1 %371  ;;  %v714_v17 = vld [vmem:[#allocation4 + $0x28] sm:$0xff] }
 0x1e7   :  { %v370_v15 = vpop.permute.xlu0 %369  ;;  %v713_v16 = vld [vmem:[#allocation4 + $0x20] sm:$0xff]  ;;  %411 = vst.msk [vmem:[#allocation4 + $0x48] sm:$0xff] %vm401_vm4, %v372_v14 }
 0x1e8   :  { %410 = vst.msk [vmem:[#allocation4 + $0x40] sm:$0xff] %vm401_vm4, %v370_v15  ;;  %v727_v18 = vpack.c.bf16 %v714_v17, %v713_v16 }
 0x1ea   :  { %4093 = vmatprep.mubr.msk.bf16.mxu0 %vm738_vm8, %v727_v18  ;;  %v376_v19 = vpop.permute.xlu1 %375  ;;  %v716_v22 = vld [vmem:[#allocation4 + $0x38] sm:$0xff] }
 0x1eb   :  { %v374_v20 = vpop.permute.xlu0 %373  ;;  %v715_v21 = vld [vmem:[#allocation4 + $0x30] sm:$0xff]  ;;  %413 = vst.msk [vmem:[#allocation4 + $0x58] sm:$0xff] %vm401_vm4, %v376_v19 }
 0x1ec   :  { %412 = vst.msk [vmem:[#allocation4 + $0x50] sm:$0xff] %vm401_vm4, %v374_v20  ;;  %v728_v23 = vpack.c.bf16 %v716_v22, %v715_v21 }
 0x1ee   :  { %4094 = vmatmul.mubr.msk.bf16.gmra.mrb[4].mxu0 %vm738_vm8, %v728_v23  ;;  %v469_v24 = vpop.permute.xlu1 %468 }
 0x1ef   :  { %v467_v25 = vpop.permute.xlu0 %466  ;;  %508 = vst.msk [vmem:[#allocation4 + $0x48] sm:$0xff] %vm498_vm5, %v469_v24 }
 0x1f0   :  { %507 = vst.msk [vmem:[#allocation4 + $0x40] sm:$0xff] %vm498_vm5, %v467_v25 }
 0x1f2   :  { %v473_v26 = vpop.permute.xlu1 %472 }
 0x1f3   :  { %v471_v27 = vpop.permute.xlu0 %470  ;;  %510 = vst.msk [vmem:[#allocation4 + $0x58] sm:$0xff] %vm498_vm5, %v473_v26 }
 0x1f4   :  { %509 = vst.msk [vmem:[#allocation4 + $0x50] sm:$0xff] %vm498_vm5, %v471_v27 }
 0x1f6   :  { %v566_v28 = vpop.permute.xlu1 %565 }
 0x1f7   :  { %v564_v29 = vpop.permute.xlu0 %563  ;;  %605 = vst.msk [vmem:[#allocation4 + $0x48] sm:$0xff] %vm595_vm6, %v566_v28 }
 0x1f8   :  { %604 = vst.msk [vmem:[#allocation4 + $0x40] sm:$0xff] %vm595_vm6, %v564_v29 }
 0x1fa   :  { %v570_v30 = vpop.permute.xlu1 %569 }
 0x1fb   :  { %v568_v31 = vpop.permute.xlu0 %567  ;;  %607 = vst.msk [vmem:[#allocation4 + $0x58] sm:$0xff] %vm595_vm6, %v570_v30 }
 0x1fc   :  { %606 = vst.msk [vmem:[#allocation4 + $0x50] sm:$0xff] %vm595_vm6, %v568_v31 }
 0x1fe   :  { %v663_v32 = vpop.permute.xlu1 %662 }
 0x1ff   :  { %v661_v33 = vpop.permute.xlu0 %660  ;;  %702 = vst.msk [vmem:[#allocation4 + $0x48] sm:$0xff] %vm692_vm7, %v663_v32 }
 0x200   :  { %701 = vst.msk [vmem:[#allocation4 + $0x40] sm:$0xff] %vm692_vm7, %v661_v33 }
 0x202   :  { %v667_v34 = vpop.permute.xlu1 %666 }
 0x203   :  { %v665_v35 = vpop.permute.xlu0 %664  ;;  %704 = vst.msk [vmem:[#allocation4 + $0x58] sm:$0xff] %vm692_vm7, %v667_v34 }
 0x204   :  { %703 = vst.msk [vmem:[#allocation4 + $0x50] sm:$0xff] %vm692_vm7, %v665_v35 }
 0x206   :  { %v380_v36 = vpop.permute.xlu1 %379  ;;  %v718_v39 = vld [vmem:[#allocation4 + $0x48] sm:$0xff] }
 0x207   :  { %v378_v37 = vpop.permute.xlu0 %377  ;;  %v717_v38 = vld [vmem:[#allocation4 + $0x40] sm:$0xff]  ;;  %415 = vst.msk [vmem:[#allocation4 + $0x68] sm:$0xff] %vm401_vm4, %v380_v36 }
 0x208   :  { %414 = vst.msk [vmem:[#allocation4 + $0x60] sm:$0xff] %vm401_vm4, %v378_v37  ;;  %v729_v40 = vpack.c.bf16 %v718_v39, %v717_v38 }
 0x20a   :  { %4097 = vmatprep.mubr.msk.bf16.mxu0 %vm738_vm8, %v729_v40  ;;  %v384_v41 = vpop.permute.xlu1 %383  ;;  %v720_v44 = vld [vmem:[#allocation4 + $0x58] sm:$0xff] }
 0x20b   :  { %v382_v42 = vpop.permute.xlu0 %381  ;;  %v719_v43 = vld [vmem:[#allocation4 + $0x50] sm:$0xff]  ;;  %417 = vst.msk [vmem:[#allocation4 + $0x78] sm:$0xff] %vm401_vm4, %v384_v41 }
 0x20c   :  { %416 = vst.msk [vmem:[#allocation4 + $0x70] sm:$0xff] %vm401_vm4, %v382_v42  ;;  %v730_v45 = vpack.c.bf16 %v720_v44, %v719_v43  ;;  %vm1917_vm4 = vcmask 785408  }
 0x20e   :  { %4098 = vmatmul.mubr.msk.bf16.gmra.mrb[8].mxu0 %vm738_vm8, %v730_v45  ;;  %v477_v46 = vpop.permute.xlu1 %476 }
 0x20f   :  { %v475_v47 = vpop.permute.xlu0 %474  ;;  %512 = vst.msk [vmem:[#allocation4 + $0x68] sm:$0xff] %vm498_vm5, %v477_v46 }
 0x210   :  { %511 = vst.msk [vmem:[#allocation4 + $0x60] sm:$0xff] %vm498_vm5, %v475_v47 }
 0x212   :  { %v481_v48 = vpop.permute.xlu1 %480 }
 0x213   :  { %v479_v49 = vpop.permute.xlu0 %478  ;;  %514 = vst.msk [vmem:[#allocation4 + $0x78] sm:$0xff] %vm498_vm5, %v481_v48 }
 0x214   :  { %513 = vst.msk [vmem:[#allocation4 + $0x70] sm:$0xff] %vm498_vm5, %v479_v49  ;;  %vm2626_vm5 = vcmask 261312  }
 0x216   :  { %v574_v50 = vpop.permute.xlu1 %573 }
 0x217   :  { %v572_v51 = vpop.permute.xlu0 %571  ;;  %609 = vst.msk [vmem:[#allocation4 + $0x68] sm:$0xff] %vm595_vm6, %v574_v50 }
 0x218   :  { %608 = vst.msk [vmem:[#allocation4 + $0x60] sm:$0xff] %vm595_vm6, %v572_v51 }
 0x21a   :  { %v578_v52 = vpop.permute.xlu1 %577 }
 0x21b   :  { %v576_v53 = vpop.permute.xlu0 %575  ;;  %611 = vst.msk [vmem:[#allocation4 + $0x78] sm:$0xff] %vm595_vm6, %v578_v52 }
 0x21c   :  { %610 = vst.msk [vmem:[#allocation4 + $0x70] sm:$0xff] %vm595_vm6, %v576_v53  ;;  %vm3055_vm6 = vcmask 254976  }
 0x21e   :  { %v671_v54 = vpop.permute.xlu1 %670 }
 0x21f   :  { %v669_v55 = vpop.permute.xlu0 %668  ;;  %706 = vst.msk [vmem:[#allocation4 + $0x68] sm:$0xff] %vm692_vm7, %v671_v54 }
 0x220   :  { %705 = vst.msk [vmem:[#allocation4 + $0x60] sm:$0xff] %vm692_vm7, %v669_v55 }
 0x222   :  { %v675_v56 = vpop.permute.xlu1 %674 }
 0x223   :  { %v673_v57 = vpop.permute.xlu0 %672  ;;  %708 = vst.msk [vmem:[#allocation4 + $0x78] sm:$0xff] %vm692_vm7, %v675_v56 }
 0x224   :  { %707 = vst.msk [vmem:[#allocation4 + $0x70] sm:$0xff] %vm692_vm7, %v673_v57  ;;  %vm4696_vm7 = vmmov 0  }
 0x226   :  { %v722_v59 = vld [vmem:[#allocation4 + $0x68] sm:$0xff] }
 0x227   :  { %v721_v58 = vld [vmem:[#allocation4 + $0x60] sm:$0xff] }
 0x228   :  { %v731_v60 = vpack.c.bf16 %v722_v59, %v721_v58 }
 0x22a   :  { %4101 = vmatprep.mubr.msk.bf16.mxu0 %vm738_vm8, %v731_v60  ;;  %v724_v62 = vld [vmem:[#allocation4 + $0x78] sm:$0xff] }
 0x22b   :  { %v723_v61 = vld [vmem:[#allocation4 + $0x70] sm:$0xff] }
 0x22c   :  { %v732_v63 = vpack.c.bf16 %v724_v62, %v723_v61 }
 0x22e   :  { %4102 = vmatmul.mubr.msk.bf16.gmra.mrb[12].mxu0 %vm738_vm8, %v732_v63  ;;  %vm3814_vm8 = vcmask 1041409  }
 0x2a1   :  { %v4091_v2 = vpop.f32.mrb[0].mxu0 }
 0x2a2   :  { %v804_v3 = vpop.f32.mrb[1].mxu0  ;;  %v5255_v7 = vadd.f32 %v4091_v2, %v3911_v1 }
 0x2a3   :  { %v5253_v4 = vadd.f32 %v3911_v1, %v804_v3  ;;  %v4092_v5 = vpop.f32.mrb[2].mxu0 }
 0x2a4   :  { %v807_v6 = vpop.f32.mrb[3].mxu0  ;;  %v5261_v10 = vadd.f32 %v4092_v5, %v3911_v1  ;;  %v873_v13 = vsel %vm869_vm9, %v5255_v7, 0.0 }
 0x2a5   :  { %v5257_v8 = vadd.f32 %v3911_v1, %v807_v6  ;;  %v870_v9 = vsel %vm869_vm9, %v5253_v4, 0.0 }
 0x2a6   :  { %v875_v15 = vsel %vm869_vm9, %v5261_v10, 0.0 }
 0x2a7   :  { %v871_v11 = vsel %vm869_vm9, %v5257_v8, 0.0 }
 0x2a8   :  { %v872_v12 = vadd.f32 %v871_v11, %v870_v9 }
 0x2aa   :  { %v874_v14 = vadd.f32 %v873_v13, %v872_v12 }
 0x2ac   :  { %v876_v16 = vadd.f32 %v875_v15, %v874_v14 }
 0x2c1   :  { %v4095_v17 = vpop.f32.mrb[4].mxu0 }
 0x2c2   :  { %v820_v18 = vpop.f32.mrb[5].mxu0  ;;  %v829_v22 = vadd.f32 %v4095_v17, %v3911_v1 }
 0x2c3   :  { %v821_v19 = vadd.f32 %v3911_v1, %v820_v18  ;;  %v4096_v20 = vpop.f32.mrb[6].mxu0 }
 0x2c4   :  { %v823_v21 = vpop.f32.mrb[7].mxu0  ;;  %v832_v26 = vadd.f32 %v4096_v20, %v3911_v1  ;;  %v881_v29 = vsel %vm869_vm9, %v829_v22, 0.0 }
 0x2c5   :  { %v877_v23 = vsel %vm869_vm9, %v821_v19, 0.0  ;;  %v824_v24 = vadd.f32 %v3911_v1, %v823_v21 }
 0x2c6   :  { %v878_v25 = vadd.f32 %v877_v23, %v876_v16  ;;  %v883_v31 = vsel %vm869_vm9, %v832_v26, 0.0 }
 0x2c7   :  { %v879_v27 = vsel %vm869_vm9, %v824_v24, 0.0 }
 0x2c8   :  { %v880_v28 = vadd.f32 %v879_v27, %v878_v25 }
 0x2ca   :  { %v882_v30 = vadd.f32 %v881_v29, %v880_v28 }
 0x2cc   :  { %v884_v32 = vadd.f32 %v883_v31, %v882_v30 }
 0x2e1   :  { %v4099_v33 = vpop.f32.mrb[8].mxu0 }
 0x2e2   :  { %v836_v34 = vpop.f32.mrb[9].mxu0  ;;  %v845_v38 = vadd.f32 %v4099_v33, %v3911_v1 }
 0x2e3   :  { %v837_v35 = vadd.f32 %v3911_v1, %v836_v34  ;;  %v4100_v36 = vpop.f32.mrb[10].mxu0 }
 0x2e4   :  { %v839_v37 = vpop.f32.mrb[11].mxu0  ;;  %v848_v42 = vadd.f32 %v4100_v36, %v3911_v1  ;;  %v889_v45 = vsel %vm869_vm9, %v845_v38, 0.0 }
 0x2e5   :  { %v885_v39 = vsel %vm869_vm9, %v837_v35, 0.0  ;;  %v840_v40 = vadd.f32 %v3911_v1, %v839_v37 }
 0x2e6   :  { %v886_v41 = vadd.f32 %v885_v39, %v884_v32  ;;  %v891_v47 = vsel %vm869_vm9, %v848_v42, 0.0 }
 0x2e7   :  { %v887_v43 = vsel %vm869_vm9, %v840_v40, 0.0 }
 0x2e8   :  { %v888_v44 = vadd.f32 %v887_v43, %v886_v41 }
 0x2ea   :  { %v890_v46 = vadd.f32 %v889_v45, %v888_v44 }
 0x2ec   :  { %v892_v48 = vadd.f32 %v891_v47, %v890_v46 }
 0x301   :  { %v4103_v49 = vpop.f32.mrb[12].mxu0 }
 0x302   :  { %v852_v50 = vpop.f32.mrb[13].mxu0  ;;  %v861_v54 = vadd.f32 %v4103_v49, %v3911_v1 }
 0x303   :  { %v853_v51 = vadd.f32 %v3911_v1, %v852_v50  ;;  %v4104_v52 = vpop.f32.mrb[14].mxu0 }
 0x304   :  { %v855_v53 = vpop.f32.mrb[15].mxu0  ;;  %v864_v58 = vadd.f32 %v4104_v52, %v3911_v1  ;;  %v897_v61 = vsel %vm869_vm9, %v861_v54, 0.0 }
 0x305   :  { %v893_v55 = vsel %vm869_vm9, %v853_v51, 0.0  ;;  %v856_v56 = vadd.f32 %v3911_v1, %v855_v53 }
 0x306   :  { %v894_v57 = vadd.f32 %v893_v55, %v892_v48  ;;  %v899_v63 = vsel %vm869_vm9, %v864_v58, 0.0 }
 0x307   :  { %v895_v59 = vsel %vm869_vm9, %v856_v56, 0.0 }
 0x308   :  { %v896_v60 = vadd.f32 %v895_v59, %v894_v57 }
 0x30a   :  { %v898_v62 = vadd.f32 %v897_v61, %v896_v60 }
 0x30c   :  { %v900_v2 = vadd.f32 %v899_v63, %v898_v62 }
 0x30e   :  { %v901_v3 = vrot.slane %v900_v2, 4 }
 0x310   :  { %v902_v5 = vadd.f32 %v901_v3, %v900_v2 }
 0x312   :  { %v903_v6 = vrot.slane %v902_v5, 2 }
 0x314   :  { %v904_v9 = vadd.f32 %v903_v6, %v902_v5 }
 0x316   :  { %v905_v11 = vrot.slane %v904_v9, 1 }
 0x318   :  { %v906_v12 = vadd.f32 %v905_v11, %v904_v9 }
 0x31a   :  { %v908_v13 = vmul.f32 0.0078125, %v906_v12 }
 0x31c   :  { %v5282_v14 = vsub.f32 %v5253_v4, %v908_v13  ;;  %v5285_v1 = vsub.f32 %v5257_v8, %v908_v13  ;;  %v5288_v15 = vsub.f32 %v5255_v7, %v908_v13  ;;  %v5291_v16 = vsub.f32 %v5261_v10, %v908_v13 }
 0x31d   :  { %v5293_v17 = vsub.f32 %v821_v19, %v908_v13  ;;  %v5295_v18 = vsub.f32 %v824_v24, %v908_v13  ;;  %v5297_v20 = vsub.f32 %v829_v22, %v908_v13  ;;  %v5299_v21 = vsub.f32 %v832_v26, %v908_v13 }
 0x31e   :  { %v5301_v23 = vsub.f32 %v837_v35, %v908_v13  ;;  %v5303_v4 = vsub.f32 %v840_v40, %v908_v13  ;;  %v5305_v8 = vsub.f32 %v845_v38, %v908_v13  ;;  %v5307_v25 = vsub.f32 %v848_v42, %v908_v13 }
 0x31f   :  { %v5309_v7 = vsub.f32 %v853_v51, %v908_v13  ;;  %v5311_v10 = vsub.f32 %v856_v56, %v908_v13  ;;  %v5313_v19 = vsub.f32 %v861_v54, %v908_v13  ;;  %v5315_v24 = vsub.f32 %v864_v58, %v908_v13 }
 0x320   :  { %v925_v22 = vmul.f32 %v5282_v14, %v5282_v14  ;;  %v926_v26 = vmul.f32 %v5285_v1, %v5285_v1  ;;  %v927_v27 = vmul.f32 %v5288_v15, %v5288_v15  ;;  %v928_v28 = vmul.f32 %v5291_v16, %v5291_v16 }
 0x321   :  { %v929_v32 = vmul.f32 %v5293_v17, %v5293_v17  ;;  %v930_v35 = vmul.f32 %v5295_v18, %v5295_v18  ;;  %v931_v38 = vmul.f32 %v5297_v20, %v5297_v20  ;;  %v932_v41 = vmul.f32 %v5299_v21, %v5299_v21 }
 0x322   :  { %v941_v29 = vsel %vm869_vm9, %v925_v22, 0.0  ;;  %v942_v30 = vsel %vm869_vm9, %v926_v26, 0.0  ;;  %v944_v33 = vsel %vm869_vm9, %v927_v27, 0.0  ;;  %v946_v36 = vsel %vm869_vm9, %v928_v28, 0.0 }
 0x323   :  { %v943_v31 = vadd.f32 %v942_v30, %v941_v29  ;;  %v948_v39 = vsel %vm869_vm9, %v929_v32, 0.0  ;;  %v950_v42 = vsel %vm869_vm9, %v930_v35, 0.0  ;;  %v933_v44 = vmul.f32 %v5301_v23, %v5301_v23  ;;  %v867_v35 = vld [vmem:[#allocation8 + $0x1] sm:$0x1] }
 0x324   :  { %v952_v45 = vsel %vm869_vm9, %v931_v38, 0.0  ;;  %v934_v47 = vmul.f32 %v5303_v4, %v5303_v4  ;;  %v954_v48 = vsel %vm869_vm9, %v932_v41, 0.0  ;;  %v935_v50 = vmul.f32 %v5305_v8, %v5305_v8 }
 0x325   :  { %v945_v34 = vadd.f32 %v944_v33, %v943_v31  ;;  %v956_v51 = vsel %vm869_vm9, %v933_v44, 0.0  ;;  %v936_v53 = vmul.f32 %v5307_v25, %v5307_v25  ;;  %v937_v56 = vmul.f32 %v5309_v7, %v5309_v7  ;;  %v3920_v44 = vld [vmem:[#allocation8 + $0x2] ss:$0 sm:$0xff] }
 0x326   :  { %v958_v54 = vsel %vm869_vm9, %v934_v47, 0.0  ;;  %v960_v57 = vsel %vm869_vm9, %v935_v50, 0.0  ;;  %v938_v59 = vmul.f32 %v5311_v10, %v5311_v10  ;;  %v939_v62 = vmul.f32 %v5313_v19, %v5313_v19 }
 0x327   :  { %v947_v37 = vadd.f32 %v946_v36, %v945_v34  ;;  %v962_v60 = vsel %vm869_vm9, %v936_v53, 0.0  ;;  %v964_v63 = vsel %vm869_vm9, %v937_v56, 0.0  ;;  %v940_v3 = vmul.f32 %v5315_v24, %v5315_v24 }
 0x328   :  { %v966_v5 = vsel %vm869_vm9, %v938_v59, 0.0  ;;  %v968_v9 = vsel %vm869_vm9, %v939_v62, 0.0  ;;  %v982_v33 = vlaneseq }
 0x329   :  { %v949_v40 = vadd.f32 %v948_v39, %v947_v37  ;;  %v970_v12 = vsel %vm869_vm9, %v940_v3, 0.0 }
 0x32a   :  { %v983_v34 = vshrl.u32 %v982_v33, 7 }
 0x32b   :  { %v951_v43 = vadd.f32 %v950_v42, %v949_v40 }
 0x32c   :  { %v5365_v36 = vsub.s32 0, %v983_v34 }
 0x32d   :  { %v953_v46 = vadd.f32 %v952_v45, %v951_v43 }
 0x32f   :  { %v955_v49 = vadd.f32 %v954_v48, %v953_v46 }
 0x331   :  { %v957_v52 = vadd.f32 %v956_v51, %v955_v49 }
 0x333   :  { %v959_v55 = vadd.f32 %v958_v54, %v957_v52 }
 0x335   :  { %v961_v58 = vadd.f32 %v960_v57, %v959_v55 }
 0x337   :  { %v963_v61 = vadd.f32 %v962_v60, %v961_v58 }
 0x339   :  { %v965_v2 = vadd.f32 %v964_v63, %v963_v61 }
 0x33b   :  { %v967_v6 = vadd.f32 %v966_v5, %v965_v2 }
 0x33d   :  { %v969_v11 = vadd.f32 %v968_v9, %v967_v6 }
 0x33f   :  { %v971_v13 = vadd.f32 %v970_v12, %v969_v11 }
 0x341   :  { %v972_v22 = vrot.slane %v971_v13, 4 }
 0x343   :  { %v973_v26 = vadd.f32 %v972_v22, %v971_v13 }
 0x345   :  { %v974_v27 = vrot.slane %v973_v26, 2 }
 0x347   :  { %v975_v28 = vadd.f32 %v974_v27, %v973_v26 }
 0x349   :  { %v976_v29 = vrot.slane %v975_v28, 1 }
 0x34b   :  { %v977_v30 = vadd.f32 %v976_v29, %v975_v28 }
 0x34d   :  { %v978_v31 = vmul.f32 0.0078125, %v977_v30 }
 0x34f   :  { %v979_v32 = vadd.f32 1e-05, %v978_v31 }
 0x351   :  { %4322 = vrsqrt.f32 %v979_v32 }
 0x35b   :  { %v4323_v37 = vpop.eup %4322 }
 0x35c   :  { %v981_v38 = vmul.f32 %v4323_v37, %v867_v35 }
 0x35e   :  { %v985_v39 = vrot.slane %v981_v38, %v5365_v36 }
 0x360   :  { %v986_v40 = vmul.f32 %v985_v39, %v5282_v14  ;;  %v987_v41 = vmul.f32 %v985_v39, %v5285_v1  ;;  %v988_v42 = vmul.f32 %v985_v39, %v5288_v15  ;;  %v989_v43 = vmul.f32 %v985_v39, %v5291_v16 }
 0x361   :  { %v990_v45 = vmul.f32 %v985_v39, %v5293_v17  ;;  %v991_v46 = vmul.f32 %v985_v39, %v5295_v18  ;;  %v992_v47 = vmul.f32 %v985_v39, %v5297_v20  ;;  %v993_v48 = vmul.f32 %v985_v39, %v5299_v21 }
 0x362   :  { %v994_v49 = vmul.f32 %v985_v39, %v5301_v23  ;;  %v995_v50 = vmul.f32 %v985_v39, %v5303_v4  ;;  %v996_v14 = vmul.f32 %v985_v39, %v5305_v8  ;;  %v997_v1 = vmul.f32 %v985_v39, %v5307_v25 }
 0x363   :  { %v998_v15 = vmul.f32 %v985_v39, %v5309_v7  ;;  %v999_v16 = vmul.f32 %v985_v39, %v5311_v10  ;;  %v1000_v17 = vmul.f32 %v985_v39, %v5313_v19  ;;  %v1001_v18 = vmul.f32 %v985_v39, %v5315_v24 }
 0x364   :  { %v1006_v51 = vadd.f32 %v3920_v44, %v986_v40  ;;  %v1007_v20 = vadd.f32 %v3920_v44, %v987_v41  ;;  %v1008_v52 = vadd.f32 %v3920_v44, %v988_v42  ;;  %v1009_v21 = vadd.f32 %v3920_v44, %v989_v43 }
 0x365   :  { %v1010_v53 = vadd.f32 %v3920_v44, %v990_v45  ;;  %v1011_v23 = vadd.f32 %v3920_v44, %v991_v46  ;;  %v1012_v54 = vadd.f32 %v3920_v44, %v992_v47  ;;  %v1013_v4 = vadd.f32 %v3920_v44, %v993_v48 }
 0x366   :  { %v1014_v55 = vadd.f32 %v3920_v44, %v994_v49  ;;  %v1015_v8 = vadd.f32 %v3920_v44, %v995_v50  ;;  %v1016_v56 = vadd.f32 %v3920_v44, %v996_v14  ;;  %v1017_v25 = vadd.f32 %v3920_v44, %v997_v1 }
 0x367   :  { %v1018_v57 = vadd.f32 %v3920_v44, %v998_v15  ;;  %v1019_v7 = vadd.f32 %v3920_v44, %v999_v16  ;;  %v1020_v58 = vadd.f32 %v3920_v44, %v1000_v17  ;;  %v1021_v10 = vadd.f32 %v3920_v44, %v1001_v18 }
 0x368   :  { %v1022_v59 = vmax.f32 %v1006_v51, 0.0  ;;  %v1023_v19 = vmax.f32 %v1007_v20, 0.0  ;;  %v1024_v60 = vmax.f32 %v1008_v52, 0.0  ;;  %v1025_v24 = vmax.f32 %v1009_v21, 0.0 }
 0x369   :  { %v1026_v61 = vmax.f32 %v1010_v53, 0.0  ;;  %v1027_v62 = vmax.f32 %v1011_v23, 0.0  ;;  %v1028_v63 = vmax.f32 %v1012_v54, 0.0  ;;  %v1029_v2 = vmax.f32 %v1013_v4, 0.0  ;;  %v4286_v23 = vld [vmem:[#allocation10] sm:$0xff]  }
 0x36a   :  { %v1030_v3 = vmax.f32 %v1014_v55, 0.0  ;;  %v1031_v5 = vmax.f32 %v1015_v8, 0.0  ;;  %v1032_v6 = vmax.f32 %v1016_v56, 0.0  ;;  %v1033_v9 = vmax.f32 %v1017_v25, 0.0  ;;  %1038 = vst.msk [vmem:[#allocation3] sm:$0xff] %vm869_vm9, %v1022_v59  ;;  %1039 = vst.msk [vmem:[#allocation3 + $0x8] sm:$0xff] %vm869_vm9, %v1023_v19  ;;  %4105 = vmatprep.subr.bf16.mxu1 %v4286_v23 }
 0x36b   :  { %1040 = vst.msk [vmem:[#allocation3 + $0x10] sm:$0xff] %vm869_vm9, %v1024_v60  ;;  %1041 = vst.msk [vmem:[#allocation3 + $0x18] sm:$0xff] %vm869_vm9, %v1025_v24  ;;  %v1034_v11 = vmax.f32 %v1018_v57, 0.0  ;;  %v1035_v12 = vmax.f32 %v1019_v7, 0.0  ;;  %v1036_v13 = vmax.f32 %v1020_v58, 0.0  ;;  %v1037_v22 = vmax.f32 %v1021_v10, 0.0  ;;  %4106 = vmatpush3.bf16.msra.mxu1 %v4286_v23 }
 0x36c   :  { %1044 = vst.msk [vmem:[#allocation3 + $0x30] sm:$0xff] %vm869_vm9, %v1028_v63  ;;  %1045 = vst.msk [vmem:[#allocation3 + $0x38] sm:$0xff] %vm869_vm9, %v1029_v2  ;;  %v4287_v55 = vld [vmem:[#allocation10 + $0x8] ss:$0 sps:$4 sm:$0xff]  }
 0x36d   :  { %1042 = vst.msk [vmem:[#allocation3 + $0x20] sm:$0xff] %vm869_vm9, %v1026_v61  ;;  %1043 = vst.msk [vmem:[#allocation3 + $0x28] sm:$0xff] %vm869_vm9, %v1027_v62  ;;  %4255 = vmatprep.subr.msk.bf16.mxu1 %vm1262_vm12, %v4287_v55  ;;  %v1264_v57 = vsel %vm1262_vm12, %v4287_v55, 0 }
 0x36e   :  { %1046 = vst.msk [vmem:[#allocation3 + $0x50] sm:$0xff] %vm869_vm9, %v1030_v3  ;;  %1047 = vst.msk [vmem:[#allocation3 + $0x58] sm:$0xff] %vm869_vm9, %v1031_v5 }
 0x36f   :  { %1049 = vst.msk [vmem:[#allocation3 + $0x68] sm:$0xff] %vm869_vm9, %v1033_v9  ;;  %1048 = vst.msk [vmem:[#allocation3 + $0x60] sm:$0xff] %vm869_vm9, %v1032_v6  ;;  %4108 = vmatpush3.bf16.msra.mxu1 %v1264_v57 }
 0x370   :  { %1051 = vst.msk [vmem:[#allocation3 + $0x78] sm:$0xff] %vm869_vm9, %v1035_v12  ;;  %1052 = vst.msk [vmem:[#allocation3 + $0x80] sm:$0xff] %vm869_vm9, %v1036_v13 }
 0x371   :  { %1053 = vst.msk [vmem:[#allocation3 + $0x88] sm:$0xff] %vm869_vm9, %v1037_v22  ;;  %1050 = vst.msk [vmem:[#allocation3 + $0x70] sm:$0xff] %vm869_vm9, %v1034_v11  ;;  %v1054_v28 = vld [vmem:[#allocation3] ss:$2 sm:$0xff]  ;;  %v1070_v30 = vld [vmem:[#allocation3 + $0x1] ss:$2 sm:$0xff] }
 0x372   :  { %v1056_v26 = vld [vmem:[#allocation3 + $0x10] ss:$2 sm:$0xff]  ;;  %v1072_v27 = vld [vmem:[#allocation3 + $0x11] ss:$2 sm:$0xff]  ;;  %v1085_v35 = vmax.f32 %v1054_v28, %v1070_v30  ;;  %1094 = vst.msk [vmem:[#allocation3] sm:$0xff] %vm869_vm9, %v4687_v0 }
 0x373   :  { %v1086_v29 = vmax.f32 %v1056_v26, %v1072_v27  ;;  %v1060_v32 = vld [vmem:[#allocation3 + $0x30] ss:$2 sm:$0xff]  ;;  %v1076_v38 = vld [vmem:[#allocation3 + $0x31] ss:$2 sm:$0xff] }
 0x374   :  { %v1058_v31 = vld [vmem:[#allocation3 + $0x20] ss:$2 sm:$0xff]  ;;  %v1074_v37 = vld [vmem:[#allocation3 + $0x21] ss:$2 sm:$0xff]  ;;  %1099 = vst.msk [vmem:[#allocation3 + $0x8] sm:$0xff] %vm869_vm9, %v1085_v35  ;;  %v1088_v43 = vmax.f32 %v1060_v32, %v1076_v38 }
 0x375   :  { %v1062_v33 = vld [vmem:[#allocation3 + $0x50] ss:$2 sm:$0xff]  ;;  %v1078_v34 = vld [vmem:[#allocation3 + $0x51] ss:$2 sm:$0xff]  ;;  %1097 = vst.msk [vmem:[#allocation3 + $0x28] sm:$0x1] %vm1096_vm10, %v4687_v0  ;;  %v1087_v39 = vmax.f32 %v1058_v31, %v1074_v37 }
 0x376   :  { %1095 = vst.msk [vmem:[#allocation3 + $0x50] sm:$0xff] %vm869_vm9, %v4687_v0  ;;  %1100 = vst.msk [vmem:[#allocation3 + $0x10] sm:$0xff] %vm869_vm9, %v1086_v29  ;;  %v1064_v40 = vld [vmem:[#allocation3 + $0x60] ss:$2 sm:$0xff]  ;;  %v1080_v41 = vld [vmem:[#allocation3 + $0x61] ss:$2 sm:$0xff]  ;;  %v1089_v42 = vmax.f32 %v1062_v33, %v1078_v34 }
 0x377   :  { %v1090_v44 = vmax.f32 %v1064_v40, %v1080_v41  ;;  %1101 = vst.msk [vmem:[#allocation3 + $0x18] sm:$0xff] %vm869_vm9, %v1087_v39  ;;  %1102 = vst.msk [vmem:[#allocation3 + $0x20] sm:$0xff] %vm869_vm9, %v1088_v43 }
 0x378   :  { %v1066_v45 = vld [vmem:[#allocation3 + $0x70] ss:$2 sm:$0xff]  ;;  %v1068_v46 = vld [vmem:[#allocation3 + $0x80] ss:$2 sm:$0xff]  ;;  %v1082_v47 = vld [vmem:[#allocation3 + $0x71] ss:$2 sm:$0xff] }
 0x379   :  { %1103 = vst.msk [vmem:[#allocation3 + $0x58] sm:$0xff] %vm869_vm9, %v1089_v42  ;;  %v1084_v48 = vld [vmem:[#allocation3 + $0x81] ss:$2 sm:$0xff]  ;;  %v1091_v49 = vmax.f32 %v1066_v45, %v1082_v47  ;;  %1104 = vst.msk [vmem:[#allocation3 + $0x60] sm:$0xff] %vm869_vm9, %v1090_v44  ;;  %v3921_v45 = vld [vmem:[#allocation11] ss:$0 sm:$0xff] }
 0x37a   :  { %1098 = vst.msk [vmem:[#allocation3 + $0x78] sm:$0x1] %vm1096_vm10, %v4687_v0  ;;  %v1092_v50 = vmax.f32 %v1068_v46, %v1084_v48  ;;  %v4288_v44 = vld [vmem:[#allocation14] sm:$0xff]  }
 0x37b   :  { %1105 = vst.msk [vmem:[#allocation3 + $0x68] sm:$0xff] %vm869_vm9, %v1091_v49  ;;  %v1123_v1 = vld [vmem:[#allocation3 + $0x8] sm:$0xff]  ;;  %4117 = vmatprep.subr.bf16.mxu1 %v4288_v44 }
 0x37c   :  { %1106 = vst.msk [vmem:[#allocation3 + $0x70] sm:$0xff] %vm869_vm9, %v1092_v50  ;;  %1139 = vrot.lane.b32.xlu0 %v1123_v1, %s4686_s6  ;;  %v1107_v52 = vld [vmem:[#allocation3 + $0x7] sm:$0xff] }
 0x37d   :  { %v1124_v14 = vld [vmem:[#allocation3 + $0x10] sm:$0xff]  ;;  %1115 = vst.msk [vmem:[#allocation4] sm:$0xff] %vm869_vm9, %v1107_v52 }
 0x37e   :  { %1141 = vrot.lane.b32.xlu1 %v1124_v14, %s4686_s6  ;;  %v1108_v15 = vld [vmem:[#allocation3 + $0xf] sm:$0xff]  ;;  %v1175_v16 = vld [vmem:[#allocation3 + $0x21] sm:$0xff]  ;;  %v1125_v18 = vld [vmem:[#allocation3 + $0x18] sm:$0xff]  ;;  %1730 = vst.msk [vmem:[#allocation3] sm:$0xff] %vm1634_vm1, %v4687_v0 }
 0x37f   :  { %1116 = vst.msk [vmem:[#allocation4 + $0x8] sm:$0xff] %vm869_vm9, %v1108_v15  ;;  %v1126_v17 = vld [vmem:[#allocation3 + $0x20] sm:$0xff]  ;;  %v1173_v20 = vld [vmem:[#allocation3 + $0x11] sm:$0xff]  ;;  %v1172_v56 = vld [vmem:[#allocation3 + $0x9] sm:$0xff] }
 0x380   :  { %1733 = vst.msk [vmem:[#allocation3 + $0x28] sm:$0x1] %vm1732_vm11, %v4687_v0  ;;  %1143 = vrot.lane.b32.xlu0 %v1125_v18, %s4686_s6  ;;  %v1110_v21 = vld [vmem:[#allocation3 + $0x1f] sm:$0xff]  ;;  %v1109_v53 = vld [vmem:[#allocation3 + $0x17] sm:$0xff] }
 0x381   :  { %1118 = vst.msk [vmem:[#allocation4 + $0x18] sm:$0xff] %vm869_vm9, %v1110_v21  ;;  %v1112_v54 = vld [vmem:[#allocation3 + $0x5f] sm:$0xff]  ;;  %1117 = vst.msk [vmem:[#allocation4 + $0x10] sm:$0xff] %vm869_vm9, %v1109_v53  ;;  %v1111_v4 = vld [vmem:[#allocation3 + $0x57] sm:$0xff] }
 0x382   :  { %1145 = vrot.lane.b32.xlu1 %v1126_v17, %s4686_s6  ;;  %1120 = vst.msk [vmem:[#allocation4 + $0x48] sm:$0xff] %vm869_vm9, %v1112_v54  ;;  %1119 = vst.msk [vmem:[#allocation4 + $0x40] sm:$0xff] %vm869_vm9, %v1111_v4  ;;  %v1113_v25 = vld [vmem:[#allocation3 + $0x67] sm:$0xff]  ;;  %v1174_v7 = vld [vmem:[#allocation3 + $0x19] sm:$0xff] }
 0x383   :  { %v1179_v51 = vld [vmem:[#allocation3 + $0x71] sm:$0xff]  ;;  %1121 = vst.msk [vmem:[#allocation4 + $0x50] sm:$0xff] %vm869_vm9, %v1113_v25  ;;  %v1128_v58 = vld [vmem:[#allocation3 + $0x60] sm:$0xff]  ;;  %v1129_v19 = vld [vmem:[#allocation3 + $0x68] sm:$0xff] }
 0x384   :  { %1734 = vst.msk [vmem:[#allocation3 + $0x78] sm:$0x1] %vm1732_vm11, %v4687_v0  ;;  %v1114_v8 = vld [vmem:[#allocation3 + $0x6f] sm:$0xff]  ;;  %1188 = vrot.lane.b32.xlu0 %v1172_v56, %s4692_s4  ;;  %v1127_v10 = vld [vmem:[#allocation3 + $0x58] sm:$0xff]  ;;  %v1177_v60 = vld [vmem:[#allocation3 + $0x61] sm:$0xff] }
 0x385   :  { %1122 = vst.msk [vmem:[#allocation4 + $0x58] sm:$0xff] %vm869_vm9, %v1114_v8  ;;  %v1130_v59 = vld [vmem:[#allocation3 + $0x70] sm:$0xff]  ;;  %v1176_v24 = vld [vmem:[#allocation3 + $0x59] sm:$0xff]  ;;  %vm3888_vm9 = vcmask 9216  }
 0x386   :  { %1190 = vrot.lane.b32.xlu1 %v1173_v20, %s4692_s4  ;;  %v1178_v61 = vld [vmem:[#allocation3 + $0x69] sm:$0xff]  ;;  %1731 = vst.msk [vmem:[#allocation3 + $0x50] sm:$0xff] %vm1634_vm1, %v4687_v0 }
 0x388   :  { %1192 = vrot.lane.b32.xlu0 %v1174_v7, %s4692_s4 }
 0x38a   :  { %1194 = vrot.lane.b32.xlu1 %v1175_v16, %s4692_s4 }
 0x38c   :  { %1147 = vrot.lane.b32.xlu0 %v1127_v10, %s4686_s6 }
 0x38e   :  { %1149 = vrot.lane.b32.xlu1 %v1128_v58, %s4686_s6 }
 0x390   :  { %1151 = vrot.lane.b32.xlu0 %v1129_v19, %s4686_s6 }
 0x392   :  { %1153 = vrot.lane.b32.xlu1 %v1130_v59, %s4686_s6 }
 0x394   :  { %1196 = vrot.lane.b32.xlu0 %v1176_v24, %s4692_s4 }
 0x396   :  { %1198 = vrot.lane.b32.xlu1 %v1177_v60, %s4692_s4 }
 0x398   :  { %1200 = vrot.lane.b32.xlu0 %v1178_v61, %s4692_s4 }
 0x39a   :  { %1202 = vrot.lane.b32.xlu1 %v1179_v51, %s4692_s4 }
 0x3ee   :  { %v1140_v63 = vpop.permute.xlu0 %1139 }
 0x3ef   :  { %1164 = vst.msk [vmem:[#allocation4] sm:$0xff] %vm1163_vm13, %v1140_v63 }
 0x3f0   :  { %v1142_v62 = vpop.permute.xlu1 %1141 }
 0x3f1   :  { %1165 = vst.msk [vmem:[#allocation4 + $0x8] sm:$0xff] %vm1163_vm13, %v1142_v62 }
 0x3f2   :  { %v1144_v3 = vpop.permute.xlu0 %1143 }
 0x3f3   :  { %1166 = vst.msk [vmem:[#allocation4 + $0x10] sm:$0xff] %vm1163_vm13, %v1144_v3 }
 0x3f4   :  { %v1146_v2 = vpop.permute.xlu1 %1145 }
 0x3f5   :  { %1167 = vst.msk [vmem:[#allocation4 + $0x18] sm:$0xff] %vm1163_vm13, %v1146_v2 }
 0x3f6   :  { %v1189_v6 = vpop.permute.xlu0 %1188 }
 0x3f7   :  { %1213 = vst.msk [vmem:[#allocation4] sm:$0xff] %vm1212_vm14, %v1189_v6 }
 0x3f8   :  { %v1191_v5 = vpop.permute.xlu1 %1190 }
 0x3f9   :  { %1214 = vst.msk [vmem:[#allocation4 + $0x8] sm:$0xff] %vm1212_vm14, %v1191_v5 }
 0x3fa   :  { %v1193_v11 = vpop.permute.xlu0 %1192 }
 0x3fb   :  { %1215 = vst.msk [vmem:[#allocation4 + $0x10] sm:$0xff] %vm1212_vm14, %v1193_v11 }
 0x3fc   :  { %v1195_v9 = vpop.permute.xlu1 %1194 }
 0x3fd   :  { %1216 = vst.msk [vmem:[#allocation4 + $0x18] sm:$0xff] %vm1212_vm14, %v1195_v9 }
 0x3fe   :  { %v1148_v22 = vpop.permute.xlu0 %1147  ;;  %v1221_v26 = vld [vmem:[#allocation4] sm:$0xff] }
 0x3ff   :  { %1168 = vst.msk [vmem:[#allocation4 + $0x40] sm:$0xff] %vm1163_vm13, %v1148_v22 }
 0x400   :  { %v1150_v12 = vpop.permute.xlu1 %1149  ;;  %v1222_v13 = vld [vmem:[#allocation4 + $0x8] sm:$0xff] }
 0x401   :  { %1169 = vst.msk [vmem:[#allocation4 + $0x48] sm:$0xff] %vm1163_vm13, %v1150_v12  ;;  %v1229_v27 = vpack.c.bf16 %v1222_v13, %v1221_v26 }
 0x402   :  { %v1152_v30 = vpop.permute.xlu0 %1151  ;;  %v1223_v31 = vld [vmem:[#allocation4 + $0x10] sm:$0xff] }
 0x403   :  { %4109 = vmatprep.mubr.msk.bf16.mxu1 %vm1249_vm15, %v1229_v27  ;;  %1170 = vst.msk [vmem:[#allocation4 + $0x50] sm:$0xff] %vm1163_vm13, %v1152_v30 }
 0x404   :  { %v1154_v28 = vpop.permute.xlu1 %1153  ;;  %v1224_v29 = vld [vmem:[#allocation4 + $0x18] sm:$0xff] }
 0x405   :  { %1171 = vst.msk [vmem:[#allocation4 + $0x58] sm:$0xff] %vm1163_vm13, %v1154_v28  ;;  %v1230_v32 = vpack.c.bf16 %v1224_v29, %v1223_v31 }
 0x406   :  { %v1197_v34 = vpop.permute.xlu0 %1196 }
 0x407   :  { %4110 = vmatmul.mubr.msk.bf16.vlgmr.msra.gmra.mrb[0].mxu1 %vm1249_vm15, %v1230_v32  ;;  %1217 = vst.msk [vmem:[#allocation4 + $0x40] sm:$0xff] %vm1212_vm14, %v1197_v34 }
 0x408   :  { %v1199_v33 = vpop.permute.xlu1 %1198  ;;  %4118 = vmatpush3.bf16.msra.mxu1 %v4288_v44 }
 0x409   :  { %1218 = vst.msk [vmem:[#allocation4 + $0x48] sm:$0xff] %vm1212_vm14, %v1199_v33 }
 0x40a   :  { %v1201_v37 = vpop.permute.xlu0 %1200 }
 0x40b   :  { %1219 = vst.msk [vmem:[#allocation4 + $0x50] sm:$0xff] %vm1212_vm14, %v1201_v37 }
 0x40c   :  { %v1203_v35 = vpop.permute.xlu1 %1202 }
 0x40d   :  { %1220 = vst.msk [vmem:[#allocation4 + $0x58] sm:$0xff] %vm1212_vm14, %v1203_v35 }
 0x40e   :  { %v1225_v39 = vld [vmem:[#allocation4 + $0x40] sm:$0xff] }
 0x410   :  { %v1226_v38 = vld [vmem:[#allocation4 + $0x48] sm:$0xff] }
 0x411   :  { %v1231_v40 = vpack.c.bf16 %v1226_v38, %v1225_v39 }
 0x412   :  { %v1227_v42 = vld [vmem:[#allocation4 + $0x50] sm:$0xff] }
 0x413   :  { %4113 = vmatprep.mubr.msk.bf16.mxu1 %vm1249_vm15, %v1231_v40 }
 0x414   :  { %v1228_v41 = vld [vmem:[#allocation4 + $0x58] sm:$0xff] }
 0x415   :  { %v1232_v43 = vpack.c.bf16 %v1228_v41, %v1227_v42 }
 0x417   :  { %4114 = vmatmul.mubr.msk.bf16.gmra.mrb[4].mxu1 %vm1249_vm15, %v1232_v43 }
 0x4da   :  { %v4111_v46 = vpop.f32.mrb[0].mxu1 }
 0x4db   :  { %v1300_v47 = vpop.f32.mrb[1].mxu1  ;;  %v1309_v14 = vadd.f32 %v4111_v46, %v3921_v45 }
 0x4dc   :  { %v1301_v48 = vadd.f32 %v3921_v45, %v1300_v47  ;;  %v4112_v49 = vpop.f32.mrb[2].mxu1 }
 0x4dd   :  { %v1303_v50 = vpop.f32.mrb[3].mxu1  ;;  %v1312_v16 = vadd.f32 %v4112_v49, %v3921_v45  ;;  %v1337_v51 = vsel %vm1333_vm0, %v1309_v14, 0.0 }
 0x4de   :  { %v1304_v1 = vadd.f32 %v3921_v45, %v1303_v50  ;;  %v1334_v15 = vsel %vm1333_vm0, %v1301_v48, 0.0 }
 0x4df   :  { %v1339_v52 = vsel %vm1333_vm0, %v1312_v16, 0.0 }
 0x4e0   :  { %v1335_v17 = vsel %vm1333_vm0, %v1304_v1, 0.0 }
 0x4e1   :  { %v1336_v18 = vadd.f32 %v1335_v17, %v1334_v15 }
 0x4e3   :  { %v1338_v20 = vadd.f32 %v1337_v51, %v1336_v18 }
 0x4e5   :  { %v1340_v21 = vadd.f32 %v1339_v52, %v1338_v20 }
 0x4ea   :  { %v4115_v53 = vpop.f32.mrb[4].mxu1 }
 0x4eb   :  { %v1316_v23 = vpop.f32.mrb[5].mxu1  ;;  %v1325_v8 = vadd.f32 %v4115_v53, %v3921_v45  ;;  %v1331_v53 = vld [vmem:[#allocation11 + $0x1] sm:$0x1] }
 0x4ec   :  { %v1317_v54 = vadd.f32 %v3921_v45, %v1316_v23  ;;  %v4116_v4 = vpop.f32.mrb[6].mxu1 }
 0x4ed   :  { %v1319_v55 = vpop.f32.mrb[7].mxu1  ;;  %v1328_v7 = vadd.f32 %v4116_v4, %v3921_v45  ;;  %v1345_v59 = vsel %vm1333_vm0, %v1325_v8, 0.0 }
 0x4ee   :  { %v1341_v56 = vsel %vm1333_vm0, %v1317_v54, 0.0  ;;  %v1320_v25 = vadd.f32 %v3921_v45, %v1319_v55  ;;  %v3928_v55 = vld [vmem:[#allocation11 + $0x2] ss:$0 sm:$0xff] }
 0x4ef   :  { %v1342_v57 = vadd.f32 %v1341_v56, %v1340_v21  ;;  %v1347_v60 = vsel %vm1333_vm0, %v1328_v7, 0.0 }
 0x4f0   :  { %v1343_v58 = vsel %vm1333_vm0, %v1320_v25, 0.0 }
 0x4f1   :  { %v1344_v10 = vadd.f32 %v1343_v58, %v1342_v57 }
 0x4f3   :  { %v1346_v19 = vadd.f32 %v1345_v59, %v1344_v10 }
 0x4f5   :  { %v1348_v24 = vadd.f32 %v1347_v60, %v1346_v19 }
 0x4f7   :  { %v1349_v61 = vrot.slane %v1348_v24, 4 }
 0x4f9   :  { %v1350_v62 = vadd.f32 %v1349_v61, %v1348_v24 }
 0x4fb   :  { %v1351_v63 = vrot.slane %v1350_v62, 2 }
 0x4fd   :  { %v1352_v2 = vadd.f32 %v1351_v63, %v1350_v62 }
 0x4ff   :  { %v1353_v3 = vrot.slane %v1352_v2, 1 }
 0x501   :  { %v1354_v5 = vadd.f32 %v1353_v3, %v1352_v2 }
 0x503   :  { %v1356_v6 = vmul.f32 0.015625, %v1354_v5 }
 0x505   :  { %v1357_v9 = vsub.f32 %v1301_v48, %v1356_v6  ;;  %v1358_v11 = vsub.f32 %v1304_v1, %v1356_v6  ;;  %v1359_v12 = vsub.f32 %v1309_v14, %v1356_v6  ;;  %v1360_v13 = vsub.f32 %v1312_v16, %v1356_v6 }
 0x506   :  { %v1361_v22 = vsub.f32 %v1317_v54, %v1356_v6  ;;  %v1362_v26 = vsub.f32 %v1320_v25, %v1356_v6  ;;  %v1363_v27 = vsub.f32 %v1325_v8, %v1356_v6  ;;  %v1364_v28 = vsub.f32 %v1328_v7, %v1356_v6 }
 0x507   :  { %v1365_v29 = vmul.f32 %v1357_v9, %v1357_v9  ;;  %v1366_v30 = vmul.f32 %v1358_v11, %v1358_v11  ;;  %v1367_v31 = vmul.f32 %v1359_v12, %v1359_v12  ;;  %v1368_v32 = vmul.f32 %v1360_v13, %v1360_v13 }
 0x508   :  { %v1369_v37 = vmul.f32 %v1361_v22, %v1361_v22  ;;  %v1370_v40 = vmul.f32 %v1362_v26, %v1362_v26  ;;  %v1371_v43 = vmul.f32 %v1363_v27, %v1363_v27  ;;  %v1372_v46 = vmul.f32 %v1364_v28, %v1364_v28 }
 0x509   :  { %v1373_v33 = vsel %vm1333_vm0, %v1365_v29, 0.0  ;;  %v1374_v34 = vsel %vm1333_vm0, %v1366_v30, 0.0  ;;  %v1376_v38 = vsel %vm1333_vm0, %v1367_v31, 0.0  ;;  %v1378_v41 = vsel %vm1333_vm0, %v1368_v32, 0.0 }
 0x50a   :  { %v1375_v35 = vadd.f32 %v1374_v34, %v1373_v33  ;;  %v1380_v44 = vsel %vm1333_vm0, %v1369_v37, 0.0  ;;  %v1382_v47 = vsel %vm1333_vm0, %v1370_v40, 0.0  ;;  %v1384_v49 = vsel %vm1333_vm0, %v1371_v43, 0.0 }
 0x50b   :  { %v1386_v14 = vsel %vm1333_vm0, %v1372_v46, 0.0 }
 0x50c   :  { %v1377_v39 = vadd.f32 %v1376_v38, %v1375_v35 }
 0x50e   :  { %v1379_v42 = vadd.f32 %v1378_v41, %v1377_v39 }
 0x510   :  { %v1381_v45 = vadd.f32 %v1380_v44, %v1379_v42 }
 0x512   :  { %v1383_v48 = vadd.f32 %v1382_v47, %v1381_v45 }
 0x514   :  { %v1385_v50 = vadd.f32 %v1384_v49, %v1383_v48 }
 0x516   :  { %v1387_v1 = vadd.f32 %v1386_v14, %v1385_v50 }
 0x518   :  { %v1388_v15 = vrot.slane %v1387_v1, 4 }
 0x51a   :  { %v1389_v16 = vadd.f32 %v1388_v15, %v1387_v1 }
 0x51c   :  { %v1390_v17 = vrot.slane %v1389_v16, 2 }
 0x51e   :  { %v1391_v18 = vadd.f32 %v1390_v17, %v1389_v16 }
 0x520   :  { %v1392_v51 = vrot.slane %v1391_v18, 1 }
 0x522   :  { %v1393_v20 = vadd.f32 %v1392_v51, %v1391_v18 }
 0x524   :  { %v1394_v52 = vmul.f32 0.015625, %v1393_v20 }
 0x526   :  { %v1395_v21 = vadd.f32 1e-05, %v1394_v52 }
 0x528   :  { %4324 = vrsqrt.f32 %v1395_v21 }
 0x532   :  { %v4325_v23 = vpop.eup %4324 }
 0x533   :  { %v1397_v54 = vmul.f32 %v4325_v23, %v1331_v53 }
 0x535   :  { %v1401_v4 = vrot.slane %v1397_v54, %v5365_v36 }
 0x537   :  { %v1402_v8 = vmul.f32 %v1401_v4, %v1357_v9  ;;  %v1403_v56 = vmul.f32 %v1401_v4, %v1358_v11  ;;  %v1404_v25 = vmul.f32 %v1401_v4, %v1359_v12  ;;  %v1405_v57 = vmul.f32 %v1401_v4, %v1360_v13 }
 0x538   :  { %v1406_v7 = vmul.f32 %v1401_v4, %v1361_v22  ;;  %v1407_v58 = vmul.f32 %v1401_v4, %v1362_v26  ;;  %v1408_v10 = vmul.f32 %v1401_v4, %v1363_v27  ;;  %v1409_v59 = vmul.f32 %v1401_v4, %v1364_v28 }
 0x539   :  { %v1414_v19 = vadd.f32 %v3928_v55, %v1402_v8  ;;  %v1415_v60 = vadd.f32 %v3928_v55, %v1403_v56  ;;  %v1416_v24 = vadd.f32 %v3928_v55, %v1404_v25  ;;  %v1417_v61 = vadd.f32 %v3928_v55, %v1405_v57 }
 0x53a   :  { %v1418_v62 = vadd.f32 %v3928_v55, %v1406_v7  ;;  %v1419_v63 = vadd.f32 %v3928_v55, %v1407_v58  ;;  %v1420_v2 = vadd.f32 %v3928_v55, %v1408_v10  ;;  %v1421_v3 = vadd.f32 %v3928_v55, %v1409_v59 }
 0x53b   :  { %v1422_v5 = vmax.f32 %v1414_v19, 0.0  ;;  %v1423_v6 = vmax.f32 %v1415_v60, 0.0  ;;  %v1424_v29 = vmax.f32 %v1416_v24, 0.0  ;;  %v1425_v30 = vmax.f32 %v1417_v61, 0.0 }
 0x53c   :  { %v1426_v9 = vmax.f32 %v1418_v62, 0.0  ;;  %v1427_v11 = vmax.f32 %v1419_v63, 0.0  ;;  %v1428_v12 = vmax.f32 %v1420_v2, 0.0  ;;  %v1429_v13 = vmax.f32 %v1421_v3, 0.0 }
 0x53d   :  { %1430 = vst.msk [vmem:[#allocation2] sm:$0xff] %vm1333_vm0, %v1422_v5  ;;  %1431 = vst.msk [vmem:[#allocation2 + $0x8] sm:$0xff] %vm1333_vm0, %v1423_v6 }
 0x53e   :  { %1432 = vst.msk [vmem:[#allocation2 + $0x10] sm:$0xff] %vm1333_vm0, %v1424_v29  ;;  %1433 = vst.msk [vmem:[#allocation2 + $0x18] sm:$0xff] %vm1333_vm0, %v1425_v30 }
 0x53f   :  { %1434 = vst.msk [vmem:[#allocation2 + $0x20] sm:$0xff] %vm1333_vm0, %v1426_v9  ;;  %1435 = vst.msk [vmem:[#allocation2 + $0x28] sm:$0xff] %vm1333_vm0, %v1427_v11 }
 0x540   :  { %1436 = vst.msk [vmem:[#allocation2 + $0x30] sm:$0xff] %vm1333_vm0, %v1428_v12  ;;  %1437 = vst.msk [vmem:[#allocation2 + $0x38] sm:$0xff] %vm1333_vm0, %v1429_v13 }
 0x544   :  { %v1438_v22 = vld [vmem:[#allocation2] sm:$0xff]  ;;  %v1439_v26 = vld [vmem:[#allocation2 + $0x8] sm:$0xff] }
 0x545   :  { %v1440_v27 = vld [vmem:[#allocation2 + $0x10] sm:$0xff]  ;;  %v1448_v28 = vsel %vm1333_vm0, %v1438_v22, 0.0  ;;  %v1449_v31 = vsel %vm1333_vm0, %v1439_v26, 0.0  ;;  %v1441_v32 = vld [vmem:[#allocation2 + $0x18] sm:$0xff] }
 0x546   :  { %v1450_v33 = vadd.f32 %v1449_v31, %v1448_v28  ;;  %v1451_v34 = vsel %vm1333_vm0, %v1440_v27, 0.0  ;;  %v1442_v35 = vld [vmem:[#allocation2 + $0x20] sm:$0xff]  ;;  %v1453_v38 = vsel %vm1333_vm0, %v1441_v32, 0.0  ;;  %v1443_v39 = vld [vmem:[#allocation2 + $0x28] sm:$0xff] }
 0x547   :  { %v1455_v41 = vsel %vm1333_vm0, %v1442_v35, 0.0  ;;  %v1444_v42 = vld [vmem:[#allocation2 + $0x30] sm:$0xff]  ;;  %v1457_v44 = vsel %vm1333_vm0, %v1443_v39, 0.0  ;;  %v1445_v45 = vld [vmem:[#allocation2 + $0x38] sm:$0xff] }
 0x548   :  { %v1452_v37 = vadd.f32 %v1451_v34, %v1450_v33  ;;  %v1459_v47 = vsel %vm1333_vm0, %v1444_v42, 0.0  ;;  %v1461_v49 = vsel %vm1333_vm0, %v1445_v45, 0.0  ;;  %v1446_v34 = vld [vmem:[#allocation13] sm:$0x1] }
 0x54a   :  { %v1454_v40 = vadd.f32 %v1453_v38, %v1452_v37 }
 0x54c   :  { %v1456_v43 = vadd.f32 %v1455_v41, %v1454_v40 }
 0x54e   :  { %v1458_v46 = vadd.f32 %v1457_v44, %v1456_v43 }
 0x550   :  { %v1460_v48 = vadd.f32 %v1459_v47, %v1458_v46 }
 0x552   :  { %v1462_v50 = vadd.f32 %v1461_v49, %v1460_v48 }
 0x554   :  { %v1463_v14 = vrot.slane %v1462_v50, 4 }
 0x556   :  { %v1464_v1 = vadd.f32 %v1463_v14, %v1462_v50 }
 0x558   :  { %v1465_v15 = vrot.slane %v1464_v1, 2 }
 0x55a   :  { %v1466_v16 = vadd.f32 %v1465_v15, %v1464_v1 }
 0x55c   :  { %v1467_v17 = vrot.slane %v1466_v16, 1 }
 0x55e   :  { %v1468_v18 = vadd.f32 %v1467_v17, %v1466_v16 }
 0x560   :  { %v1469_v51 = vmul.f32 0.015625, %v1468_v18 }
 0x562   :  { %v1470_v20 = vsub.f32 %v1438_v22, %v1469_v51  ;;  %v1471_v52 = vsub.f32 %v1439_v26, %v1469_v51  ;;  %v1472_v21 = vsub.f32 %v1440_v27, %v1469_v51  ;;  %v1473_v53 = vsub.f32 %v1441_v32, %v1469_v51 }
 0x563   :  { %v1474_v23 = vsub.f32 %v1442_v35, %v1469_v51  ;;  %v1475_v8 = vsub.f32 %v1443_v39, %v1469_v51  ;;  %v1476_v58 = vsub.f32 %v1444_v42, %v1469_v51  ;;  %v1477_v60 = vsub.f32 %v1445_v45, %v1469_v51  ;;  %v3929_v39 = vld [vmem:[#allocation13 + $0x1] ss:$0 sm:$0xff] }
 0x564   :  { %v1478_v54 = vmul.f32 %v1470_v20, %v1470_v20  ;;  %v1479_v4 = vmul.f32 %v1471_v52, %v1471_v52  ;;  %v1480_v55 = vmul.f32 %v1472_v21, %v1472_v21  ;;  %v1481_v56 = vmul.f32 %v1473_v53, %v1473_v53 }
 0x565   :  { %v1482_v10 = vmul.f32 %v1474_v23, %v1474_v23  ;;  %v1483_v24 = vmul.f32 %v1475_v8, %v1475_v8  ;;  %v1484_v63 = vmul.f32 %v1476_v58, %v1476_v58  ;;  %v1485_v5 = vmul.f32 %v1477_v60, %v1477_v60 }
 0x566   :  { %v1486_v25 = vsel %vm1333_vm0, %v1478_v54, 0.0  ;;  %v1487_v57 = vsel %vm1333_vm0, %v1479_v4, 0.0  ;;  %v1489_v59 = vsel %vm1333_vm0, %v1480_v55, 0.0  ;;  %v1491_v61 = vsel %vm1333_vm0, %v1481_v56, 0.0 }
 0x567   :  { %v1488_v7 = vadd.f32 %v1487_v57, %v1486_v25  ;;  %v1493_v2 = vsel %vm1333_vm0, %v1482_v10, 0.0  ;;  %v1495_v6 = vsel %vm1333_vm0, %v1483_v24, 0.0  ;;  %v1497_v30 = vsel %vm1333_vm0, %v1484_v63, 0.0  ;;  %v4289_v25 = vld [vmem:[%s6091_s8] sm:$0xff]  }
 0x568   :  { %v1499_v11 = vsel %vm1333_vm0, %v1485_v5, 0.0  ;;  %4127 = vmatprep.subr.bf16.mxu0 %v4289_v25 }
 0x569   :  { %v1490_v19 = vadd.f32 %v1489_v59, %v1488_v7  ;;  %4128 = vmatpush3.bf16.msra.mxu0 %v4289_v25 }
 0x56b   :  { %v1492_v62 = vadd.f32 %v1491_v61, %v1490_v19 }
 0x56d   :  { %v1494_v3 = vadd.f32 %v1493_v2, %v1492_v62 }
 0x56f   :  { %v1496_v29 = vadd.f32 %v1495_v6, %v1494_v3 }
 0x571   :  { %v1498_v9 = vadd.f32 %v1497_v30, %v1496_v29 }
 0x573   :  { %v1500_v12 = vadd.f32 %v1499_v11, %v1498_v9 }
 0x575   :  { %v1501_v13 = vrot.slane %v1500_v12, 4 }
 0x577   :  { %v1502_v22 = vadd.f32 %v1501_v13, %v1500_v12 }
 0x579   :  { %v1503_v26 = vrot.slane %v1502_v22, 2 }
 0x57b   :  { %v1504_v27 = vadd.f32 %v1503_v26, %v1502_v22 }
 0x57d   :  { %v1505_v28 = vrot.slane %v1504_v27, 1 }
 0x57f   :  { %v1506_v31 = vadd.f32 %v1505_v28, %v1504_v27 }
 0x581   :  { %v1507_v32 = vmul.f32 0.015625, %v1506_v31 }
 0x583   :  { %v1508_v33 = vadd.f32 1e-05, %v1507_v32 }
 0x585   :  { %4326 = vrsqrt.f32 %v1508_v33 }
 0x58f   :  { %v4327_v35 = vpop.eup %4326 }
 0x590   :  { %v1510_v37 = vmul.f32 %v4327_v35, %v1446_v34 }
 0x592   :  { %v1514_v38 = vrot.slane %v1510_v37, %v5365_v36 }
 0x594   :  { %v1515_v40 = vmul.f32 %v1514_v38, %v1470_v20  ;;  %v1516_v41 = vmul.f32 %v1514_v38, %v1471_v52  ;;  %v1517_v42 = vmul.f32 %v1514_v38, %v1472_v21  ;;  %v1518_v43 = vmul.f32 %v1514_v38, %v1473_v53 }
 0x595   :  { %v1519_v44 = vmul.f32 %v1514_v38, %v1474_v23  ;;  %v1520_v45 = vmul.f32 %v1514_v38, %v1475_v8  ;;  %v1521_v1 = vmul.f32 %v1514_v38, %v1476_v58  ;;  %v1522_v15 = vmul.f32 %v1514_v38, %v1477_v60 }
 0x596   :  { %v1527_v46 = vadd.f32 %v3929_v39, %v1515_v40  ;;  %v1528_v47 = vadd.f32 %v3929_v39, %v1516_v41  ;;  %v1529_v48 = vadd.f32 %v3929_v39, %v1517_v42  ;;  %v1530_v49 = vadd.f32 %v3929_v39, %v1518_v43 }
 0x597   :  { %v1531_v50 = vadd.f32 %v3929_v39, %v1519_v44  ;;  %v1532_v14 = vadd.f32 %v3929_v39, %v1520_v45  ;;  %v1533_v21 = vadd.f32 %v3929_v39, %v1521_v1  ;;  %v1534_v53 = vadd.f32 %v3929_v39, %v1522_v15 }
 0x598   :  { %v1535_v16 = vmax.f32 %v1527_v46, 0.0  ;;  %v1536_v17 = vmax.f32 %v1528_v47, 0.0  ;;  %v1537_v18 = vmax.f32 %v1529_v48, 0.0  ;;  %v1538_v51 = vmax.f32 %v1530_v49, 0.0 }
 0x599   :  { %v1539_v54 = vmax.f32 %v1531_v50, 0.0  ;;  %v1540_v4 = vmax.f32 %v1532_v14, 0.0  ;;  %v1541_v55 = vmax.f32 %v1533_v21, 0.0  ;;  %v1542_v8 = vmax.f32 %v1534_v53, 0.0 }
 0x59a   :  { %v1543_v20 = vpack.c.bf16 %v1536_v17, %v1535_v16  ;;  %v1544_v52 = vpack.c.bf16 %v1538_v51, %v1537_v18 }
 0x59b   :  { %v1545_v23 = vpack.c.bf16 %v1540_v4, %v1539_v54  ;;  %v1546_v56 = vpack.c.bf16 %v1542_v8, %v1541_v55 }
 0x59c   :  { %4119 = vmatprep.mubr.msk.bf16.mxu1 %vm1333_vm0, %v1543_v20 }
 0x59d   :  { %4120 = vmatmul.mubr.msk.bf16.vlgmr.msra.gmra.mrb[8].mxu1 %vm1333_vm0, %v1544_v52 }
 0x59e   :  { %4123 = vmatprep.mubr.msk.bf16.mxu1 %vm1333_vm0, %v1545_v23 }
 0x5a5   :  { %4124 = vmatmul.mubr.msk.bf16.gmra.mrb[12].mxu1 %vm1333_vm0, %v1546_v56 }
 0x670   :  { %v4121_v57 = vpop.f32.mrb[8].mxu1 }
 0x671   :  { %v1601_v7 = vpop.f32.mrb[9].mxu1  ;;  %v1638_v24 = vsel %vm1634_vm1, %v4121_v57, 0.0 }
 0x672   :  { %v4122_v58 = vpop.f32.mrb[10].mxu1  ;;  %v1635_v59 = vsel %vm1634_vm1, %v1601_v7, 0.0 }
 0x673   :  { %v1604_v10 = vpop.f32.mrb[11].mxu1  ;;  %v1640_v62 = vsel %vm1634_vm1, %v4122_v58, 0.0 }
 0x674   :  { %v1636_v19 = vsel %vm1634_vm1, %v1604_v10, 0.0 }
 0x675   :  { %v1637_v60 = vadd.f32 %v1636_v19, %v1635_v59 }
 0x677   :  { %v1639_v61 = vadd.f32 %v1638_v24, %v1637_v60  ;;  %v1632_v24 = vld [vmem:[%s6092_s28] sm:$0x1] }
 0x678   :  { %v4125_v63 = vpop.f32.mrb[12].mxu1 }
 0x679   :  { %v1617_v2 = vpop.f32.mrb[13].mxu1  ;;  %v1641_v3 = vadd.f32 %v1640_v62, %v1639_v61  ;;  %v1646_v12 = vsel %vm1634_vm1, %v4125_v63, 0.0 }
 0x67a   :  { %v1642_v5 = vsel %vm1634_vm1, %v1617_v2, 0.0  ;;  %v4126_v6 = vpop.f32.mrb[14].mxu1 }
 0x67b   :  { %v1643_v29 = vadd.f32 %v1642_v5, %v1641_v3  ;;  %v1620_v30 = vpop.f32.mrb[15].mxu1  ;;  %v1648_v22 = vsel %vm1634_vm1, %v4126_v6, 0.0 }
 0x67c   :  { %v1644_v9 = vsel %vm1634_vm1, %v1620_v30, 0.0 }
 0x67d   :  { %v1645_v11 = vadd.f32 %v1644_v9, %v1643_v29 }
 0x67f   :  { %v1647_v13 = vadd.f32 %v1646_v12, %v1645_v11 }
 0x681   :  { %v1649_v26 = vadd.f32 %v1648_v22, %v1647_v13  ;;  %v4290_v13 = vld [vmem:[%s6091_s8 + $0x8] sm:$0xff]  }
 0x682   :  { %4129 = vmatprep.subr.bf16.mxu0 %v4290_v13 }
 0x683   :  { %v1650_v27 = vrot.slane %v1649_v26, 4  ;;  %4130 = vmatpush3.bf16.msra.mxu0 %v4290_v13 }
 0x685   :  { %v1651_v28 = vadd.f32 %v1650_v27, %v1649_v26 }
 0x687   :  { %v1652_v31 = vrot.slane %v1651_v28, 2 }
 0x689   :  { %v1653_v32 = vadd.f32 %v1652_v31, %v1651_v28 }
 0x68b   :  { %v1654_v33 = vrot.slane %v1653_v32, 1 }
 0x68d   :  { %v1655_v34 = vadd.f32 %v1654_v33, %v1653_v32 }
 0x68f   :  { %v1656_v35 = vmul.f32 0.015625, %v1655_v34 }
 0x691   :  { %v1657_v37 = vsub.f32 %v1601_v7, %v1656_v35  ;;  %v1658_v38 = vsub.f32 %v1604_v10, %v1656_v35  ;;  %v1659_v39 = vsub.f32 %v4121_v57, %v1656_v35  ;;  %v1660_v40 = vsub.f32 %v4122_v58, %v1656_v35 }
 0x692   :  { %v1661_v41 = vsub.f32 %v1617_v2, %v1656_v35  ;;  %v1662_v42 = vsub.f32 %v1620_v30, %v1656_v35  ;;  %v1663_v43 = vsub.f32 %v4125_v63, %v1656_v35  ;;  %v1664_v44 = vsub.f32 %v4126_v6, %v1656_v35  ;;  %v3935_v2 = vld [vmem:[%s6092_s28 + $0x1] ss:$0 sm:$0xff] }
 0x693   :  { %v1665_v45 = vmul.f32 %v1657_v37, %v1657_v37  ;;  %v1666_v46 = vmul.f32 %v1658_v38, %v1658_v38  ;;  %v1667_v47 = vmul.f32 %v1659_v39, %v1659_v39  ;;  %v1668_v48 = vmul.f32 %v1660_v40, %v1660_v40 }
 0x694   :  { %v1669_v1 = vmul.f32 %v1661_v41, %v1661_v41  ;;  %v1670_v17 = vmul.f32 %v1662_v42, %v1662_v42  ;;  %v1671_v54 = vmul.f32 %v1663_v43, %v1663_v43  ;;  %v1672_v52 = vmul.f32 %v1664_v44, %v1664_v44 }
 0x695   :  { %v1673_v49 = vsel %vm1634_vm1, %v1665_v45, 0.0  ;;  %v1674_v50 = vsel %vm1634_vm1, %v1666_v46, 0.0  ;;  %v1676_v15 = vsel %vm1634_vm1, %v1667_v47, 0.0  ;;  %v1678_v18 = vsel %vm1634_vm1, %v1668_v48, 0.0  ;;  %v4292_v45 = vld [vmem:[%s6091_s8 + $0x18] sm:$0xff]  }
 0x696   :  { %v1675_v14 = vadd.f32 %v1674_v50, %v1673_v49  ;;  %v1680_v4 = vsel %vm1634_vm1, %v1669_v1, 0.0  ;;  %v1682_v21 = vsel %vm1634_vm1, %v1670_v17, 0.0  ;;  %v1684_v23 = vsel %vm1634_vm1, %v1671_v54, 0.0 }
 0x697   :  { %v1686_v8 = vsel %vm1634_vm1, %v1672_v52, 0.0 }
 0x698   :  { %v1677_v16 = vadd.f32 %v1676_v15, %v1675_v14 }
 0x69a   :  { %v1679_v51 = vadd.f32 %v1678_v18, %v1677_v16 }
 0x69c   :  { %v1681_v20 = vadd.f32 %v1680_v4, %v1679_v51  ;;  %v4293_v51 = vld [vmem:[%s6091_s8 + $0x20] sm:$0xff]  }
 0x69e   :  { %v1683_v53 = vadd.f32 %v1682_v21, %v1681_v20  ;;  %v4294_v20 = vld [vmem:[%s6091_s8 + $0x28] sm:$0xff]  }
 0x6a0   :  { %v1685_v55 = vadd.f32 %v1684_v23, %v1683_v53 }
 0x6a2   :  { %v1687_v56 = vadd.f32 %v1686_v8, %v1685_v55 }
 0x6a4   :  { %v1688_v25 = vrot.slane %v1687_v56, 4 }
 0x6a6   :  { %v1689_v57 = vadd.f32 %v1688_v25, %v1687_v56 }
 0x6a8   :  { %v1690_v7 = vrot.slane %v1689_v57, 2 }
 0x6aa   :  { %v1691_v58 = vadd.f32 %v1690_v7, %v1689_v57 }
 0x6ac   :  { %v1692_v10 = vrot.slane %v1691_v58, 1 }
 0x6ae   :  { %v1693_v59 = vadd.f32 %v1692_v10, %v1691_v58 }
 0x6b0   :  { %v1694_v19 = vmul.f32 0.015625, %v1693_v59 }
 0x6b2   :  { %v1695_v60 = vadd.f32 1e-05, %v1694_v19 }
 0x6b4   :  { %4328 = vrsqrt.f32 %v1695_v60 }
 0x6be   :  { %v4329_v61 = vpop.eup %4328 }
 0x6bf   :  { %v1697_v62 = vmul.f32 %v4329_v61, %v1632_v24 }
 0x6c1   :  { %v1701_v63 = vrot.slane %v1697_v62, %v5365_v36 }
 0x6c3   :  { %v1702_v3 = vmul.f32 %v1701_v63, %v1657_v37  ;;  %v1703_v5 = vmul.f32 %v1701_v63, %v1658_v38  ;;  %v1704_v6 = vmul.f32 %v1701_v63, %v1659_v39  ;;  %v1705_v29 = vmul.f32 %v1701_v63, %v1660_v40 }
 0x6c4   :  { %v1706_v30 = vmul.f32 %v1701_v63, %v1661_v41  ;;  %v1707_v9 = vmul.f32 %v1701_v63, %v1662_v42  ;;  %v1708_v11 = vmul.f32 %v1701_v63, %v1663_v43  ;;  %v1709_v12 = vmul.f32 %v1701_v63, %v1664_v44  ;;  %v4291_v44 = vld [vmem:[%s6091_s8 + $0x10] sm:$0xff]  }
 0x6c5   :  { %v1714_v22 = vadd.f32 %v3935_v2, %v1702_v3  ;;  %v1715_v26 = vadd.f32 %v3935_v2, %v1703_v5  ;;  %v1716_v27 = vadd.f32 %v3935_v2, %v1704_v6  ;;  %v1717_v28 = vadd.f32 %v3935_v2, %v1705_v29  ;;  %4131 = vmatprep.subr.bf16.mxu0 %v4291_v44 }
 0x6c6   :  { %v1718_v31 = vadd.f32 %v3935_v2, %v1706_v30  ;;  %v1719_v32 = vadd.f32 %v3935_v2, %v1707_v9  ;;  %v1720_v33 = vadd.f32 %v3935_v2, %v1708_v11  ;;  %v1721_v34 = vadd.f32 %v3935_v2, %v1709_v12  ;;  %4132 = vmatpush3.bf16.msra.mxu0 %v4291_v44 }
 0x6c7   :  { %v1722_v35 = vmax.f32 %v1714_v22, 0.0  ;;  %v1723_v37 = vmax.f32 %v1715_v26, 0.0  ;;  %v1724_v38 = vmax.f32 %v1716_v27, 0.0  ;;  %v1725_v39 = vmax.f32 %v1717_v28, 0.0  ;;  %4133 = vmatprep.subr.bf16.mxu0 %v4292_v45 }
 0x6c8   :  { %v1726_v40 = vmax.f32 %v1718_v31, 0.0  ;;  %v1727_v41 = vmax.f32 %v1719_v32, 0.0  ;;  %v1728_v42 = vmax.f32 %v1720_v33, 0.0  ;;  %v1729_v43 = vmax.f32 %v1721_v34, 0.0 }
 0x6c9   :  { %1735 = vst.msk [vmem:[#allocation3 + $0x8] sm:$0xff] %vm1634_vm1, %v1722_v35  ;;  %1736 = vst.msk [vmem:[#allocation3 + $0x10] sm:$0xff] %vm1634_vm1, %v1723_v37 }
 0x6ca   :  { %1737 = vst.msk [vmem:[#allocation3 + $0x18] sm:$0xff] %vm1634_vm1, %v1724_v38  ;;  %1738 = vst.msk [vmem:[#allocation3 + $0x20] sm:$0xff] %vm1634_vm1, %v1725_v39  ;;  %4134 = vmatpush3.bf16.msra.mxu0 %v4292_v45 }
 0x6cb   :  { %1739 = vst.msk [vmem:[#allocation3 + $0x58] sm:$0xff] %vm1634_vm1, %v1726_v40  ;;  %1740 = vst.msk [vmem:[#allocation3 + $0x60] sm:$0xff] %vm1634_vm1, %v1727_v41  ;;  %4135 = vmatprep.subr.bf16.mxu0 %v4293_v51 }
 0x6cc   :  { %1741 = vst.msk [vmem:[#allocation3 + $0x68] sm:$0xff] %vm1634_vm1, %v1728_v42  ;;  %1742 = vst.msk [vmem:[#allocation3 + $0x70] sm:$0xff] %vm1634_vm1, %v1729_v43  ;;  %v4295_v42 = vld [vmem:[#allocation17] sm:$0xff]   ;;  %v4296_v43 = vld [vmem:[#allocation17 + $0x8] ss:$0 sps:$4 sm:$0xff]  }
 0x6cd   :  { %4147 = vmatprep.subr.bf16.mxu1 %v4295_v42  ;;  %v2169_v44 = vsel %vm1262_vm12, %v4296_v43, 0 }
 0x6ce   :  { %4136 = vmatpush3.bf16.msra.mxu0 %v4293_v51  ;;  %4148 = vmatpush3.bf16.msra.mxu1 %v4295_v42 }
 0x6cf   :  { %4137 = vmatprep.subr.bf16.mxu0 %v4294_v20  ;;  %4256 = vmatprep.subr.msk.bf16.mxu1 %vm1262_vm12, %v4296_v43 }
 0x6d0   :  { %v1760_v46 = vld [vmem:[#allocation3 + $0x10] sm:$0xff]  ;;  %v1759_v47 = vld [vmem:[#allocation3 + $0x8] sm:$0xff] }
 0x6d1   :  { %1777 = vrot.lane.b32.xlu1 %v1760_v46, %s4693_s2  ;;  %1775 = vrot.lane.b32.xlu0 %v1759_v47, %s4693_s2  ;;  %v1811_v48 = vld [vmem:[#allocation3 + $0x21] sm:$0xff]  ;;  %v1761_v50 = vld [vmem:[#allocation3 + $0x18] sm:$0xff]  ;;  %v1744_v1 = vld [vmem:[#allocation3 + $0xf] sm:$0xff] }
 0x6d2   :  { %2335 = vst.msk [vmem:[#allocation3 + $0x28] sm:$0x1] %vm1732_vm11, %v4687_v0  ;;  %v1762_v49 = vld [vmem:[#allocation3 + $0x20] sm:$0xff]  ;;  %v1809_v16 = vld [vmem:[#allocation3 + $0x11] sm:$0xff]  ;;  %v1808_v52 = vld [vmem:[#allocation3 + $0x9] sm:$0xff]  ;;  %4138 = vmatpush3.bf16.msra.mxu0 %v4294_v20  ;;  %4150 = vmatpush3.bf16.msra.mxu1 %v2169_v44 }
 0x6d3   :  { %v1815_v14 = vld [vmem:[#allocation3 + $0x71] sm:$0xff]  ;;  %v1743_v15 = vld [vmem:[#allocation3 + $0x7] sm:$0xff]  ;;  %1752 = vst.msk [vmem:[#allocation4 + $0x8] sm:$0xff] %vm1634_vm1, %v1744_v1  ;;  %v1746_v17 = vld [vmem:[#allocation3 + $0x1f] sm:$0xff] }
 0x6d4   :  { %2336 = vst.msk [vmem:[#allocation3 + $0x78] sm:$0x1] %vm1732_vm11, %v4687_v0  ;;  %v1745_v18 = vld [vmem:[#allocation3 + $0x17] sm:$0xff]  ;;  %v1748_v54 = vld [vmem:[#allocation3 + $0x5f] sm:$0xff]  ;;  %v1750_v21 = vld [vmem:[#allocation3 + $0x6f] sm:$0xff] }
 0x6d5   :  { %1781 = vrot.lane.b32.xlu1 %v1762_v49, %s4693_s2  ;;  %1779 = vrot.lane.b32.xlu0 %v1761_v50, %s4693_s2  ;;  %1751 = vst.msk [vmem:[#allocation4] sm:$0xff] %vm1634_vm1, %v1743_v15  ;;  %2333 = vst.msk [vmem:[#allocation3] sm:$0xff] %vm1634_vm1, %v4687_v0  ;;  %v1747_v4 = vld [vmem:[#allocation3 + $0x57] sm:$0xff]  ;;  %v1749_v53 = vld [vmem:[#allocation3 + $0x67] sm:$0xff] }
 0x6d6   :  { %1754 = vst.msk [vmem:[#allocation4 + $0x18] sm:$0xff] %vm1634_vm1, %v1746_v17  ;;  %1753 = vst.msk [vmem:[#allocation4 + $0x10] sm:$0xff] %vm1634_vm1, %v1745_v18  ;;  %v1810_v23 = vld [vmem:[#allocation3 + $0x19] sm:$0xff]  ;;  %v1766_v56 = vld [vmem:[#allocation3 + $0x70] sm:$0xff] }
 0x6d7   :  { %1756 = vst.msk [vmem:[#allocation4 + $0x48] sm:$0xff] %vm1634_vm1, %v1748_v54  ;;  %1755 = vst.msk [vmem:[#allocation4 + $0x40] sm:$0xff] %vm1634_vm1, %v1747_v4  ;;  %v1764_v55 = vld [vmem:[#allocation3 + $0x60] sm:$0xff]  ;;  %v1763_v8 = vld [vmem:[#allocation3 + $0x58] sm:$0xff] }
 0x6d8   :  { %2334 = vst.msk [vmem:[#allocation3 + $0x50] sm:$0xff] %vm1634_vm1, %v4687_v0  ;;  %1758 = vst.msk [vmem:[#allocation4 + $0x58] sm:$0xff] %vm1634_vm1, %v1750_v21  ;;  %v1765_v25 = vld [vmem:[#allocation3 + $0x68] sm:$0xff]  ;;  %v1812_v7 = vld [vmem:[#allocation3 + $0x59] sm:$0xff] }
 0x6d9   :  { %1826 = vrot.lane.b32.xlu1 %v1809_v16, %s4674_s9  ;;  %1824 = vrot.lane.b32.xlu0 %v1808_v52, %s4674_s9  ;;  %1757 = vst.msk [vmem:[#allocation4 + $0x50] sm:$0xff] %vm1634_vm1, %v1749_v53  ;;  %v1813_v57 = vld [vmem:[#allocation3 + $0x61] sm:$0xff]  ;;  %v1814_v58 = vld [vmem:[#allocation3 + $0x69] sm:$0xff] }
 0x6dd   :  { %1830 = vrot.lane.b32.xlu1 %v1811_v48, %s4674_s9  ;;  %1828 = vrot.lane.b32.xlu0 %v1810_v23, %s4674_s9 }
 0x6e1   :  { %1785 = vrot.lane.b32.xlu1 %v1764_v55, %s4693_s2  ;;  %1783 = vrot.lane.b32.xlu0 %v1763_v8, %s4693_s2 }
 0x6e5   :  { %1789 = vrot.lane.b32.xlu1 %v1766_v56, %s4693_s2  ;;  %1787 = vrot.lane.b32.xlu0 %v1765_v25, %s4693_s2 }
 0x6e9   :  { %1834 = vrot.lane.b32.xlu1 %v1813_v57, %s4674_s9  ;;  %1832 = vrot.lane.b32.xlu0 %v1812_v7, %s4674_s9 }
 0x6ed   :  { %1838 = vrot.lane.b32.xlu1 %v1815_v14, %s4674_s9  ;;  %1836 = vrot.lane.b32.xlu0 %v1814_v58, %s4674_s9 }
 0x743   :  { %v1778_v10 = vpop.permute.xlu1 %1777  ;;  %v1776_v59 = vpop.permute.xlu0 %1775 }
 0x744   :  { %1801 = vst.msk [vmem:[#allocation4 + $0x8] sm:$0xff] %vm1799_vm2, %v1778_v10  ;;  %1800 = vst.msk [vmem:[#allocation4] sm:$0xff] %vm1799_vm2, %v1776_v59 }
 0x747   :  { %v1782_v19 = vpop.permute.xlu1 %1781  ;;  %v1780_v60 = vpop.permute.xlu0 %1779 }
 0x748   :  { %1803 = vst.msk [vmem:[#allocation4 + $0x18] sm:$0xff] %vm1799_vm2, %v1782_v19  ;;  %1802 = vst.msk [vmem:[#allocation4 + $0x10] sm:$0xff] %vm1799_vm2, %v1780_v60 }
 0x74b   :  { %v1827_v24 = vpop.permute.xlu1 %1826  ;;  %v1825_v61 = vpop.permute.xlu0 %1824 }
 0x74c   :  { %1850 = vst.msk [vmem:[#allocation4 + $0x8] sm:$0xff] %vm1848_vm3, %v1827_v24  ;;  %1849 = vst.msk [vmem:[#allocation4] sm:$0xff] %vm1848_vm3, %v1825_v61 }
 0x74f   :  { %v1831_v62 = vpop.permute.xlu1 %1830  ;;  %v1829_v63 = vpop.permute.xlu0 %1828 }
 0x750   :  { %1852 = vst.msk [vmem:[#allocation4 + $0x18] sm:$0xff] %vm1848_vm3, %v1831_v62  ;;  %1851 = vst.msk [vmem:[#allocation4 + $0x10] sm:$0xff] %vm1848_vm3, %v1829_v63 }
 0x753   :  { %v1786_v2 = vpop.permute.xlu1 %1785  ;;  %v1784_v3 = vpop.permute.xlu0 %1783  ;;  %v1857_v5 = vld [vmem:[#allocation4] sm:$0xff]  ;;  %v1858_v6 = vld [vmem:[#allocation4 + $0x8] sm:$0xff] }
 0x754   :  { %1805 = vst.msk [vmem:[#allocation4 + $0x48] sm:$0xff] %vm1799_vm2, %v1786_v2  ;;  %1804 = vst.msk [vmem:[#allocation4 + $0x40] sm:$0xff] %vm1799_vm2, %v1784_v3  ;;  %v1865_v29 = vpack.c.bf16 %v1858_v6, %v1857_v5 }
 0x756   :  { %4139 = vmatprep.mubr.msk.bf16.mxu0 %vm1917_vm4, %v1865_v29 }
 0x757   :  { %v1790_v30 = vpop.permute.xlu1 %1789  ;;  %v1788_v9 = vpop.permute.xlu0 %1787  ;;  %v1859_v11 = vld [vmem:[#allocation4 + $0x10] sm:$0xff]  ;;  %v1860_v12 = vld [vmem:[#allocation4 + $0x18] sm:$0xff] }
 0x758   :  { %1807 = vst.msk [vmem:[#allocation4 + $0x58] sm:$0xff] %vm1799_vm2, %v1790_v30  ;;  %1806 = vst.msk [vmem:[#allocation4 + $0x50] sm:$0xff] %vm1799_vm2, %v1788_v9  ;;  %v1866_v13 = vpack.c.bf16 %v1860_v12, %v1859_v11 }
 0x75a   :  { %4140 = vmatmul.mubr.msk.bf16.vlgmr.msra.gmra.mrb[16].mxu0 %vm1917_vm4, %v1866_v13 }
 0x75b   :  { %v1835_v22 = vpop.permute.xlu1 %1834  ;;  %v1833_v26 = vpop.permute.xlu0 %1832 }
 0x75c   :  { %1854 = vst.msk [vmem:[#allocation4 + $0x48] sm:$0xff] %vm1848_vm3, %v1835_v22  ;;  %1853 = vst.msk [vmem:[#allocation4 + $0x40] sm:$0xff] %vm1848_vm3, %v1833_v26 }
 0x75f   :  { %v1839_v27 = vpop.permute.xlu1 %1838  ;;  %v1837_v28 = vpop.permute.xlu0 %1836 }
 0x760   :  { %1856 = vst.msk [vmem:[#allocation4 + $0x58] sm:$0xff] %vm1848_vm3, %v1839_v27  ;;  %1855 = vst.msk [vmem:[#allocation4 + $0x50] sm:$0xff] %vm1848_vm3, %v1837_v28 }
 0x763   :  { %v1861_v31 = vld [vmem:[#allocation4 + $0x40] sm:$0xff]  ;;  %v1862_v32 = vld [vmem:[#allocation4 + $0x48] sm:$0xff] }
 0x764   :  { %v1867_v33 = vpack.c.bf16 %v1862_v32, %v1861_v31 }
 0x766   :  { %4143 = vmatprep.mubr.msk.bf16.mxu0 %vm1917_vm4, %v1867_v33 }
 0x767   :  { %v1863_v34 = vld [vmem:[#allocation4 + $0x50] sm:$0xff]  ;;  %v1864_v35 = vld [vmem:[#allocation4 + $0x58] sm:$0xff] }
 0x768   :  { %v1868_v37 = vpack.c.bf16 %v1864_v35, %v1863_v34 }
 0x76a   :  { %4144 = vmatmul.mubr.msk.bf16.gmra.mrb[20].mxu0 %vm1917_vm4, %v1868_v37 }
 0x82d   :  { %v4141_v38 = vpop.f32.mrb[16].mxu0 }
 0x82e   :  { %v1964_v39 = vpop.f32.mrb[17].mxu0 }
 0x82f   :  { %2003 = vrot.lane.b32.xlu0 %v1964_v39, %s4692_s4  ;;  %v4142_v40 = vpop.f32.mrb[18].mxu0 }
 0x830   :  { %v1967_v41 = vpop.f32.mrb[19].mxu0 }
 0x831   :  { %2005 = vrot.lane.b32.xlu1 %v1967_v41, %s4692_s4 }
 0x833   :  { %2007 = vrot.lane.b32.xlu0 %v4141_v38, %s4692_s4 }
 0x835   :  { %2009 = vrot.lane.b32.xlu1 %v4142_v40, %s4692_s4 }
 0x83d   :  { %v4145_v45 = vpop.f32.mrb[20].mxu0 }
 0x83e   :  { %v1980_v46 = vpop.f32.mrb[21].mxu0 }
 0x83f   :  { %2011 = vrot.lane.b32.xlu0 %v1980_v46, %s4692_s4  ;;  %v4146_v47 = vpop.f32.mrb[22].mxu0 }
 0x840   :  { %v1983_v48 = vpop.f32.mrb[23].mxu0 }
 0x841   :  { %2013 = vrot.lane.b32.xlu1 %v1983_v48, %s4692_s4 }
 0x843   :  { %2015 = vrot.lane.b32.xlu0 %v4145_v45, %s4692_s4 }
 0x845   :  { %2017 = vrot.lane.b32.xlu1 %v4146_v47, %s4692_s4 }
 0x8a1   :  { %v2004_v49 = vpop.permute.xlu0 %2003 }
 0x8a2   :  { %2027 = vst.msk [vmem:[#allocation2] sm:$0xff] %vm1212_vm14, %v2004_v49 }
 0x8a3   :  { %v2006_v50 = vpop.permute.xlu1 %2005 }
 0x8a4   :  { %2028 = vst.msk [vmem:[#allocation2 + $0x8] sm:$0xff] %vm1212_vm14, %v2006_v50 }
 0x8a5   :  { %v2008_v14 = vpop.permute.xlu0 %2007 }
 0x8a6   :  { %2029 = vst.msk [vmem:[#allocation2 + $0x10] sm:$0xff] %vm1212_vm14, %v2008_v14 }
 0x8a7   :  { %v2010_v1 = vpop.permute.xlu1 %2009 }
 0x8a8   :  { %2030 = vst.msk [vmem:[#allocation2 + $0x18] sm:$0xff] %vm1212_vm14, %v2010_v1 }
 0x8a9   :  { %v2035_v16 = vld [vmem:[#allocation2] sm:$0xff] }
 0x8aa   :  { %v2045_v51 = vsel %vm1249_vm15, %v2035_v16, 0.0 }
 0x8ab   :  { %v2036_v15 = vld [vmem:[#allocation2 + $0x8] sm:$0xff] }
 0x8ac   :  { %v2046_v17 = vsel %vm1249_vm15, %v2036_v15, 0.0 }
 0x8ad   :  { %v2037_v18 = vld [vmem:[#allocation2 + $0x10] sm:$0xff]  ;;  %v2047_v4 = vadd.f32 %v2046_v17, %v2045_v51 }
 0x8ae   :  { %v2048_v20 = vsel %vm1249_vm15, %v2037_v18, 0.0 }
 0x8af   :  { %v2038_v21 = vld [vmem:[#allocation2 + $0x18] sm:$0xff]  ;;  %v2049_v23 = vadd.f32 %v2048_v20, %v2047_v4 }
 0x8b0   :  { %v2050_v55 = vsel %vm1249_vm15, %v2038_v21, 0.0 }
 0x8b1   :  { %v2012_v54 = vpop.permute.xlu0 %2011  ;;  %v2051_v25 = vadd.f32 %v2050_v55, %v2049_v23  ;;  %v2043_v23 = vld [vmem:[#allocation16] sm:$0x1] }
 0x8b2   :  { %2031 = vst.msk [vmem:[#allocation2 + $0x20] sm:$0xff] %vm1212_vm14, %v2012_v54 }
 0x8b3   :  { %v2014_v52 = vpop.permute.xlu1 %2013 }
 0x8b4   :  { %2032 = vst.msk [vmem:[#allocation2 + $0x28] sm:$0xff] %vm1212_vm14, %v2014_v52 }
 0x8b5   :  { %v2016_v53 = vpop.permute.xlu0 %2015 }
 0x8b6   :  { %2033 = vst.msk [vmem:[#allocation2 + $0x30] sm:$0xff] %vm1212_vm14, %v2016_v53 }
 0x8b7   :  { %v2018_v8 = vpop.permute.xlu1 %2017 }
 0x8b8   :  { %2034 = vst.msk [vmem:[#allocation2 + $0x38] sm:$0xff] %vm1212_vm14, %v2018_v8 }
 0x8b9   :  { %v2039_v56 = vld [vmem:[#allocation2 + $0x20] sm:$0xff] }
 0x8ba   :  { %v2052_v57 = vsel %vm1249_vm15, %v2039_v56, 0.0 }
 0x8bb   :  { %v2040_v7 = vld [vmem:[#allocation2 + $0x28] sm:$0xff]  ;;  %v2053_v58 = vadd.f32 %v2052_v57, %v2051_v25  ;;  %v3946_v25 = vld [vmem:[#allocation16 + $0x1] ss:$0 sm:$0xff] }
 0x8bc   :  { %v2054_v10 = vsel %vm1249_vm15, %v2040_v7, 0.0 }
 0x8bd   :  { %v2041_v59 = vld [vmem:[#allocation2 + $0x30] sm:$0xff]  ;;  %v2055_v19 = vadd.f32 %v2054_v10, %v2053_v58 }
 0x8be   :  { %v2056_v60 = vsel %vm1249_vm15, %v2041_v59, 0.0 }
 0x8bf   :  { %v2042_v24 = vld [vmem:[#allocation2 + $0x38] sm:$0xff]  ;;  %v2057_v61 = vadd.f32 %v2056_v60, %v2055_v19 }
 0x8c0   :  { %v2058_v62 = vsel %vm1249_vm15, %v2042_v24, 0.0 }
 0x8c1   :  { %v2059_v63 = vadd.f32 %v2058_v62, %v2057_v61 }
 0x8c3   :  { %v2060_v2 = vrot.slane %v2059_v63, 4 }
 0x8c5   :  { %v2061_v3 = vadd.f32 %v2060_v2, %v2059_v63 }
 0x8c7   :  { %v2062_v5 = vrot.slane %v2061_v3, 2 }
 0x8c9   :  { %v2063_v6 = vadd.f32 %v2062_v5, %v2061_v3 }
 0x8cb   :  { %v2064_v29 = vrot.slane %v2063_v6, 1 }
 0x8cd   :  { %v2065_v30 = vadd.f32 %v2064_v29, %v2063_v6 }
 0x8cf   :  { %v2066_v9 = vmul.f32 0.015625, %v2065_v30 }
 0x8d1   :  { %v2067_v11 = vsub.f32 %v2035_v16, %v2066_v9  ;;  %v2068_v12 = vsub.f32 %v2036_v15, %v2066_v9  ;;  %v2069_v13 = vsub.f32 %v2037_v18, %v2066_v9  ;;  %v2070_v22 = vsub.f32 %v2038_v21, %v2066_v9 }
 0x8d2   :  { %v2071_v26 = vsub.f32 %v2039_v56, %v2066_v9  ;;  %v2072_v32 = vsub.f32 %v2040_v7, %v2066_v9  ;;  %v2073_v38 = vsub.f32 %v2041_v59, %v2066_v9  ;;  %v2074_v42 = vsub.f32 %v2042_v24, %v2066_v9 }
 0x8d3   :  { %v2075_v27 = vmul.f32 %v2067_v11, %v2067_v11  ;;  %v2076_v28 = vmul.f32 %v2068_v12, %v2068_v12  ;;  %v2077_v31 = vmul.f32 %v2069_v13, %v2069_v13  ;;  %v2078_v33 = vmul.f32 %v2070_v22, %v2070_v22 }
 0x8d4   :  { %v2079_v39 = vmul.f32 %v2071_v26, %v2071_v26  ;;  %v2080_v43 = vmul.f32 %v2072_v32, %v2072_v32  ;;  %v2081_v46 = vmul.f32 %v2073_v38, %v2073_v38  ;;  %v2082_v49 = vmul.f32 %v2074_v42, %v2074_v42 }
 0x8d5   :  { %v2083_v34 = vsel %vm1249_vm15, %v2075_v27, 0.0  ;;  %v2084_v35 = vsel %vm1249_vm15, %v2076_v28, 0.0  ;;  %v2086_v40 = vsel %vm1249_vm15, %v2077_v31, 0.0  ;;  %v2088_v44 = vsel %vm1249_vm15, %v2078_v33, 0.0 }
 0x8d6   :  { %v2085_v37 = vadd.f32 %v2084_v35, %v2083_v34  ;;  %v2090_v47 = vsel %vm1249_vm15, %v2079_v39, 0.0  ;;  %v2092_v50 = vsel %vm1249_vm15, %v2080_v43, 0.0  ;;  %v2094_v1 = vsel %vm1249_vm15, %v2081_v46, 0.0  ;;  %v4297_v34 = vld [vmem:[%s6039_s12] sm:$0xff]  }
 0x8d7   :  { %v2096_v16 = vsel %vm1249_vm15, %v2082_v49, 0.0  ;;  %4159 = vmatprep.subr.bf16.mxu0 %v4297_v34 }
 0x8d8   :  { %v2087_v41 = vadd.f32 %v2086_v40, %v2085_v37  ;;  %4160 = vmatpush3.bf16.msra.mxu0 %v4297_v34 }
 0x8da   :  { %v2089_v45 = vadd.f32 %v2088_v44, %v2087_v41 }
 0x8dc   :  { %v2091_v48 = vadd.f32 %v2090_v47, %v2089_v45 }
 0x8de   :  { %v2093_v14 = vadd.f32 %v2092_v50, %v2091_v48 }
 0x8e0   :  { %v2095_v15 = vadd.f32 %v2094_v1, %v2093_v14 }
 0x8e2   :  { %v2097_v17 = vadd.f32 %v2096_v16, %v2095_v15 }
 0x8e4   :  { %v2098_v18 = vrot.slane %v2097_v17, 4 }
 0x8e6   :  { %v2099_v51 = vadd.f32 %v2098_v18, %v2097_v17 }
 0x8e8   :  { %v2100_v54 = vrot.slane %v2099_v51, 2 }
 0x8ea   :  { %v2101_v4 = vadd.f32 %v2100_v54, %v2099_v51 }
 0x8ec   :  { %v2102_v20 = vrot.slane %v2101_v4, 1 }
 0x8ee   :  { %v2103_v52 = vadd.f32 %v2102_v20, %v2101_v4 }
 0x8f0   :  { %v2104_v21 = vmul.f32 0.015625, %v2103_v52 }
 0x8f2   :  { %v2105_v53 = vadd.f32 1e-05, %v2104_v21 }
 0x8f4   :  { %4330 = vrsqrt.f32 %v2105_v53 }
 0x8fe   :  { %v4331_v55 = vpop.eup %4330 }
 0x8ff   :  { %v2107_v8 = vmul.f32 %v4331_v55, %v2043_v23 }
 0x901   :  { %v2111_v56 = vrot.slane %v2107_v8, %v5365_v36 }
 0x903   :  { %v2112_v57 = vmul.f32 %v2111_v56, %v2067_v11  ;;  %v2113_v7 = vmul.f32 %v2111_v56, %v2068_v12  ;;  %v2114_v58 = vmul.f32 %v2111_v56, %v2069_v13  ;;  %v2115_v10 = vmul.f32 %v2111_v56, %v2070_v22 }
 0x904   :  { %v2116_v59 = vmul.f32 %v2111_v56, %v2071_v26  ;;  %v2117_v19 = vmul.f32 %v2111_v56, %v2072_v32  ;;  %v2118_v3 = vmul.f32 %v2111_v56, %v2073_v38  ;;  %v2119_v5 = vmul.f32 %v2111_v56, %v2074_v42 }
 0x905   :  { %v2124_v60 = vadd.f32 %v3946_v25, %v2112_v57  ;;  %v2125_v24 = vadd.f32 %v3946_v25, %v2113_v7  ;;  %v2126_v61 = vadd.f32 %v3946_v25, %v2114_v58  ;;  %v2127_v62 = vadd.f32 %v3946_v25, %v2115_v10 }
 0x906   :  { %v2128_v63 = vadd.f32 %v3946_v25, %v2116_v59  ;;  %v2129_v2 = vadd.f32 %v3946_v25, %v2117_v19  ;;  %v2130_v13 = vadd.f32 %v3946_v25, %v2118_v3  ;;  %v2131_v22 = vadd.f32 %v3946_v25, %v2119_v5 }
 0x907   :  { %v2132_v6 = vmax.f32 %v2124_v60, 0.0  ;;  %v2133_v29 = vmax.f32 %v2125_v24, 0.0  ;;  %v2134_v30 = vmax.f32 %v2126_v61, 0.0  ;;  %v2135_v9 = vmax.f32 %v2127_v62, 0.0 }
 0x908   :  { %v2136_v27 = vmax.f32 %v2128_v63, 0.0  ;;  %v2137_v28 = vmax.f32 %v2129_v2, 0.0  ;;  %v2138_v31 = vmax.f32 %v2130_v13, 0.0  ;;  %v2139_v32 = vmax.f32 %v2131_v22, 0.0 }
 0x909   :  { %v2140_v11 = vpack.c.bf16 %v2133_v29, %v2132_v6  ;;  %v2141_v12 = vpack.c.bf16 %v2135_v9, %v2134_v30 }
 0x90a   :  { %v2142_v26 = vpack.c.bf16 %v2137_v28, %v2136_v27  ;;  %v2143_v33 = vpack.c.bf16 %v2139_v32, %v2138_v31 }
 0x90b   :  { %4151 = vmatprep.mubr.msk.bf16.mxu1 %vm1249_vm15, %v2140_v11 }
 0x90c   :  { %4152 = vmatmul.mubr.msk.bf16.vlgmr.msra.gmra.mrb[16].mxu1 %vm1249_vm15, %v2141_v12 }
 0x90d   :  { %4155 = vmatprep.mubr.msk.bf16.mxu1 %vm1249_vm15, %v2142_v26 }
 0x914   :  { %4156 = vmatmul.mubr.msk.bf16.gmra.mrb[20].mxu1 %vm1249_vm15, %v2143_v33 }
 0x9df   :  { %v4153_v35 = vpop.f32.mrb[16].mxu1 }
 0x9e0   :  { %v2205_v37 = vpop.f32.mrb[17].mxu1  ;;  %v2241_v43 = vsel %vm1634_vm1, %v4153_v35, 0.0 }
 0x9e1   :  { %v4154_v38 = vpop.f32.mrb[18].mxu1  ;;  %v2238_v40 = vsel %vm1634_vm1, %v2205_v37, 0.0 }
 0x9e2   :  { %v2208_v39 = vpop.f32.mrb[19].mxu1  ;;  %v2243_v45 = vsel %vm1634_vm1, %v4154_v38, 0.0 }
 0x9e3   :  { %v2239_v41 = vsel %vm1634_vm1, %v2208_v39, 0.0 }
 0x9e4   :  { %v2240_v42 = vadd.f32 %v2239_v41, %v2238_v40 }
 0x9e6   :  { %v2242_v44 = vadd.f32 %v2241_v43, %v2240_v42  ;;  %v2236_v43 = vld [vmem:[%s6093_s25] sm:$0x1] }
 0x9e7   :  { %v4157_v46 = vpop.f32.mrb[20].mxu1 }
 0x9e8   :  { %v2221_v47 = vpop.f32.mrb[21].mxu1  ;;  %v2244_v48 = vadd.f32 %v2243_v45, %v2242_v44  ;;  %v2249_v17 = vsel %vm1634_vm1, %v4157_v46, 0.0 }
 0x9e9   :  { %v2245_v49 = vsel %vm1634_vm1, %v2221_v47, 0.0  ;;  %v4158_v50 = vpop.f32.mrb[22].mxu1 }
 0x9ea   :  { %v2246_v14 = vadd.f32 %v2245_v49, %v2244_v48  ;;  %v2224_v1 = vpop.f32.mrb[23].mxu1  ;;  %v2251_v51 = vsel %vm1634_vm1, %v4158_v50, 0.0 }
 0x9eb   :  { %v2247_v15 = vsel %vm1634_vm1, %v2224_v1, 0.0 }
 0x9ec   :  { %v2248_v16 = vadd.f32 %v2247_v15, %v2246_v14 }
 0x9ee   :  { %v2250_v18 = vadd.f32 %v2249_v17, %v2248_v16 }
 0x9f0   :  { %v2252_v54 = vadd.f32 %v2251_v51, %v2250_v18  ;;  %v4298_v18 = vld [vmem:[%s6039_s12 + $0x8] sm:$0xff]  }
 0x9f1   :  { %4161 = vmatprep.subr.bf16.mxu0 %v4298_v18 }
 0x9f2   :  { %v2253_v4 = vrot.slane %v2252_v54, 4  ;;  %4162 = vmatpush3.bf16.msra.mxu0 %v4298_v18 }
 0x9f4   :  { %v2254_v20 = vadd.f32 %v2253_v4, %v2252_v54 }
 0x9f6   :  { %v2255_v52 = vrot.slane %v2254_v20, 2 }
 0x9f8   :  { %v2256_v21 = vadd.f32 %v2255_v52, %v2254_v20 }
 0x9fa   :  { %v2257_v53 = vrot.slane %v2256_v21, 1 }
 0x9fc   :  { %v2258_v23 = vadd.f32 %v2257_v53, %v2256_v21 }
 0x9fe   :  { %v2259_v55 = vmul.f32 0.015625, %v2258_v23 }
 0xa00   :  { %v2260_v8 = vsub.f32 %v2205_v37, %v2259_v55  ;;  %v2261_v56 = vsub.f32 %v2208_v39, %v2259_v55  ;;  %v2262_v25 = vsub.f32 %v4153_v35, %v2259_v55  ;;  %v2263_v57 = vsub.f32 %v4154_v38, %v2259_v55 }
 0xa01   :  { %v2264_v7 = vsub.f32 %v2221_v47, %v2259_v55  ;;  %v2265_v58 = vsub.f32 %v2224_v1, %v2259_v55  ;;  %v2266_v10 = vsub.f32 %v4157_v46, %v2259_v55  ;;  %v2267_v59 = vsub.f32 %v4158_v50, %v2259_v55  ;;  %v3953_v47 = vld [vmem:[%s6093_s25 + $0x1] ss:$0 sm:$0xff] }
 0xa02   :  { %v2268_v19 = vmul.f32 %v2260_v8, %v2260_v8  ;;  %v2269_v60 = vmul.f32 %v2261_v56, %v2261_v56  ;;  %v2270_v24 = vmul.f32 %v2262_v25, %v2262_v25  ;;  %v2271_v61 = vmul.f32 %v2263_v57, %v2263_v57 }
 0xa03   :  { %v2272_v3 = vmul.f32 %v2264_v7, %v2264_v7  ;;  %v2273_v29 = vmul.f32 %v2265_v58, %v2265_v58  ;;  %v2274_v27 = vmul.f32 %v2266_v10, %v2266_v10  ;;  %v2275_v12 = vmul.f32 %v2267_v59, %v2267_v59 }
 0xa04   :  { %v2276_v62 = vsel %vm1634_vm1, %v2268_v19, 0.0  ;;  %v2277_v63 = vsel %vm1634_vm1, %v2269_v60, 0.0  ;;  %v2279_v5 = vsel %vm1634_vm1, %v2270_v24, 0.0  ;;  %v2281_v30 = vsel %vm1634_vm1, %v2271_v61, 0.0  ;;  %v4300_v19 = vld [vmem:[%s6039_s12 + $0x18] sm:$0xff]  }
 0xa05   :  { %v2278_v2 = vadd.f32 %v2277_v63, %v2276_v62  ;;  %v2283_v28 = vsel %vm1634_vm1, %v2272_v3, 0.0  ;;  %v2285_v13 = vsel %vm1634_vm1, %v2273_v29, 0.0  ;;  %v2287_v26 = vsel %vm1634_vm1, %v2274_v27, 0.0  ;;  %v4301_v29 = vld [vmem:[%s6039_s12 + $0x20] sm:$0xff]   ;;  %v4302_v27 = vld [vmem:[%s6039_s12 + $0x28] sm:$0xff]  }
 0xa06   :  { %v2289_v32 = vsel %vm1634_vm1, %v2275_v12, 0.0 }
 0xa07   :  { %v2280_v6 = vadd.f32 %v2279_v5, %v2278_v2 }
 0xa09   :  { %v2282_v9 = vadd.f32 %v2281_v30, %v2280_v6 }
 0xa0b   :  { %v2284_v11 = vadd.f32 %v2283_v28, %v2282_v9 }
 0xa0d   :  { %v2286_v22 = vadd.f32 %v2285_v13, %v2284_v11 }
 0xa0f   :  { %v2288_v31 = vadd.f32 %v2287_v26, %v2286_v22 }
 0xa11   :  { %v2290_v33 = vadd.f32 %v2289_v32, %v2288_v31 }
 0xa13   :  { %v2291_v34 = vrot.slane %v2290_v33, 4 }
 0xa15   :  { %v2292_v35 = vadd.f32 %v2291_v34, %v2290_v33 }
 0xa17   :  { %v2293_v37 = vrot.slane %v2292_v35, 2 }
 0xa19   :  { %v2294_v38 = vadd.f32 %v2293_v37, %v2292_v35 }
 0xa1b   :  { %v2295_v39 = vrot.slane %v2294_v38, 1 }
 0xa1d   :  { %v2296_v40 = vadd.f32 %v2295_v39, %v2294_v38 }
 0xa1f   :  { %v2297_v41 = vmul.f32 0.015625, %v2296_v40 }
 0xa21   :  { %v2298_v42 = vadd.f32 1e-05, %v2297_v41 }
 0xa23   :  { %4332 = vrsqrt.f32 %v2298_v42 }
 0xa2d   :  { %v4333_v44 = vpop.eup %4332 }
 0xa2e   :  { %v2300_v45 = vmul.f32 %v4333_v44, %v2236_v43 }
 0xa30   :  { %v2304_v46 = vrot.slane %v2300_v45, %v5365_v36 }
 0xa32   :  { %v2305_v48 = vmul.f32 %v2304_v46, %v2260_v8  ;;  %v2306_v49 = vmul.f32 %v2304_v46, %v2261_v56  ;;  %v2307_v50 = vmul.f32 %v2304_v46, %v2262_v25  ;;  %v2308_v14 = vmul.f32 %v2304_v46, %v2263_v57 }
 0xa33   :  { %v2309_v1 = vmul.f32 %v2304_v46, %v2264_v7  ;;  %v2310_v15 = vmul.f32 %v2304_v46, %v2265_v58  ;;  %v2311_v16 = vmul.f32 %v2304_v46, %v2266_v10  ;;  %v2312_v17 = vmul.f32 %v2304_v46, %v2267_v59  ;;  %v4299_v59 = vld [vmem:[%s6039_s12 + $0x10] sm:$0xff]   ;;  %s4694_s12 = smov 24  }
 0xa34   :  { %v2317_v51 = vadd.f32 %v3953_v47, %v2305_v48  ;;  %v2318_v54 = vadd.f32 %v3953_v47, %v2306_v49  ;;  %v2319_v4 = vadd.f32 %v3953_v47, %v2307_v50  ;;  %v2320_v20 = vadd.f32 %v3953_v47, %v2308_v14  ;;  %4163 = vmatprep.subr.bf16.mxu0 %v4299_v59 }
 0xa35   :  { %v2321_v52 = vadd.f32 %v3953_v47, %v2309_v1  ;;  %v2322_v21 = vadd.f32 %v3953_v47, %v2310_v15  ;;  %v2323_v53 = vadd.f32 %v3953_v47, %v2311_v16  ;;  %v2324_v23 = vadd.f32 %v3953_v47, %v2312_v17  ;;  %4164 = vmatpush3.bf16.msra.mxu0 %v4299_v59 }
 0xa36   :  { %v2325_v55 = vmax.f32 %v2317_v51, 0.0  ;;  %v2326_v8 = vmax.f32 %v2318_v54, 0.0  ;;  %v2327_v56 = vmax.f32 %v2319_v4, 0.0  ;;  %v2328_v25 = vmax.f32 %v2320_v20, 0.0  ;;  %4165 = vmatprep.subr.bf16.mxu0 %v4300_v19 }
 0xa37   :  { %v2329_v57 = vmax.f32 %v2321_v52, 0.0  ;;  %v2330_v7 = vmax.f32 %v2322_v21, 0.0  ;;  %v2331_v58 = vmax.f32 %v2323_v53, 0.0  ;;  %v2332_v10 = vmax.f32 %v2324_v23, 0.0 }
 0xa38   :  { %2337 = vst.msk [vmem:[#allocation3 + $0x8] sm:$0xff] %vm1634_vm1, %v2325_v55  ;;  %2338 = vst.msk [vmem:[#allocation3 + $0x10] sm:$0xff] %vm1634_vm1, %v2326_v8 }
 0xa39   :  { %2339 = vst.msk [vmem:[#allocation3 + $0x18] sm:$0xff] %vm1634_vm1, %v2327_v56  ;;  %2340 = vst.msk [vmem:[#allocation3 + $0x20] sm:$0xff] %vm1634_vm1, %v2328_v25  ;;  %4166 = vmatpush3.bf16.msra.mxu0 %v4300_v19 }
 0xa3a   :  { %2341 = vst.msk [vmem:[#allocation3 + $0x58] sm:$0xff] %vm1634_vm1, %v2329_v57  ;;  %2342 = vst.msk [vmem:[#allocation3 + $0x60] sm:$0xff] %vm1634_vm1, %v2330_v7  ;;  %4167 = vmatprep.subr.bf16.mxu0 %v4301_v29 }
 0xa3b   :  { %2343 = vst.msk [vmem:[#allocation3 + $0x68] sm:$0xff] %vm1634_vm1, %v2331_v58  ;;  %2344 = vst.msk [vmem:[#allocation3 + $0x70] sm:$0xff] %vm1634_vm1, %v2332_v10  ;;  %v4303_v58 = vld [vmem:[#allocation19] sm:$0xff]   ;;  %v4304_v10 = vld [vmem:[#allocation19 + $0x8] sm:$0xff]  }
 0xa3c   :  { %4179 = vmatprep.subr.bf16.mxu1 %v4303_v58 }
 0xa3d   :  { %4168 = vmatpush3.bf16.msra.mxu0 %v4301_v29  ;;  %4180 = vmatpush3.bf16.msra.mxu1 %v4303_v58 }
 0xa3e   :  { %4169 = vmatprep.subr.bf16.mxu0 %v4302_v27  ;;  %4181 = vmatprep.subr.bf16.mxu1 %v4304_v10 }
 0xa3f   :  { %v2362_v60 = vld [vmem:[#allocation3 + $0x10] sm:$0xff]  ;;  %v2361_v24 = vld [vmem:[#allocation3 + $0x8] sm:$0xff] }
 0xa40   :  { %2379 = vrot.lane.b32.xlu1 %v2362_v60, %s4693_s2  ;;  %2377 = vrot.lane.b32.xlu0 %v2361_v24, %s4693_s2  ;;  %v2364_v61 = vld [vmem:[#allocation3 + $0x20] sm:$0xff]  ;;  %v2363_v62 = vld [vmem:[#allocation3 + $0x18] sm:$0xff]  ;;  %v2346_v63 = vld [vmem:[#allocation3 + $0xf] sm:$0xff] }
 0xa41   :  { %v2345_v2 = vld [vmem:[#allocation3 + $0x7] sm:$0xff]  ;;  %v2410_v3 = vld [vmem:[#allocation3 + $0x11] sm:$0xff]  ;;  %2354 = vst.msk [vmem:[#allocation4 + $0x8] sm:$0xff] %vm1634_vm1, %v2346_v63  ;;  %v2348_v5 = vld [vmem:[#allocation3 + $0x1f] sm:$0xff]  ;;  %4170 = vmatpush3.bf16.msra.mxu0 %v4302_v27  ;;  %4182 = vmatpush3.bf16.msra.mxu1 %v4304_v10 }
 0xa42   :  { %2353 = vst.msk [vmem:[#allocation4] sm:$0xff] %vm1634_vm1, %v2345_v2  ;;  %v2347_v6 = vld [vmem:[#allocation3 + $0x17] sm:$0xff]  ;;  %2356 = vst.msk [vmem:[#allocation4 + $0x18] sm:$0xff] %vm1634_vm1, %v2348_v5  ;;  %v2350_v30 = vld [vmem:[#allocation3 + $0x5f] sm:$0xff] }
 0xa43   :  { %2355 = vst.msk [vmem:[#allocation4 + $0x10] sm:$0xff] %vm1634_vm1, %v2347_v6  ;;  %v2349_v9 = vld [vmem:[#allocation3 + $0x57] sm:$0xff]  ;;  %v2409_v28 = vld [vmem:[#allocation3 + $0x9] sm:$0xff]  ;;  %2358 = vst.msk [vmem:[#allocation4 + $0x48] sm:$0xff] %vm1634_vm1, %v2350_v30 }
 0xa44   :  { %2383 = vrot.lane.b32.xlu1 %v2364_v61, %s4693_s2  ;;  %2381 = vrot.lane.b32.xlu0 %v2363_v62, %s4693_s2  ;;  %2357 = vst.msk [vmem:[#allocation4 + $0x40] sm:$0xff] %vm1634_vm1, %v2349_v9  ;;  %v2352_v11 = vld [vmem:[#allocation3 + $0x6f] sm:$0xff]  ;;  %v2351_v12 = vld [vmem:[#allocation3 + $0x67] sm:$0xff]  ;;  %v2411_v22 = vld [vmem:[#allocation3 + $0x19] sm:$0xff] }
 0xa45   :  { %2360 = vst.msk [vmem:[#allocation4 + $0x58] sm:$0xff] %vm1634_vm1, %v2352_v11  ;;  %2359 = vst.msk [vmem:[#allocation4 + $0x50] sm:$0xff] %vm1634_vm1, %v2351_v12  ;;  %v2412_v13 = vld [vmem:[#allocation3 + $0x21] sm:$0xff]  ;;  %v2365_v31 = vld [vmem:[#allocation3 + $0x58] sm:$0xff] }
 0xa46   :  { %v2366_v26 = vld [vmem:[#allocation3 + $0x60] sm:$0xff]  ;;  %v2368_v32 = vld [vmem:[#allocation3 + $0x70] sm:$0xff]  ;;  %v2367_v33 = vld [vmem:[#allocation3 + $0x68] sm:$0xff] }
 0xa47   :  { %v2414_v34 = vld [vmem:[#allocation3 + $0x61] sm:$0xff]  ;;  %v2413_v35 = vld [vmem:[#allocation3 + $0x59] sm:$0xff]  ;;  %v2416_v37 = vld [vmem:[#allocation3 + $0x71] sm:$0xff] }
 0xa48   :  { %2427 = vrot.lane.b32.xlu1 %v2410_v3, %s4674_s9  ;;  %2425 = vrot.lane.b32.xlu0 %v2409_v28, %s4674_s9  ;;  %v2415_v38 = vld [vmem:[#allocation3 + $0x69] sm:$0xff] }
 0xa4c   :  { %2431 = vrot.lane.b32.xlu1 %v2412_v13, %s4674_s9  ;;  %2429 = vrot.lane.b32.xlu0 %v2411_v22, %s4674_s9 }
 0xa50   :  { %2387 = vrot.lane.b32.xlu1 %v2366_v26, %s4693_s2  ;;  %2385 = vrot.lane.b32.xlu0 %v2365_v31, %s4693_s2 }
 0xa54   :  { %2391 = vrot.lane.b32.xlu1 %v2368_v32, %s4693_s2  ;;  %2389 = vrot.lane.b32.xlu0 %v2367_v33, %s4693_s2 }
 0xa58   :  { %2435 = vrot.lane.b32.xlu1 %v2414_v34, %s4674_s9  ;;  %2433 = vrot.lane.b32.xlu0 %v2413_v35, %s4674_s9 }
 0xa5c   :  { %2439 = vrot.lane.b32.xlu1 %v2416_v37, %s4674_s9  ;;  %2437 = vrot.lane.b32.xlu0 %v2415_v38, %s4674_s9 }
 0xab2   :  { %v2380_v39 = vpop.permute.xlu1 %2379  ;;  %v2378_v40 = vpop.permute.xlu0 %2377 }
 0xab3   :  { %2402 = vst.msk [vmem:[#allocation4 + $0x8] sm:$0xff] %vm1799_vm2, %v2380_v39  ;;  %2401 = vst.msk [vmem:[#allocation4] sm:$0xff] %vm1799_vm2, %v2378_v40 }
 0xab6   :  { %v2384_v41 = vpop.permute.xlu1 %2383  ;;  %v2382_v42 = vpop.permute.xlu0 %2381 }
 0xab7   :  { %2404 = vst.msk [vmem:[#allocation4 + $0x18] sm:$0xff] %vm1799_vm2, %v2384_v41  ;;  %2403 = vst.msk [vmem:[#allocation4 + $0x10] sm:$0xff] %vm1799_vm2, %v2382_v42 }
 0xaba   :  { %v2428_v43 = vpop.permute.xlu1 %2427  ;;  %v2426_v44 = vpop.permute.xlu0 %2425 }
 0xabb   :  { %2450 = vst.msk [vmem:[#allocation4 + $0x8] sm:$0xff] %vm1848_vm3, %v2428_v43  ;;  %2449 = vst.msk [vmem:[#allocation4] sm:$0xff] %vm1848_vm3, %v2426_v44 }
 0xabe   :  { %v2432_v45 = vpop.permute.xlu1 %2431  ;;  %v2430_v46 = vpop.permute.xlu0 %2429 }
 0xabf   :  { %2452 = vst.msk [vmem:[#allocation4 + $0x18] sm:$0xff] %vm1848_vm3, %v2432_v45  ;;  %2451 = vst.msk [vmem:[#allocation4 + $0x10] sm:$0xff] %vm1848_vm3, %v2430_v46 }
 0xac2   :  { %v2388_v47 = vpop.permute.xlu1 %2387  ;;  %v2386_v48 = vpop.permute.xlu0 %2385  ;;  %v2457_v49 = vld [vmem:[#allocation4] sm:$0xff]  ;;  %v2458_v50 = vld [vmem:[#allocation4 + $0x8] sm:$0xff] }
 0xac3   :  { %2406 = vst.msk [vmem:[#allocation4 + $0x48] sm:$0xff] %vm1799_vm2, %v2388_v47  ;;  %2405 = vst.msk [vmem:[#allocation4 + $0x40] sm:$0xff] %vm1799_vm2, %v2386_v48  ;;  %v2465_v14 = vpack.c.bf16 %v2458_v50, %v2457_v49 }
 0xac5   :  { %4171 = vmatprep.mubr.msk.bf16.mxu0 %vm1917_vm4, %v2465_v14 }
 0xac6   :  { %v2392_v1 = vpop.permute.xlu1 %2391  ;;  %v2390_v15 = vpop.permute.xlu0 %2389  ;;  %v2459_v16 = vld [vmem:[#allocation4 + $0x10] sm:$0xff]  ;;  %v2460_v17 = vld [vmem:[#allocation4 + $0x18] sm:$0xff] }
 0xac7   :  { %2408 = vst.msk [vmem:[#allocation4 + $0x58] sm:$0xff] %vm1799_vm2, %v2392_v1  ;;  %2407 = vst.msk [vmem:[#allocation4 + $0x50] sm:$0xff] %vm1799_vm2, %v2390_v15  ;;  %v2466_v18 = vpack.c.bf16 %v2460_v17, %v2459_v16 }
 0xac9   :  { %4172 = vmatmul.mubr.msk.bf16.vlgmr.msra.gmra.mrb[24].mxu0 %vm1917_vm4, %v2466_v18 }
 0xaca   :  { %v2436_v51 = vpop.permute.xlu1 %2435  ;;  %v2434_v54 = vpop.permute.xlu0 %2433 }
 0xacb   :  { %2454 = vst.msk [vmem:[#allocation4 + $0x48] sm:$0xff] %vm1848_vm3, %v2436_v51  ;;  %2453 = vst.msk [vmem:[#allocation4 + $0x40] sm:$0xff] %vm1848_vm3, %v2434_v54 }
 0xace   :  { %v2440_v4 = vpop.permute.xlu1 %2439  ;;  %v2438_v20 = vpop.permute.xlu0 %2437 }
 0xacf   :  { %2456 = vst.msk [vmem:[#allocation4 + $0x58] sm:$0xff] %vm1848_vm3, %v2440_v4  ;;  %2455 = vst.msk [vmem:[#allocation4 + $0x50] sm:$0xff] %vm1848_vm3, %v2438_v20 }
 0xad2   :  { %v2461_v52 = vld [vmem:[#allocation4 + $0x40] sm:$0xff]  ;;  %v2462_v21 = vld [vmem:[#allocation4 + $0x48] sm:$0xff] }
 0xad3   :  { %v2467_v53 = vpack.c.bf16 %v2462_v21, %v2461_v52 }
 0xad5   :  { %4175 = vmatprep.mubr.msk.bf16.mxu0 %vm1917_vm4, %v2467_v53 }
 0xad6   :  { %v2463_v23 = vld [vmem:[#allocation4 + $0x50] sm:$0xff]  ;;  %v2464_v55 = vld [vmem:[#allocation4 + $0x58] sm:$0xff] }
 0xad7   :  { %v2468_v8 = vpack.c.bf16 %v2464_v55, %v2463_v23 }
 0xad9   :  { %4176 = vmatmul.mubr.msk.bf16.gmra.mrb[28].mxu0 %vm1917_vm4, %v2468_v8 }
 0xb9c   :  { %v4173_v56 = vpop.f32.mrb[24].mxu0 }
 0xb9d   :  { %v2563_v25 = vpop.f32.mrb[25].mxu0 }
 0xb9e   :  { %2602 = vrot.lane.b32.xlu0 %v2563_v25, %s4694_s12  ;;  %v4174_v57 = vpop.f32.mrb[26].mxu0 }
 0xb9f   :  { %v2566_v7 = vpop.f32.mrb[27].mxu0 }
 0xba0   :  { %2604 = vrot.lane.b32.xlu1 %v2566_v7, %s4694_s12 }
 0xba2   :  { %2606 = vrot.lane.b32.xlu0 %v4173_v56, %s4694_s12 }
 0xba4   :  { %2608 = vrot.lane.b32.xlu1 %v4174_v57, %s4694_s12 }
 0xbac   :  { %v4177_v59 = vpop.f32.mrb[28].mxu0 }
 0xbad   :  { %v2579_v19 = vpop.f32.mrb[29].mxu0 }
 0xbae   :  { %2610 = vrot.lane.b32.xlu0 %v2579_v19, %s4694_s12  ;;  %v4178_v60 = vpop.f32.mrb[30].mxu0 }
 0xbaf   :  { %v2582_v24 = vpop.f32.mrb[31].mxu0 }
 0xbb0   :  { %2612 = vrot.lane.b32.xlu1 %v2582_v24, %s4694_s12 }
 0xbb2   :  { %2614 = vrot.lane.b32.xlu0 %v4177_v59, %s4694_s12 }
 0xbb4   :  { %2616 = vrot.lane.b32.xlu1 %v4178_v60, %s4694_s12 }
 0xc10   :  { %v2603_v61 = vpop.permute.xlu0 %2602 }
 0xc11   :  { %2627 = vst.msk [vmem:[#allocation2] sm:$0xff] %vm2626_vm5, %v2603_v61 }
 0xc12   :  { %v2605_v62 = vpop.permute.xlu1 %2604 }
 0xc13   :  { %2628 = vst.msk [vmem:[#allocation2 + $0x8] sm:$0xff] %vm2626_vm5, %v2605_v62 }
 0xc14   :  { %v2607_v63 = vpop.permute.xlu0 %2606 }
 0xc15   :  { %2629 = vst.msk [vmem:[#allocation2 + $0x10] sm:$0xff] %vm2626_vm5, %v2607_v63 }
 0xc16   :  { %v2609_v2 = vpop.permute.xlu1 %2608 }
 0xc17   :  { %2630 = vst.msk [vmem:[#allocation2 + $0x18] sm:$0xff] %vm2626_vm5, %v2609_v2 }
 0xc18   :  { %v2635_v5 = vld [vmem:[#allocation2] sm:$0xff] }
 0xc19   :  { %v2645_v30 = vsel %vm1634_vm1, %v2635_v5, 0.0 }
 0xc1a   :  { %v2636_v3 = vld [vmem:[#allocation2 + $0x8] sm:$0xff] }
 0xc1b   :  { %v2646_v6 = vsel %vm1634_vm1, %v2636_v3, 0.0 }
 0xc1c   :  { %v2637_v29 = vld [vmem:[#allocation2 + $0x10] sm:$0xff]  ;;  %v2647_v27 = vadd.f32 %v2646_v6, %v2645_v30 }
 0xc1d   :  { %v2648_v28 = vsel %vm1634_vm1, %v2637_v29, 0.0 }
 0xc1e   :  { %v2638_v12 = vld [vmem:[#allocation2 + $0x18] sm:$0xff]  ;;  %v2649_v22 = vadd.f32 %v2648_v28, %v2647_v27 }
 0xc1f   :  { %v2650_v26 = vsel %vm1634_vm1, %v2638_v12, 0.0 }
 0xc20   :  { %v2611_v9 = vpop.permute.xlu0 %2610  ;;  %v2651_v33 = vadd.f32 %v2650_v26, %v2649_v22  ;;  %v2643_v22 = vld [vmem:[%s6040_s13] sm:$0x1] }
 0xc21   :  { %2631 = vst.msk [vmem:[#allocation2 + $0x20] sm:$0xff] %vm2626_vm5, %v2611_v9 }
 0xc22   :  { %v2613_v11 = vpop.permute.xlu1 %2612 }
 0xc23   :  { %2632 = vst.msk [vmem:[#allocation2 + $0x28] sm:$0xff] %vm2626_vm5, %v2613_v11 }
 0xc24   :  { %v2615_v13 = vpop.permute.xlu0 %2614 }
 0xc25   :  { %2633 = vst.msk [vmem:[#allocation2 + $0x30] sm:$0xff] %vm2626_vm5, %v2615_v13 }
 0xc26   :  { %v2617_v31 = vpop.permute.xlu1 %2616 }
 0xc27   :  { %2634 = vst.msk [vmem:[#allocation2 + $0x38] sm:$0xff] %vm2626_vm5, %v2617_v31 }
 0xc28   :  { %v2639_v32 = vld [vmem:[#allocation2 + $0x20] sm:$0xff] }
 0xc29   :  { %v2652_v34 = vsel %vm1634_vm1, %v2639_v32, 0.0 }
 0xc2a   :  { %v2640_v35 = vld [vmem:[#allocation2 + $0x28] sm:$0xff]  ;;  %v2653_v37 = vadd.f32 %v2652_v34, %v2651_v33  ;;  %v3964_v33 = vld [vmem:[%s6040_s13 + $0x1] ss:$0 sm:$0xff] }
 0xc2b   :  { %v2654_v38 = vsel %vm1634_vm1, %v2640_v35, 0.0 }
 0xc2c   :  { %v2641_v39 = vld [vmem:[#allocation2 + $0x30] sm:$0xff]  ;;  %v2655_v40 = vadd.f32 %v2654_v38, %v2653_v37 }
 0xc2d   :  { %v2656_v41 = vsel %vm1634_vm1, %v2641_v39, 0.0 }
 0xc2e   :  { %v2642_v42 = vld [vmem:[#allocation2 + $0x38] sm:$0xff]  ;;  %v2657_v43 = vadd.f32 %v2656_v41, %v2655_v40 }
 0xc2f   :  { %v2658_v44 = vsel %vm1634_vm1, %v2642_v42, 0.0 }
 0xc30   :  { %v2659_v45 = vadd.f32 %v2658_v44, %v2657_v43 }
 0xc32   :  { %v2660_v46 = vrot.slane %v2659_v45, 4 }
 0xc34   :  { %v2661_v47 = vadd.f32 %v2660_v46, %v2659_v45 }
 0xc36   :  { %v2662_v48 = vrot.slane %v2661_v47, 2 }
 0xc38   :  { %v2663_v49 = vadd.f32 %v2662_v48, %v2661_v47 }
 0xc3a   :  { %v2664_v50 = vrot.slane %v2663_v49, 1 }
 0xc3c   :  { %v2665_v14 = vadd.f32 %v2664_v50, %v2663_v49 }
 0xc3e   :  { %v2666_v1 = vmul.f32 0.015625, %v2665_v14 }
 0xc40   :  { %v2667_v15 = vsub.f32 %v2635_v5, %v2666_v1  ;;  %v2668_v16 = vsub.f32 %v2636_v3, %v2666_v1  ;;  %v2669_v17 = vsub.f32 %v2637_v29, %v2666_v1  ;;  %v2670_v18 = vsub.f32 %v2638_v12, %v2666_v1 }
 0xc41   :  { %v2671_v51 = vsub.f32 %v2639_v32, %v2666_v1  ;;  %v2672_v52 = vsub.f32 %v2640_v35, %v2666_v1  ;;  %v2673_v8 = vsub.f32 %v2641_v39, %v2666_v1  ;;  %v2674_v7 = vsub.f32 %v2642_v42, %v2666_v1 }
 0xc42   :  { %v2675_v54 = vmul.f32 %v2667_v15, %v2667_v15  ;;  %v2676_v4 = vmul.f32 %v2668_v16, %v2668_v16  ;;  %v2677_v20 = vmul.f32 %v2669_v17, %v2669_v17  ;;  %v2678_v21 = vmul.f32 %v2670_v18, %v2670_v18 }
 0xc43   :  { %v2679_v56 = vmul.f32 %v2671_v51, %v2671_v51  ;;  %v2680_v58 = vmul.f32 %v2672_v52, %v2672_v52  ;;  %v2681_v19 = vmul.f32 %v2673_v8, %v2673_v8  ;;  %v2682_v61 = vmul.f32 %v2674_v7, %v2674_v7 }
 0xc44   :  { %v2683_v53 = vsel %vm1634_vm1, %v2675_v54, 0.0  ;;  %v2684_v23 = vsel %vm1634_vm1, %v2676_v4, 0.0  ;;  %v2686_v25 = vsel %vm1634_vm1, %v2677_v20, 0.0  ;;  %v2688_v10 = vsel %vm1634_vm1, %v2678_v21, 0.0 }
 0xc45   :  { %v2685_v55 = vadd.f32 %v2684_v23, %v2683_v53  ;;  %v2690_v60 = vsel %vm1634_vm1, %v2679_v56, 0.0  ;;  %v2692_v62 = vsel %vm1634_vm1, %v2680_v58, 0.0  ;;  %v2694_v2 = vsel %vm1634_vm1, %v2681_v19, 0.0  ;;  %v4305_v53 = vld [vmem:[%s6043_s16] sm:$0xff]  }
 0xc46   :  { %v2696_v5 = vsel %vm1634_vm1, %v2682_v61, 0.0  ;;  %4191 = vmatprep.subr.bf16.mxu1 %v4305_v53 }
 0xc47   :  { %v2687_v57 = vadd.f32 %v2686_v25, %v2685_v55 }
 0xc49   :  { %v2689_v59 = vadd.f32 %v2688_v10, %v2687_v57 }
 0xc4b   :  { %v2691_v24 = vadd.f32 %v2690_v60, %v2689_v59 }
 0xc4d   :  { %v2693_v63 = vadd.f32 %v2692_v62, %v2691_v24 }
 0xc4f   :  { %v2695_v3 = vadd.f32 %v2694_v2, %v2693_v63 }
 0xc51   :  { %v2697_v6 = vadd.f32 %v2696_v5, %v2695_v3 }
 0xc53   :  { %v2698_v29 = vrot.slane %v2697_v6, 4 }
 0xc55   :  { %v2699_v30 = vadd.f32 %v2698_v29, %v2697_v6 }
 0xc57   :  { %v2700_v9 = vrot.slane %v2699_v30, 2 }
 0xc59   :  { %v2701_v27 = vadd.f32 %v2700_v9, %v2699_v30 }
 0xc5b   :  { %v2702_v28 = vrot.slane %v2701_v27, 1 }
 0xc5d   :  { %v2703_v11 = vadd.f32 %v2702_v28, %v2701_v27 }
 0xc5f   :  { %v2704_v12 = vmul.f32 0.015625, %v2703_v11 }
 0xc61   :  { %v2705_v13 = vadd.f32 1e-05, %v2704_v12 }
 0xc63   :  { %4334 = vrsqrt.f32 %v2705_v13 }
 0xc6d   :  { %v4335_v26 = vpop.eup %4334 }
 0xc6e   :  { %v2707_v31 = vmul.f32 %v4335_v26, %v2643_v22 }
 0xc70   :  { %v2711_v32 = vrot.slane %v2707_v31, %v5365_v36 }
 0xc72   :  { %v2712_v34 = vmul.f32 %v2711_v32, %v2667_v15  ;;  %v2713_v35 = vmul.f32 %v2711_v32, %v2668_v16  ;;  %v2714_v37 = vmul.f32 %v2711_v32, %v2669_v17  ;;  %v2715_v38 = vmul.f32 %v2711_v32, %v2670_v18 }
 0xc73   :  { %v2716_v39 = vmul.f32 %v2711_v32, %v2671_v51  ;;  %v2717_v40 = vmul.f32 %v2711_v32, %v2672_v52  ;;  %v2718_v47 = vmul.f32 %v2711_v32, %v2673_v8  ;;  %v2719_v48 = vmul.f32 %v2711_v32, %v2674_v7 }
 0xc74   :  { %v2724_v41 = vadd.f32 %v3964_v33, %v2712_v34  ;;  %v2725_v42 = vadd.f32 %v3964_v33, %v2713_v35  ;;  %v2726_v43 = vadd.f32 %v3964_v33, %v2714_v37  ;;  %v2727_v44 = vadd.f32 %v3964_v33, %v2715_v38 }
 0xc75   :  { %v2728_v45 = vadd.f32 %v3964_v33, %v2716_v39  ;;  %v2729_v46 = vadd.f32 %v3964_v33, %v2717_v40  ;;  %v2730_v17 = vadd.f32 %v3964_v33, %v2718_v47  ;;  %v2731_v18 = vadd.f32 %v3964_v33, %v2719_v48 }
 0xc76   :  { %v2732_v49 = vmax.f32 %v2724_v41, 0.0  ;;  %v2733_v50 = vmax.f32 %v2725_v42, 0.0  ;;  %v2734_v14 = vmax.f32 %v2726_v43, 0.0  ;;  %v2735_v1 = vmax.f32 %v2727_v44, 0.0 }
 0xc77   :  { %v2736_v54 = vmax.f32 %v2728_v45, 0.0  ;;  %v2737_v4 = vmax.f32 %v2729_v46, 0.0  ;;  %v2738_v20 = vmax.f32 %v2730_v17, 0.0  ;;  %v2739_v52 = vmax.f32 %v2731_v18, 0.0 }
 0xc78   :  { %v2740_v15 = vpack.c.bf16 %v2733_v50, %v2732_v49  ;;  %v2741_v16 = vpack.c.bf16 %v2735_v1, %v2734_v14 }
 0xc79   :  { %v2742_v51 = vpack.c.bf16 %v2737_v4, %v2736_v54  ;;  %v2743_v21 = vpack.c.bf16 %v2739_v52, %v2738_v20 }
 0xc7a   :  { %4183 = vmatprep.mubr.msk.bf16.mxu1 %vm1634_vm1, %v2740_v15 }
 0xc7b   :  { %4184 = vmatmul.mubr.msk.bf16.vlgmr.msra.gmra.mrb[24].mxu1 %vm1634_vm1, %v2741_v16 }
 0xc7c   :  { %4187 = vmatprep.mubr.msk.bf16.mxu1 %vm1634_vm1, %v2742_v51  ;;  %4192 = vmatpush3.bf16.msra.mxu1 %v4305_v53  ;;  %v2865_v53 = vld [vmem:[#allocation20] sm:$0x1] }
 0xc83   :  { %4188 = vmatmul.mubr.msk.bf16.gmra.mrb[28].mxu1 %vm1634_vm1, %v2743_v21 }
 0xd4e   :  { %v4185_v23 = vpop.f32.mrb[24].mxu1 }
 0xd4f   :  { %2839 = vst.msk [vmem:[#allocation3 + $0x10] sm:$0xff] %vm1333_vm0, %v4185_v23  ;;  %v2806_v55 = vpop.f32.mrb[25].mxu1 }
 0xd50   :  { %2837 = vst.msk [vmem:[#allocation3] sm:$0xff] %vm1333_vm0, %v2806_v55  ;;  %v4186_v8 = vpop.f32.mrb[26].mxu1 }
 0xd51   :  { %2840 = vst.msk [vmem:[#allocation3 + $0x18] sm:$0xff] %vm1333_vm0, %v4186_v8  ;;  %v2809_v56 = vpop.f32.mrb[27].mxu1 }
 0xd52   :  { %2838 = vst.msk [vmem:[#allocation3 + $0x8] sm:$0xff] %vm1333_vm0, %v2809_v56  ;;  %v3971_v56 = vld [vmem:[#allocation20 + $0x1] ss:$0 sm:$0xff] }
 0xd56   :  { %v4189_v25 = vpop.f32.mrb[28].mxu1 }
 0xd57   :  { %2843 = vst.msk [vmem:[#allocation3 + $0x60] sm:$0xff] %vm1333_vm0, %v4189_v25  ;;  %v2822_v57 = vpop.f32.mrb[29].mxu1 }
 0xd58   :  { %2841 = vst.msk [vmem:[#allocation3 + $0x50] sm:$0xff] %vm1333_vm0, %v2822_v57  ;;  %v4190_v7 = vpop.f32.mrb[30].mxu1  ;;  %v2846_v58 = vld [vmem:[#allocation3 + $0x10] ss:$2 sm:$0xff]  ;;  %v2850_v10 = vld [vmem:[#allocation3 + $0x11] ss:$2 sm:$0xff] }
 0xd59   :  { %2844 = vst.msk [vmem:[#allocation3 + $0x68] sm:$0xff] %vm1333_vm0, %v4190_v7  ;;  %v2825_v59 = vpop.f32.mrb[31].mxu1  ;;  %v2845_v19 = vld [vmem:[#allocation3] ss:$2 sm:$0xff]  ;;  %v2849_v60 = vld [vmem:[#allocation3 + $0x1] ss:$2 sm:$0xff]  ;;  %v2854_v24 = vmax.f32 %v2846_v58, %v2850_v10 }
 0xd5a   :  { %2842 = vst.msk [vmem:[#allocation3 + $0x58] sm:$0xff] %vm1333_vm0, %v2825_v59  ;;  %v2853_v61 = vmax.f32 %v2845_v19, %v2849_v60 }
 0xd5b   :  { %3053 = vst.msk [vmem:[#allocation3] sm:$0xff] %vm1634_vm1, %v4687_v0 }
 0xd5c   :  { %2858 = vst.msk [vmem:[#allocation2 + $0x8] sm:$0xff] %vm1333_vm0, %v2854_v24  ;;  %2857 = vst.msk [vmem:[#allocation2] sm:$0xff] %vm1333_vm0, %v2853_v61 }
 0xd5d   :  { %3056 = vst.msk [vmem:[#allocation3 + $0x18] sm:$0x3] %vm3055_vm6, %v4687_v0 }
 0xd60   :  { %v2848_v62 = vld [vmem:[#allocation3 + $0x60] ss:$2 sm:$0xff]  ;;  %v2852_v63 = vld [vmem:[#allocation3 + $0x61] ss:$2 sm:$0xff] }
 0xd61   :  { %v2847_v2 = vld [vmem:[#allocation3 + $0x50] ss:$2 sm:$0xff]  ;;  %v2851_v3 = vld [vmem:[#allocation3 + $0x51] ss:$2 sm:$0xff]  ;;  %v2856_v5 = vmax.f32 %v2848_v62, %v2852_v63  ;;  %3057 = vst.msk [vmem:[#allocation3 + $0x68] sm:$0x3] %vm3055_vm6, %v4687_v0 }
 0xd62   :  { %v2855_v6 = vmax.f32 %v2847_v2, %v2851_v3  ;;  %3054 = vst.msk [vmem:[#allocation3 + $0x50] sm:$0xff] %vm1634_vm1, %v4687_v0 }
 0xd63   :  { %2860 = vst.msk [vmem:[#allocation2 + $0x28] sm:$0xff] %vm1333_vm0, %v2856_v5  ;;  %v2861_v29 = vld [vmem:[#allocation2] sm:$0xff]  ;;  %v2862_v30 = vld [vmem:[#allocation2 + $0x8] sm:$0xff] }
 0xd64   :  { %2859 = vst.msk [vmem:[#allocation2 + $0x20] sm:$0xff] %vm1333_vm0, %v2855_v6  ;;  %v2867_v9 = vsel %vm1333_vm0, %v2861_v29, 0.0  ;;  %v2868_v27 = vsel %vm1333_vm0, %v2862_v30, 0.0  ;;  %v4306_v5 = vld [vmem:[%s6045_s18] sm:$0xff]  }
 0xd65   :  { %v2869_v12 = vadd.f32 %v2868_v27, %v2867_v9  ;;  %4197 = vmatprep.subr.bf16.mxu0 %v4306_v5 }
 0xd66   :  { %4198 = vmatpush3.bf16.msra.mxu0 %v4306_v5 }
 0xd6a   :  { %v2864_v11 = vld [vmem:[#allocation2 + $0x28] sm:$0xff] }
 0xd6b   :  { %v2863_v28 = vld [vmem:[#allocation2 + $0x20] sm:$0xff]  ;;  %v2872_v26 = vsel %vm1333_vm0, %v2864_v11, 0.0 }
 0xd6c   :  { %v2870_v13 = vsel %vm1333_vm0, %v2863_v28, 0.0 }
 0xd6d   :  { %v2871_v22 = vadd.f32 %v2870_v13, %v2869_v12 }
 0xd6f   :  { %v2873_v31 = vadd.f32 %v2872_v26, %v2871_v22 }
 0xd71   :  { %v2874_v32 = vrot.slane %v2873_v31, 4 }
 0xd73   :  { %v2875_v33 = vadd.f32 %v2874_v32, %v2873_v31 }
 0xd75   :  { %v2876_v34 = vrot.slane %v2875_v33, 2 }
 0xd77   :  { %v2877_v35 = vadd.f32 %v2876_v34, %v2875_v33 }
 0xd79   :  { %v2878_v37 = vrot.slane %v2877_v35, 1 }
 0xd7b   :  { %v2879_v38 = vadd.f32 %v2878_v37, %v2877_v35 }
 0xd7d   :  { %v2881_v39 = vmul.f32 0.03125, %v2879_v38 }
 0xd7f   :  { %v2882_v40 = vsub.f32 %v2861_v29, %v2881_v39  ;;  %v2883_v41 = vsub.f32 %v2862_v30, %v2881_v39  ;;  %v2884_v42 = vsub.f32 %v2863_v28, %v2881_v39  ;;  %v2885_v43 = vsub.f32 %v2864_v11, %v2881_v39 }
 0xd81   :  { %v2886_v44 = vmul.f32 %v2882_v40, %v2882_v40  ;;  %v2887_v45 = vmul.f32 %v2883_v41, %v2883_v41  ;;  %v2888_v46 = vmul.f32 %v2884_v42, %v2884_v42  ;;  %v2889_v47 = vmul.f32 %v2885_v43, %v2885_v43 }
 0xd83   :  { %v2890_v48 = vsel %vm1333_vm0, %v2886_v44, 0.0  ;;  %v2891_v49 = vsel %vm1333_vm0, %v2887_v45, 0.0  ;;  %v2893_v14 = vsel %vm1333_vm0, %v2888_v46, 0.0  ;;  %v2895_v54 = vsel %vm1333_vm0, %v2889_v47, 0.0 }
 0xd84   :  { %v2892_v50 = vadd.f32 %v2891_v49, %v2890_v48 }
 0xd86   :  { %v2894_v1 = vadd.f32 %v2893_v14, %v2892_v50 }
 0xd88   :  { %v2896_v4 = vadd.f32 %v2895_v54, %v2894_v1 }
 0xd8a   :  { %v2897_v15 = vrot.slane %v2896_v4, 4 }
 0xd8c   :  { %v2898_v16 = vadd.f32 %v2897_v15, %v2896_v4 }
 0xd8e   :  { %v2899_v17 = vrot.slane %v2898_v16, 2 }
 0xd90   :  { %v2900_v18 = vadd.f32 %v2899_v17, %v2898_v16 }
 0xd92   :  { %v2901_v51 = vrot.slane %v2900_v18, 1 }
 0xd94   :  { %v2902_v20 = vadd.f32 %v2901_v51, %v2900_v18 }
 0xd96   :  { %v2903_v52 = vmul.f32 0.03125, %v2902_v20 }
 0xd98   :  { %v2904_v21 = vadd.f32 1e-05, %v2903_v52 }
 0xd9a   :  { %4336 = vrsqrt.f32 %v2904_v21  ;;  %v2992_v21 = vld [vmem:[%s6044_s17] sm:$0x1] }
 0xda4   :  { %v4337_v23 = vpop.eup %4336 }
 0xda5   :  { %v2906_v55 = vmul.f32 %v4337_v23, %v2865_v53 }
 0xda7   :  { %v2910_v8 = vrot.slane %v2906_v55, %v5365_v36 }
 0xda9   :  { %v2911_v25 = vmul.f32 %v2910_v8, %v2882_v40  ;;  %v2912_v57 = vmul.f32 %v2910_v8, %v2883_v41  ;;  %v2913_v7 = vmul.f32 %v2910_v8, %v2884_v42  ;;  %v2914_v58 = vmul.f32 %v2910_v8, %v2885_v43  ;;  %v3975_v8 = vld [vmem:[%s6044_s17 + $0x1] ss:$0 sm:$0xff] }
 0xdab   :  { %v2919_v10 = vadd.f32 %v3971_v56, %v2911_v25  ;;  %v2920_v59 = vadd.f32 %v3971_v56, %v2912_v57  ;;  %v2921_v19 = vadd.f32 %v3971_v56, %v2913_v7  ;;  %v2922_v60 = vadd.f32 %v3971_v56, %v2914_v58  ;;  %v4307_v58 = vld [vmem:[%s6045_s18 + $0x8] sm:$0xff]  }
 0xdac   :  { %4199 = vmatprep.subr.bf16.mxu0 %v4307_v58 }
 0xdad   :  { %v2923_v24 = vmax.f32 %v2919_v10, 0.0  ;;  %v2924_v61 = vmax.f32 %v2920_v59, 0.0  ;;  %v2925_v62 = vmax.f32 %v2921_v19, 0.0  ;;  %v2926_v63 = vmax.f32 %v2922_v60, 0.0  ;;  %4200 = vmatpush3.bf16.msra.mxu0 %v4307_v58 }
 0xdaf   :  { %v2927_v2 = vpack.c.bf16 %v2924_v61, %v2923_v24  ;;  %v2928_v3 = vpack.c.bf16 %v2926_v63, %v2925_v62 }
 0xdb1   :  { %4193 = vmatprep.mubr.msk.bf16.mxu1 %vm1333_vm0, %v2927_v2  ;;  %v4308_v2 = vld [vmem:[%s6045_s18 + $0x10] sm:$0xff]  }
 0xdb2   :  { %4194 = vmatmul.mubr.msk.bf16.vlgmr.msra.gmra.mrb[32].mxu1 %vm1333_vm0, %v2928_v3  ;;  %4201 = vmatprep.subr.bf16.mxu0 %v4308_v2  ;;  %v4309_v3 = vld [vmem:[%s6045_s18 + $0x18] sm:$0xff]  }
 0xdb3   :  { %4202 = vmatpush3.bf16.msra.mxu0 %v4308_v2 }
 0xdb4   :  { %4203 = vmatprep.subr.bf16.mxu0 %v4309_v3 }
 0xdb7   :  { %4204 = vmatpush3.bf16.msra.mxu0 %v4309_v3 }
 0xe85   :  { %v4195_v6 = vpop.f32.mrb[32].mxu1 }
 0xe86   :  { %v2977_v29 = vpop.f32.mrb[33].mxu1  ;;  %v2997_v12 = vsel %vm1634_vm1, %v4195_v6, 0.0 }
 0xe87   :  { %v4196_v30 = vpop.f32.mrb[34].mxu1  ;;  %v2994_v27 = vsel %vm1634_vm1, %v2977_v29, 0.0 }
 0xe88   :  { %v2980_v9 = vpop.f32.mrb[35].mxu1  ;;  %v2999_v22 = vsel %vm1634_vm1, %v4196_v30, 0.0 }
 0xe89   :  { %v2995_v28 = vsel %vm1634_vm1, %v2980_v9, 0.0 }
 0xe8a   :  { %v2996_v11 = vadd.f32 %v2995_v28, %v2994_v27 }
 0xe8c   :  { %v2998_v13 = vadd.f32 %v2997_v12, %v2996_v11 }
 0xe8e   :  { %v3000_v26 = vadd.f32 %v2999_v22, %v2998_v13  ;;  %v4310_v22 = vld [vmem:[%s6045_s18 + $0x20] sm:$0xff]  }
 0xe8f   :  { %4205 = vmatprep.subr.bf16.mxu0 %v4310_v22 }
 0xe90   :  { %v3001_v31 = vrot.slane %v3000_v26, 4  ;;  %4206 = vmatpush3.bf16.msra.mxu0 %v4310_v22 }
 0xe92   :  { %v3002_v32 = vadd.f32 %v3001_v31, %v3000_v26  ;;  %v4311_v26 = vld [vmem:[%s6045_s18 + $0x28] sm:$0xff]  }
 0xe93   :  { %4207 = vmatprep.subr.bf16.mxu0 %v4311_v26 }
 0xe94   :  { %v3003_v33 = vrot.slane %v3002_v32, 2  ;;  %4208 = vmatpush3.bf16.msra.mxu0 %v4311_v26 }
 0xe96   :  { %v3004_v34 = vadd.f32 %v3003_v33, %v3002_v32 }
 0xe98   :  { %v3005_v35 = vrot.slane %v3004_v34, 1 }
 0xe9a   :  { %v3006_v37 = vadd.f32 %v3005_v35, %v3004_v34 }
 0xe9c   :  { %v3007_v38 = vmul.f32 0.03125, %v3006_v37 }
 0xe9e   :  { %v3008_v39 = vsub.f32 %v2977_v29, %v3007_v38  ;;  %v3009_v40 = vsub.f32 %v2980_v9, %v3007_v38  ;;  %v3010_v41 = vsub.f32 %v4195_v6, %v3007_v38  ;;  %v3011_v42 = vsub.f32 %v4196_v30, %v3007_v38 }
 0xea0   :  { %v3012_v43 = vmul.f32 %v3008_v39, %v3008_v39  ;;  %v3013_v44 = vmul.f32 %v3009_v40, %v3009_v40  ;;  %v3014_v45 = vmul.f32 %v3010_v41, %v3010_v41  ;;  %v3015_v46 = vmul.f32 %v3011_v42, %v3011_v42 }
 0xea2   :  { %v3016_v47 = vsel %vm1634_vm1, %v3012_v43, 0.0  ;;  %v3017_v48 = vsel %vm1634_vm1, %v3013_v44, 0.0  ;;  %v3019_v50 = vsel %vm1634_vm1, %v3014_v45, 0.0  ;;  %v3021_v1 = vsel %vm1634_vm1, %v3015_v46, 0.0 }
 0xea3   :  { %v3018_v49 = vadd.f32 %v3017_v48, %v3016_v47  ;;  %v4312_v48 = vld [vmem:[#allocation23] sm:$0xff]  }
 0xea4   :  { %4213 = vmatprep.subr.bf16.mxu1 %v4312_v48 }
 0xea5   :  { %v3020_v14 = vadd.f32 %v3019_v50, %v3018_v49  ;;  %v4313_v49 = vld [vmem:[#allocation23 + $0x8] ss:$0 sps:$4 sm:$0xff]   ;;  %4214 = vmatpush3.bf16.msra.mxu1 %v4312_v48 }
 0xea6   :  { %4257 = vmatprep.subr.msk.bf16.mxu1 %vm1262_vm12, %v4313_v49  ;;  %v3333_v50 = vsel %vm1262_vm12, %v4313_v49, 0 }
 0xea7   :  { %v3022_v54 = vadd.f32 %v3021_v1, %v3020_v14 }
 0xea9   :  { %v3023_v4 = vrot.slane %v3022_v54, 4  ;;  %4216 = vmatpush3.bf16.msra.mxu1 %v3333_v50 }
 0xeab   :  { %v3024_v15 = vadd.f32 %v3023_v4, %v3022_v54 }
 0xead   :  { %v3025_v16 = vrot.slane %v3024_v15, 2 }
 0xeaf   :  { %v3026_v17 = vadd.f32 %v3025_v16, %v3024_v15 }
 0xeb1   :  { %v3027_v18 = vrot.slane %v3026_v17, 1 }
 0xeb3   :  { %v3028_v51 = vadd.f32 %v3027_v18, %v3026_v17 }
 0xeb5   :  { %v3029_v20 = vmul.f32 0.03125, %v3028_v51 }
 0xeb7   :  { %v3030_v52 = vadd.f32 1e-05, %v3029_v20 }
 0xeb9   :  { %4338 = vrsqrt.f32 %v3030_v52 }
 0xec3   :  { %v4339_v53 = vpop.eup %4338 }
 0xec4   :  { %v3032_v23 = vmul.f32 %v4339_v53, %v2992_v21 }
 0xec6   :  { %v3036_v55 = vrot.slane %v3032_v23, %v5365_v36 }
 0xec8   :  { %v3037_v56 = vmul.f32 %v3036_v55, %v3008_v39  ;;  %v3038_v25 = vmul.f32 %v3036_v55, %v3009_v40  ;;  %v3039_v57 = vmul.f32 %v3036_v55, %v3010_v41  ;;  %v3040_v7 = vmul.f32 %v3036_v55, %v3011_v42 }
 0xeca   :  { %v3045_v10 = vadd.f32 %v3975_v8, %v3037_v56  ;;  %v3046_v59 = vadd.f32 %v3975_v8, %v3038_v25  ;;  %v3047_v19 = vadd.f32 %v3975_v8, %v3039_v57  ;;  %v3048_v60 = vadd.f32 %v3975_v8, %v3040_v7 }
 0xecc   :  { %v3049_v24 = vmax.f32 %v3045_v10, 0.0  ;;  %v3050_v61 = vmax.f32 %v3046_v59, 0.0  ;;  %v3051_v62 = vmax.f32 %v3047_v19, 0.0  ;;  %v3052_v63 = vmax.f32 %v3048_v60, 0.0 }
 0xece   :  { %3058 = vst.msk [vmem:[#allocation3 + $0x8] sm:$0xff] %vm1634_vm1, %v3049_v24  ;;  %3059 = vst.msk [vmem:[#allocation3 + $0x10] sm:$0xff] %vm1634_vm1, %v3050_v61 }
 0xecf   :  { %3060 = vst.msk [vmem:[#allocation3 + $0x58] sm:$0xff] %vm1634_vm1, %v3051_v62  ;;  %3061 = vst.msk [vmem:[#allocation3 + $0x60] sm:$0xff] %vm1634_vm1, %v3052_v63 }
 0xed5   :  { %v3071_v5 = vld [vmem:[#allocation3 + $0x10] sm:$0xff]  ;;  %v3070_v6 = vld [vmem:[#allocation3 + $0x8] sm:$0xff] }
 0xed6   :  { %3080 = vrot.lane.b32.xlu1 %v3071_v5, %s4693_s2  ;;  %3078 = vrot.lane.b32.xlu0 %v3070_v6, %s4693_s2  ;;  %v3095_v29 = vld [vmem:[#allocation3 + $0x12] sm:$0xff]  ;;  %v3073_v30 = vld [vmem:[#allocation3 + $0x60] sm:$0xff]  ;;  %v3094_v31 = vld [vmem:[#allocation3 + $0xa] sm:$0xff] }
 0xed7   :  { %3447 = vst.msk [vmem:[#allocation3 + $0x18] sm:$0x3] %vm3055_vm6, %v4687_v0  ;;  %v3097_v9 = vld [vmem:[#allocation3 + $0x62] sm:$0xff]  ;;  %v3063_v27 = vld [vmem:[#allocation3 + $0xe] sm:$0xff]  ;;  %v3064_v12 = vld [vmem:[#allocation3 + $0x56] sm:$0xff] }
 0xed8   :  { %3448 = vst.msk [vmem:[#allocation3 + $0x68] sm:$0x3] %vm3055_vm6, %v4687_v0  ;;  %v3062_v28 = vld [vmem:[#allocation3 + $0x6] sm:$0xff]  ;;  %v3065_v11 = vld [vmem:[#allocation3 + $0x5e] sm:$0xff] }
 0xed9   :  { %3067 = vst.msk [vmem:[#allocation4 + $0x8] sm:$0xff] %vm1634_vm1, %v3063_v27  ;;  %v3072_v13 = vld [vmem:[#allocation3 + $0x58] sm:$0xff]  ;;  %3066 = vst.msk [vmem:[#allocation4] sm:$0xff] %vm1634_vm1, %v3062_v28 }
 0xeda   :  { %3445 = vst.msk [vmem:[#allocation3] sm:$0xff] %vm1634_vm1, %v4687_v0  ;;  %3069 = vst.msk [vmem:[#allocation4 + $0x48] sm:$0xff] %vm1634_vm1, %v3065_v11  ;;  %3084 = vrot.lane.b32.xlu1 %v3073_v30, %s4693_s2  ;;  %3082 = vrot.lane.b32.xlu0 %v3072_v13, %s4693_s2  ;;  %v3096_v32 = vld [vmem:[#allocation3 + $0x5a] sm:$0xff] }
 0xedb   :  { %3068 = vst.msk [vmem:[#allocation4 + $0x40] sm:$0xff] %vm1634_vm1, %v3064_v12  ;;  %3446 = vst.msk [vmem:[#allocation3 + $0x50] sm:$0xff] %vm1634_vm1, %v4687_v0 }
 0xede   :  { %3104 = vrot.lane.b32.xlu1 %v3095_v29, %s4674_s9  ;;  %3102 = vrot.lane.b32.xlu0 %v3094_v31, %s4674_s9 }
 0xee2   :  { %3108 = vrot.lane.b32.xlu1 %v3097_v9, %s4674_s9  ;;  %3106 = vrot.lane.b32.xlu0 %v3096_v32, %s4674_s9 }
 0xf48   :  { %v3081_v33 = vpop.permute.xlu1 %3080  ;;  %v3079_v34 = vpop.permute.xlu0 %3078 }
 0xf49   :  { %3091 = vst.msk [vmem:[#allocation4 + $0x8] sm:$0xff] %vm1799_vm2, %v3081_v33  ;;  %3090 = vst.msk [vmem:[#allocation4] sm:$0xff] %vm1799_vm2, %v3079_v34 }
 0xf4c   :  { %v3085_v35 = vpop.permute.xlu1 %3084  ;;  %v3083_v37 = vpop.permute.xlu0 %3082 }
 0xf4d   :  { %3093 = vst.msk [vmem:[#allocation4 + $0x48] sm:$0xff] %vm1799_vm2, %v3085_v35  ;;  %3092 = vst.msk [vmem:[#allocation4 + $0x40] sm:$0xff] %vm1799_vm2, %v3083_v37 }
 0xf50   :  { %v3105_v38 = vpop.permute.xlu1 %3104  ;;  %v3103_v39 = vpop.permute.xlu0 %3102 }
 0xf51   :  { %3115 = vst.msk [vmem:[#allocation4 + $0x8] sm:$0xff] %vm1848_vm3, %v3105_v38  ;;  %3114 = vst.msk [vmem:[#allocation4] sm:$0xff] %vm1848_vm3, %v3103_v39  ;;  %v3251_v38 = vld [vmem:[#allocation22] sm:$0x1] }
 0xf54   :  { %v3109_v40 = vpop.permute.xlu1 %3108  ;;  %v3107_v41 = vpop.permute.xlu0 %3106 }
 0xf55   :  { %3117 = vst.msk [vmem:[#allocation4 + $0x48] sm:$0xff] %vm1848_vm3, %v3109_v40  ;;  %3116 = vst.msk [vmem:[#allocation4 + $0x40] sm:$0xff] %vm1848_vm3, %v3107_v41 }
 0xf58   :  { %v3118_v42 = vld [vmem:[#allocation4] sm:$0xff]  ;;  %v3119_v43 = vld [vmem:[#allocation4 + $0x8] sm:$0xff] }
 0xf59   :  { %v3122_v44 = vpack.c.bf16 %v3119_v43, %v3118_v42  ;;  %v3984_v42 = vld [vmem:[#allocation22 + $0x1] ss:$0 sm:$0xff] }
 0xf5b   :  { %4209 = vmatprep.mubr.msk.bf16.mxu0 %vm1917_vm4, %v3122_v44 }
 0xf5c   :  { %v3120_v45 = vld [vmem:[#allocation4 + $0x40] sm:$0xff]  ;;  %v3121_v46 = vld [vmem:[#allocation4 + $0x48] sm:$0xff] }
 0xf5d   :  { %v3123_v47 = vpack.c.bf16 %v3121_v46, %v3120_v45 }
 0xf5f   :  { %4210 = vmatmul.mubr.msk.bf16.vlgmr.msra.gmra.mrb[32].mxu0 %vm1917_vm4, %v3123_v47 }
0x1032   :  { %v4211_v14 = vpop.f32.mrb[32].mxu0 }
0x1033   :  { %v3212_v1 = vpop.f32.mrb[33].mxu0 }
0x1034   :  { %3231 = vrot.lane.b32.xlu0 %v3212_v1, %s4692_s4  ;;  %v4212_v54 = vpop.f32.mrb[34].mxu0 }
0x1035   :  { %v3215_v4 = vpop.f32.mrb[35].mxu0 }
0x1036   :  { %3233 = vrot.lane.b32.xlu1 %v3215_v4, %s4692_s4 }
0x1038   :  { %3235 = vrot.lane.b32.xlu0 %v4211_v14, %s4692_s4 }
0x103a   :  { %3237 = vrot.lane.b32.xlu1 %v4212_v54, %s4692_s4 }
0x10a6   :  { %v3232_v15 = vpop.permute.xlu0 %3231 }
0x10a7   :  { %3243 = vst.msk [vmem:[#allocation2] sm:$0xff] %vm1212_vm14, %v3232_v15 }
0x10a8   :  { %v3234_v16 = vpop.permute.xlu1 %3233 }
0x10a9   :  { %3244 = vst.msk [vmem:[#allocation2 + $0x8] sm:$0xff] %vm1212_vm14, %v3234_v16 }
0x10aa   :  { %v3236_v17 = vpop.permute.xlu0 %3235 }
0x10ab   :  { %3245 = vst.msk [vmem:[#allocation2 + $0x20] sm:$0xff] %vm1212_vm14, %v3236_v17  ;;  %v4314_v17 = vld [vmem:[%s6049_s22] sm:$0xff]  }
0x10ac   :  { %v3238_v18 = vpop.permute.xlu1 %3237  ;;  %4221 = vmatprep.subr.bf16.mxu1 %v4314_v17 }
0x10ad   :  { %3246 = vst.msk [vmem:[#allocation2 + $0x28] sm:$0xff] %vm1212_vm14, %v3238_v18 }
0x10ae   :  { %v3247_v51 = vld [vmem:[#allocation2] sm:$0xff] }
0x10af   :  { %v3253_v52 = vsel %vm1249_vm15, %v3247_v51, 0.0 }
0x10b0   :  { %v3248_v20 = vld [vmem:[#allocation2 + $0x8] sm:$0xff] }
0x10b1   :  { %v3254_v21 = vsel %vm1249_vm15, %v3248_v20, 0.0 }
0x10b2   :  { %v3249_v53 = vld [vmem:[#allocation2 + $0x20] sm:$0xff]  ;;  %v3255_v23 = vadd.f32 %v3254_v21, %v3253_v52 }
0x10b3   :  { %v3256_v55 = vsel %vm1249_vm15, %v3249_v53, 0.0 }
0x10b4   :  { %v3250_v8 = vld [vmem:[#allocation2 + $0x28] sm:$0xff]  ;;  %v3257_v56 = vadd.f32 %v3256_v55, %v3255_v23 }
0x10b5   :  { %v3258_v25 = vsel %vm1249_vm15, %v3250_v8, 0.0 }
0x10b6   :  { %v3259_v57 = vadd.f32 %v3258_v25, %v3257_v56 }
0x10b8   :  { %v3260_v7 = vrot.slane %v3259_v57, 4 }
0x10ba   :  { %v3261_v58 = vadd.f32 %v3260_v7, %v3259_v57 }
0x10bc   :  { %v3262_v10 = vrot.slane %v3261_v58, 2 }
0x10be   :  { %v3263_v59 = vadd.f32 %v3262_v10, %v3261_v58 }
0x10c0   :  { %v3264_v19 = vrot.slane %v3263_v59, 1 }
0x10c2   :  { %v3265_v60 = vadd.f32 %v3264_v19, %v3263_v59 }
0x10c4   :  { %v3266_v24 = vmul.f32 0.03125, %v3265_v60 }
0x10c6   :  { %v3267_v61 = vsub.f32 %v3247_v51, %v3266_v24  ;;  %v3268_v62 = vsub.f32 %v3248_v20, %v3266_v24  ;;  %v3269_v63 = vsub.f32 %v3249_v53, %v3266_v24  ;;  %v3270_v2 = vsub.f32 %v3250_v8, %v3266_v24 }
0x10c8   :  { %v3271_v3 = vmul.f32 %v3267_v61, %v3267_v61  ;;  %v3272_v5 = vmul.f32 %v3268_v62, %v3268_v62  ;;  %v3273_v6 = vmul.f32 %v3269_v63, %v3269_v63  ;;  %v3274_v29 = vmul.f32 %v3270_v2, %v3270_v2 }
0x10ca   :  { %v3275_v30 = vsel %vm1249_vm15, %v3271_v3, 0.0  ;;  %v3276_v9 = vsel %vm1249_vm15, %v3272_v5, 0.0  ;;  %v3278_v28 = vsel %vm1249_vm15, %v3273_v6, 0.0  ;;  %v3280_v12 = vsel %vm1249_vm15, %v3274_v29, 0.0 }
0x10cb   :  { %v3277_v27 = vadd.f32 %v3276_v9, %v3275_v30 }
0x10cd   :  { %v3279_v11 = vadd.f32 %v3278_v28, %v3277_v27 }
0x10cf   :  { %v3281_v13 = vadd.f32 %v3280_v12, %v3279_v11 }
0x10d1   :  { %v3282_v22 = vrot.slane %v3281_v13, 4 }
0x10d3   :  { %v3283_v26 = vadd.f32 %v3282_v22, %v3281_v13 }
0x10d5   :  { %v3284_v31 = vrot.slane %v3283_v26, 2 }
0x10d7   :  { %v3285_v32 = vadd.f32 %v3284_v31, %v3283_v26 }
0x10d9   :  { %v3286_v33 = vrot.slane %v3285_v32, 1 }
0x10db   :  { %v3287_v34 = vadd.f32 %v3286_v33, %v3285_v32 }
0x10dd   :  { %v3288_v35 = vmul.f32 0.03125, %v3287_v34 }
0x10df   :  { %v3289_v37 = vadd.f32 1e-05, %v3288_v35 }
0x10e1   :  { %4340 = vrsqrt.f32 %v3289_v37  ;;  %v3384_v37 = vld [vmem:[%s6048_s21] sm:$0x1] }
0x10eb   :  { %v4341_v39 = vpop.eup %4340 }
0x10ec   :  { %v3291_v40 = vmul.f32 %v4341_v39, %v3251_v38 }
0x10ee   :  { %v3295_v41 = vrot.slane %v3291_v40, %v5365_v36 }
0x10f0   :  { %v3296_v43 = vmul.f32 %v3295_v41, %v3267_v61  ;;  %v3297_v44 = vmul.f32 %v3295_v41, %v3268_v62  ;;  %v3298_v45 = vmul.f32 %v3295_v41, %v3269_v63  ;;  %v3299_v46 = vmul.f32 %v3295_v41, %v3270_v2  ;;  %v3989_v41 = vld [vmem:[%s6048_s21 + $0x1] ss:$0 sm:$0xff] }
0x10f2   :  { %v3304_v47 = vadd.f32 %v3984_v42, %v3296_v43  ;;  %v3305_v48 = vadd.f32 %v3984_v42, %v3297_v44  ;;  %v3306_v49 = vadd.f32 %v3984_v42, %v3298_v45  ;;  %v3307_v50 = vadd.f32 %v3984_v42, %v3299_v46  ;;  %v4315_v46 = vld [vmem:[%s6049_s22 + $0x8] sm:$0xff]  }
0x10f4   :  { %v3308_v14 = vmax.f32 %v3304_v47, 0.0  ;;  %v3309_v1 = vmax.f32 %v3305_v48, 0.0  ;;  %v3310_v54 = vmax.f32 %v3306_v49, 0.0  ;;  %v3311_v4 = vmax.f32 %v3307_v50, 0.0 }
0x10f6   :  { %v3312_v15 = vpack.c.bf16 %v3309_v1, %v3308_v14  ;;  %v3313_v16 = vpack.c.bf16 %v3311_v4, %v3310_v54 }
0x10f8   :  { %4217 = vmatprep.mubr.msk.bf16.mxu1 %vm1249_vm15, %v3312_v15  ;;  %v4316_v15 = vld [vmem:[%s6049_s22 + $0x10] sm:$0xff]  }
0x10f9   :  { %4218 = vmatmul.mubr.msk.bf16.vlgmr.msra.gmra.mrb[36].mxu1 %vm1249_vm15, %v3313_v16  ;;  %v4317_v16 = vld [vmem:[%s6049_s22 + $0x18] sm:$0xff]  }
0x10fa   :  { %4222 = vmatpush3.bf16.msra.mxu1 %v4314_v17 }
0x10fb   :  { %4223 = vmatprep.subr.bf16.mxu1 %v4315_v46 }
0x10fe   :  { %4224 = vmatpush3.bf16.msra.mxu1 %v4315_v46 }
0x10ff   :  { %4225 = vmatprep.subr.bf16.mxu1 %v4316_v15 }
0x1102   :  { %4226 = vmatpush3.bf16.msra.mxu1 %v4316_v15 }
0x1103   :  { %4227 = vmatprep.subr.bf16.mxu1 %v4317_v16 }
0x1106   :  { %4228 = vmatpush3.bf16.msra.mxu1 %v4317_v16 }
0x11cc   :  { %v4219_v18 = vpop.f32.mrb[36].mxu1 }
0x11cd   :  { %v3369_v51 = vpop.f32.mrb[37].mxu1  ;;  %v3389_v55 = vsel %vm1634_vm1, %v4219_v18, 0.0 }
0x11ce   :  { %v4220_v20 = vpop.f32.mrb[38].mxu1  ;;  %v3386_v21 = vsel %vm1634_vm1, %v3369_v51, 0.0 }
0x11cf   :  { %v3372_v52 = vpop.f32.mrb[39].mxu1  ;;  %v3391_v56 = vsel %vm1634_vm1, %v4220_v20, 0.0 }
0x11d0   :  { %v3387_v53 = vsel %vm1634_vm1, %v3372_v52, 0.0 }
0x11d1   :  { %v3388_v23 = vadd.f32 %v3387_v53, %v3386_v21 }
0x11d3   :  { %v3390_v8 = vadd.f32 %v3389_v55, %v3388_v23  ;;  %v4318_v55 = vld [vmem:[%s6049_s22 + $0x20] sm:$0xff]  }
0x11d4   :  { %4229 = vmatprep.subr.bf16.mxu1 %v4318_v55 }
0x11d5   :  { %v3392_v25 = vadd.f32 %v3391_v56, %v3390_v8  ;;  %v4319_v8 = vld [vmem:[%s6049_s22 + $0x28] sm:$0xff]   ;;  %4230 = vmatpush3.bf16.msra.mxu1 %v4318_v55 }
0x11d6   :  { %4231 = vmatprep.subr.bf16.mxu1 %v4319_v8 }
0x11d7   :  { %v3393_v57 = vrot.slane %v3392_v25, 4 }
0x11d9   :  { %v3394_v7 = vadd.f32 %v3393_v57, %v3392_v25  ;;  %4232 = vmatpush3.bf16.msra.mxu1 %v4319_v8 }
0x11db   :  { %v3395_v58 = vrot.slane %v3394_v7, 2 }
0x11dd   :  { %v3396_v10 = vadd.f32 %v3395_v58, %v3394_v7 }
0x11df   :  { %v3397_v59 = vrot.slane %v3396_v10, 1 }
0x11e1   :  { %v3398_v19 = vadd.f32 %v3397_v59, %v3396_v10 }
0x11e3   :  { %v3399_v60 = vmul.f32 0.03125, %v3398_v19 }
0x11e5   :  { %v3400_v24 = vsub.f32 %v3369_v51, %v3399_v60  ;;  %v3401_v61 = vsub.f32 %v3372_v52, %v3399_v60  ;;  %v3402_v62 = vsub.f32 %v4219_v18, %v3399_v60  ;;  %v3403_v63 = vsub.f32 %v4220_v20, %v3399_v60 }
0x11e7   :  { %v3404_v2 = vmul.f32 %v3400_v24, %v3400_v24  ;;  %v3405_v3 = vmul.f32 %v3401_v61, %v3401_v61  ;;  %v3406_v5 = vmul.f32 %v3402_v62, %v3402_v62  ;;  %v3407_v6 = vmul.f32 %v3403_v63, %v3403_v63 }
0x11e9   :  { %v3408_v29 = vsel %vm1634_vm1, %v3404_v2, 0.0  ;;  %v3409_v30 = vsel %vm1634_vm1, %v3405_v3, 0.0  ;;  %v3411_v27 = vsel %vm1634_vm1, %v3406_v5, 0.0  ;;  %v3413_v11 = vsel %vm1634_vm1, %v3407_v6, 0.0 }
0x11ea   :  { %v3410_v9 = vadd.f32 %v3409_v30, %v3408_v29  ;;  %v4320_v30 = vld [vmem:[%s6051_s24] sm:$0xff]  }
0x11eb   :  { %4237 = vmatprep.subr.bf16.mxu0 %v4320_v30 }
0x11ec   :  { %v3412_v28 = vadd.f32 %v3411_v27, %v3410_v9  ;;  %v4321_v9 = vld [vmem:[%s6051_s24 + $0x8] sm:$0xff]   ;;  %4238 = vmatpush3.bf16.msra.mxu0 %v4320_v30 }
0x11ed   :  { %4239 = vmatprep.subr.bf16.mxu0 %v4321_v9 }
0x11ee   :  { %v3414_v12 = vadd.f32 %v3413_v11, %v3412_v28 }
0x11f0   :  { %v3415_v13 = vrot.slane %v3414_v12, 4  ;;  %4240 = vmatpush3.bf16.msra.mxu0 %v4321_v9 }
0x11f2   :  { %v3416_v22 = vadd.f32 %v3415_v13, %v3414_v12 }
0x11f4   :  { %v3417_v26 = vrot.slane %v3416_v22, 2 }
0x11f6   :  { %v3418_v31 = vadd.f32 %v3417_v26, %v3416_v22 }
0x11f8   :  { %v3419_v32 = vrot.slane %v3418_v31, 1 }
0x11fa   :  { %v3420_v33 = vadd.f32 %v3419_v32, %v3418_v31 }
0x11fc   :  { %v3421_v34 = vmul.f32 0.03125, %v3420_v33 }
0x11fe   :  { %v3422_v35 = vadd.f32 1e-05, %v3421_v34 }
0x1200   :  { %4342 = vrsqrt.f32 %v3422_v35 }
0x120a   :  { %v4343_v38 = vpop.eup %4342 }
0x120b   :  { %v3424_v39 = vmul.f32 %v4343_v38, %v3384_v37 }
0x120d   :  { %v3428_v40 = vrot.slane %v3424_v39, %v5365_v36 }
0x120f   :  { %v3429_v42 = vmul.f32 %v3428_v40, %v3400_v24  ;;  %v3430_v43 = vmul.f32 %v3428_v40, %v3401_v61  ;;  %v3431_v44 = vmul.f32 %v3428_v40, %v3402_v62  ;;  %v3432_v45 = vmul.f32 %v3428_v40, %v3403_v63 }
0x1211   :  { %v3437_v47 = vadd.f32 %v3989_v41, %v3429_v42  ;;  %v3438_v48 = vadd.f32 %v3989_v41, %v3430_v43  ;;  %v3439_v49 = vadd.f32 %v3989_v41, %v3431_v44  ;;  %v3440_v50 = vadd.f32 %v3989_v41, %v3432_v45 }
0x1213   :  { %v3441_v14 = vmax.f32 %v3437_v47, 0.0  ;;  %v3442_v1 = vmax.f32 %v3438_v48, 0.0  ;;  %v3443_v54 = vmax.f32 %v3439_v49, 0.0  ;;  %v3444_v4 = vmax.f32 %v3440_v50, 0.0 }
0x1215   :  { %3449 = vst.msk [vmem:[#allocation3 + $0x8] sm:$0xff] %vm1634_vm1, %v3441_v14  ;;  %3450 = vst.msk [vmem:[#allocation3 + $0x10] sm:$0xff] %vm1634_vm1, %v3442_v1 }
0x1216   :  { %3451 = vst.msk [vmem:[#allocation3 + $0x58] sm:$0xff] %vm1634_vm1, %v3443_v54  ;;  %3452 = vst.msk [vmem:[#allocation3 + $0x60] sm:$0xff] %vm1634_vm1, %v3444_v4 }
0x121c   :  { %v3462_v17 = vld [vmem:[#allocation3 + $0x10] sm:$0xff]  ;;  %v3461_v18 = vld [vmem:[#allocation3 + $0x8] sm:$0xff] }
0x121d   :  { %3471 = vrot.lane.b32.xlu1 %v3462_v17, %s4693_s2  ;;  %3469 = vrot.lane.b32.xlu0 %v3461_v18, %s4693_s2  ;;  %v3464_v51 = vld [vmem:[#allocation3 + $0x60] sm:$0xff]  ;;  %v3454_v20 = vld [vmem:[#allocation3 + $0xe] sm:$0xff]  ;;  %v3455_v53 = vld [vmem:[#allocation3 + $0x56] sm:$0xff] }
0x121e   :  { %3458 = vst.msk [vmem:[#allocation4 + $0x8] sm:$0xff] %vm1634_vm1, %v3454_v20  ;;  %v3453_v52 = vld [vmem:[#allocation3 + $0x6] sm:$0xff]  ;;  %v3456_v21 = vld [vmem:[#allocation3 + $0x5e] sm:$0xff]  ;;  %3459 = vst.msk [vmem:[#allocation4 + $0x40] sm:$0xff] %vm1634_vm1, %v3455_v53 }
0x121f   :  { %v3463_v23 = vld [vmem:[#allocation3 + $0x58] sm:$0xff]  ;;  %3457 = vst.msk [vmem:[#allocation4] sm:$0xff] %vm1634_vm1, %v3453_v52  ;;  %3460 = vst.msk [vmem:[#allocation4 + $0x48] sm:$0xff] %vm1634_vm1, %v3456_v21  ;;  %v3485_v25 = vld [vmem:[#allocation3 + $0xa] sm:$0xff] }
0x1220   :  { %v3486_v56 = vld [vmem:[#allocation3 + $0x12] sm:$0xff]  ;;  %v3488_v57 = vld [vmem:[#allocation3 + $0x62] sm:$0xff]  ;;  %v3487_v7 = vld [vmem:[#allocation3 + $0x5a] sm:$0xff] }
0x1221   :  { %3475 = vrot.lane.b32.xlu1 %v3464_v51, %s4693_s2  ;;  %3473 = vrot.lane.b32.xlu0 %v3463_v23, %s4693_s2 }
0x1225   :  { %3495 = vrot.lane.b32.xlu1 %v3486_v56, %s4674_s9  ;;  %3493 = vrot.lane.b32.xlu0 %v3485_v25, %s4674_s9 }
0x1229   :  { %3499 = vrot.lane.b32.xlu1 %v3488_v57, %s4674_s9  ;;  %3497 = vrot.lane.b32.xlu0 %v3487_v7, %s4674_s9 }
0x128f   :  { %v3472_v58 = vpop.permute.xlu1 %3471  ;;  %v3470_v10 = vpop.permute.xlu0 %3469 }
0x1290   :  { %3482 = vst.msk [vmem:[#allocation4 + $0x8] sm:$0xff] %vm1799_vm2, %v3472_v58  ;;  %3481 = vst.msk [vmem:[#allocation4] sm:$0xff] %vm1799_vm2, %v3470_v10 }
0x1293   :  { %v3476_v59 = vpop.permute.xlu1 %3475  ;;  %v3474_v19 = vpop.permute.xlu0 %3473 }
0x1294   :  { %3484 = vst.msk [vmem:[#allocation4 + $0x48] sm:$0xff] %vm1799_vm2, %v3476_v59  ;;  %3483 = vst.msk [vmem:[#allocation4 + $0x40] sm:$0xff] %vm1799_vm2, %v3474_v19  ;;  %v3642_v19 = vld [vmem:[%s6050_s23] sm:$0x1] }
0x1297   :  { %v3496_v60 = vpop.permute.xlu1 %3495  ;;  %v3494_v24 = vpop.permute.xlu0 %3493 }
0x1298   :  { %3506 = vst.msk [vmem:[#allocation4 + $0x8] sm:$0xff] %vm1848_vm3, %v3496_v60  ;;  %3505 = vst.msk [vmem:[#allocation4] sm:$0xff] %vm1848_vm3, %v3494_v24 }
0x129b   :  { %v3500_v61 = vpop.permute.xlu1 %3499  ;;  %v3498_v62 = vpop.permute.xlu0 %3497 }
0x129c   :  { %3508 = vst.msk [vmem:[#allocation4 + $0x48] sm:$0xff] %vm1848_vm3, %v3500_v61  ;;  %3507 = vst.msk [vmem:[#allocation4 + $0x40] sm:$0xff] %vm1848_vm3, %v3498_v62  ;;  %v3998_v62 = vld [vmem:[%s6050_s23 + $0x1] ss:$0 sm:$0xff] }
0x129f   :  { %v3509_v63 = vld [vmem:[#allocation4] sm:$0xff]  ;;  %v3510_v2 = vld [vmem:[#allocation4 + $0x8] sm:$0xff] }
0x12a0   :  { %v3513_v3 = vpack.c.bf16 %v3510_v2, %v3509_v63 }
0x12a2   :  { %4233 = vmatprep.mubr.msk.bf16.mxu1 %vm1917_vm4, %v3513_v3 }
0x12a3   :  { %v3511_v5 = vld [vmem:[#allocation4 + $0x40] sm:$0xff]  ;;  %v3512_v6 = vld [vmem:[#allocation4 + $0x48] sm:$0xff] }
0x12a4   :  { %v3514_v29 = vpack.c.bf16 %v3512_v6, %v3511_v5 }
0x12a6   :  { %4234 = vmatmul.mubr.msk.bf16.vlgmr.msra.gmra.mrb[40].mxu1 %vm1917_vm4, %v3514_v29 }
0x1379   :  { %v4235_v27 = vpop.f32.mrb[40].mxu1 }
0x137a   :  { %v3603_v28 = vpop.f32.mrb[41].mxu1 }
0x137b   :  { %3622 = vrot.lane.b32.xlu0 %v3603_v28, %s4694_s12  ;;  %v4236_v11 = vpop.f32.mrb[42].mxu1 }
0x137c   :  { %v3606_v12 = vpop.f32.mrb[43].mxu1 }
0x137d   :  { %3624 = vrot.lane.b32.xlu1 %v3606_v12, %s4694_s12 }
0x137f   :  { %3626 = vrot.lane.b32.xlu0 %v4235_v27, %s4694_s12 }
0x1381   :  { %3628 = vrot.lane.b32.xlu1 %v4236_v11, %s4694_s12 }
0x13ed   :  { %v3623_v13 = vpop.permute.xlu0 %3622 }
0x13ee   :  { %3634 = vst.msk [vmem:[#allocation2] sm:$0xff] %vm2626_vm5, %v3623_v13 }
0x13ef   :  { %v3625_v22 = vpop.permute.xlu1 %3624 }
0x13f0   :  { %3635 = vst.msk [vmem:[#allocation2 + $0x8] sm:$0xff] %vm2626_vm5, %v3625_v22 }
0x13f1   :  { %v3627_v26 = vpop.permute.xlu0 %3626 }
0x13f2   :  { %3636 = vst.msk [vmem:[#allocation2 + $0x20] sm:$0xff] %vm2626_vm5, %v3627_v26  ;;  %v3804_v26 = vld [vmem:[#allocation25 + $0x8] sm:$0xff] }
0x13f3   :  { %v3629_v31 = vpop.permute.xlu1 %3628 }
0x13f4   :  { %3637 = vst.msk [vmem:[#allocation2 + $0x28] sm:$0xff] %vm2626_vm5, %v3629_v31  ;;  %v4695_v31 = vmov 0.0|0.0  }
0x13f5   :  { %v3638_v32 = vld [vmem:[#allocation2] sm:$0xff]  ;;  %4252 = vmatprep.subr.bf16.mxu0 %v4695_v31 }
0x13f6   :  { %v3644_v34 = vsel %vm1634_vm1, %v3638_v32, 0.0 }
0x13f7   :  { %v3639_v33 = vld [vmem:[#allocation2 + $0x8] sm:$0xff] }
0x13f8   :  { %v3645_v35 = vsel %vm1634_vm1, %v3639_v33, 0.0 }
0x13f9   :  { %v3640_v37 = vld [vmem:[#allocation2 + $0x20] sm:$0xff]  ;;  %v3646_v38 = vadd.f32 %v3645_v35, %v3644_v34 }
0x13fa   :  { %v3647_v39 = vsel %vm1634_vm1, %v3640_v37, 0.0 }
0x13fb   :  { %v3641_v40 = vld [vmem:[#allocation2 + $0x28] sm:$0xff]  ;;  %v3648_v41 = vadd.f32 %v3647_v39, %v3646_v38 }
0x13fc   :  { %v3649_v42 = vsel %vm1634_vm1, %v3641_v40, 0.0 }
0x13fd   :  { %v3650_v43 = vadd.f32 %v3649_v42, %v3648_v41 }
0x13ff   :  { %v3651_v44 = vrot.slane %v3650_v43, 4 }
0x1401   :  { %v3652_v45 = vadd.f32 %v3651_v44, %v3650_v43 }
0x1403   :  { %v3653_v46 = vrot.slane %v3652_v45, 2 }
0x1405   :  { %v3654_v47 = vadd.f32 %v3653_v46, %v3652_v45 }
0x1407   :  { %v3655_v48 = vrot.slane %v3654_v47, 1 }
0x1409   :  { %v3656_v49 = vadd.f32 %v3655_v48, %v3654_v47 }
0x140b   :  { %v3657_v50 = vmul.f32 0.03125, %v3656_v49 }
0x140d   :  { %v3658_v14 = vsub.f32 %v3638_v32, %v3657_v50  ;;  %v3659_v1 = vsub.f32 %v3639_v33, %v3657_v50  ;;  %v3660_v54 = vsub.f32 %v3640_v37, %v3657_v50  ;;  %v3661_v4 = vsub.f32 %v3641_v40, %v3657_v50 }
0x140f   :  { %v3662_v15 = vmul.f32 %v3658_v14, %v3658_v14  ;;  %v3663_v16 = vmul.f32 %v3659_v1, %v3659_v1  ;;  %v3664_v17 = vmul.f32 %v3660_v54, %v3660_v54  ;;  %v3665_v18 = vmul.f32 %v3661_v4, %v3661_v4 }
0x1411   :  { %v3666_v51 = vsel %vm1634_vm1, %v3662_v15, 0.0  ;;  %v3667_v20 = vsel %vm1634_vm1, %v3663_v16, 0.0  ;;  %v3669_v21 = vsel %vm1634_vm1, %v3664_v17, 0.0  ;;  %v3671_v23 = vsel %vm1634_vm1, %v3665_v18, 0.0 }
0x1412   :  { %v3668_v52 = vadd.f32 %v3667_v20, %v3666_v51  ;;  %v4003_v20 = vld [vmem:[%s6094_s7] ss:$0 sm:$0xff] }
0x1414   :  { %v3670_v53 = vadd.f32 %v3669_v21, %v3668_v52 }
0x1416   :  { %v3672_v55 = vadd.f32 %v3671_v23, %v3670_v53 }
0x1418   :  { %v3673_v8 = vrot.slane %v3672_v55, 4 }
0x141a   :  { %v3674_v56 = vadd.f32 %v3673_v8, %v3672_v55 }
0x141c   :  { %v3675_v25 = vrot.slane %v3674_v56, 2 }
0x141e   :  { %v3676_v57 = vadd.f32 %v3675_v25, %v3674_v56 }
0x1420   :  { %v3677_v7 = vrot.slane %v3676_v57, 1 }
0x1422   :  { %v3678_v58 = vadd.f32 %v3677_v7, %v3676_v57 }
0x1424   :  { %v3679_v10 = vmul.f32 0.03125, %v3678_v58 }
0x1426   :  { %v3680_v59 = vadd.f32 1e-05, %v3679_v10 }
0x1428   :  { %4344 = vrsqrt.f32 %v3680_v59 }
0x1432   :  { %v4345_v60 = vpop.eup %4344 }
0x1433   :  { %v3682_v24 = vmul.f32 %v4345_v60, %v3642_v19 }
0x1435   :  { %v3686_v61 = vrot.slane %v3682_v24, %v5365_v36  ;;  %v3803_v36 = vld [vmem:[#allocation25] sm:$0xff] }
0x1436   :  { %v4253_v32 = vpack.c.bf16 %v3804_v26, %v3803_v36 }
0x1437   :  { %v3687_v63 = vmul.f32 %v3686_v61, %v3658_v14  ;;  %v3688_v2 = vmul.f32 %v3686_v61, %v3659_v1  ;;  %v3689_v3 = vmul.f32 %v3686_v61, %v3660_v54  ;;  %v3690_v5 = vmul.f32 %v3686_v61, %v3661_v4 }
0x1439   :  { %v3695_v6 = vadd.f32 %v3998_v62, %v3687_v63  ;;  %v3696_v29 = vadd.f32 %v3998_v62, %v3688_v2  ;;  %v3697_v30 = vadd.f32 %v3998_v62, %v3689_v3  ;;  %v3698_v9 = vadd.f32 %v3998_v62, %v3690_v5 }
0x143b   :  { %v3699_v27 = vmax.f32 %v3695_v6, 0.0  ;;  %v3700_v28 = vmax.f32 %v3696_v29, 0.0  ;;  %v3701_v11 = vmax.f32 %v3697_v30, 0.0  ;;  %v3702_v12 = vmax.f32 %v3698_v9, 0.0 }
0x143d   :  { %v3703_v13 = vpack.c.bf16 %v3700_v28, %v3699_v27  ;;  %v3704_v22 = vpack.c.bf16 %v3702_v12, %v3701_v11 }
0x143f   :  { %4241 = vmatprep.mubr.msk.bf16.mxu0 %vm1634_vm1, %v3703_v13 }
0x1440   :  { %4242 = vmatmul.mubr.msk.bf16.vlgmr.msra.gmra.mrb[36].mxu0 %vm1634_vm1, %v3704_v22 }
0x1441   :  { %4249 = vmatprep.mubr.msk.f32.mxu0 %vm4696_vm7, %v4687_v0  ;;  %4254 = vmatpush3.bf16.msra.mxu0 %v4253_v32 }
0x1513   :  { %v4243_v33 = vpop.f32.mrb[36].mxu0 }
0x1514   :  { %3778 = vst.msk [vmem:[#allocation3 + $0x50] sm:$0xff] %vm1333_vm0, %v4243_v33  ;;  %v3761_v34 = vpop.f32.mrb[37].mxu0 }
0x1515   :  { %3776 = vst.msk [vmem:[#allocation3] sm:$0xff] %vm1333_vm0, %v3761_v34  ;;  %v4244_v35 = vpop.f32.mrb[38].mxu0 }
0x1516   :  { %3779 = vst.msk [vmem:[#allocation3 + $0x58] sm:$0xff] %vm1333_vm0, %v4244_v35  ;;  %v3764_v37 = vpop.f32.mrb[39].mxu0 }
0x1517   :  { %3777 = vst.msk [vmem:[#allocation3 + $0x8] sm:$0xff] %vm1333_vm0, %v3764_v37 }
0x151d   :  { %v3781_v38 = vld [vmem:[#allocation3 + $0x50] ss:$2 sm:$0xff]  ;;  %v3783_v39 = vld [vmem:[#allocation3 + $0x51] ss:$2 sm:$0xff] }
0x151e   :  { %v3780_v40 = vld [vmem:[#allocation3] ss:$2 sm:$0xff]  ;;  %v3782_v41 = vld [vmem:[#allocation3 + $0x1] ss:$2 sm:$0xff]  ;;  %v3785_v42 = vmax.f32 %v3781_v38, %v3783_v39 }
0x151f   :  { %v3784_v43 = vmax.f32 %v3780_v40, %v3782_v41 }
0x1520   :  { %v3793_v0 = vsel %vm1333_vm0, %v3785_v42, 0.0 }
0x1521   :  { %v3786_v44 = vsel %vm1333_vm0, %v3784_v43, 0.0  ;;  %v3794_v45 = vrot.slane %v3793_v0, 4 }
0x1522   :  { %v3787_v46 = vrot.slane %v3786_v44, 4 }
0x1523   :  { %v3795_v47 = vadd.f32 %v3794_v45, %v3793_v0 }
0x1524   :  { %v3788_v48 = vadd.f32 %v3787_v46, %v3786_v44 }
0x1525   :  { %v3796_v49 = vrot.slane %v3795_v47, 2 }
0x1526   :  { %v3789_v50 = vrot.slane %v3788_v48, 2 }
0x1527   :  { %v3797_v14 = vadd.f32 %v3796_v49, %v3795_v47 }
0x1528   :  { %v3790_v1 = vadd.f32 %v3789_v50, %v3788_v48 }
0x1529   :  { %v3798_v54 = vrot.slane %v3797_v14, 1 }
0x152a   :  { %v3791_v4 = vrot.slane %v3790_v1, 1 }
0x152b   :  { %v3799_v15 = vadd.f32 %v3798_v54, %v3797_v14 }
0x152c   :  { %v3792_v16 = vadd.f32 %v3791_v4, %v3790_v1 }
0x152d   :  { %v3802_v17 = vmul.f32 0.125, %v3799_v15 }
0x152e   :  { %v3801_v18 = vmul.f32 0.125, %v3792_v16 }
0x1530   :  { %v3815_v51 = vsel %vm3814_vm8, %v3802_v17, %v3801_v18 }
0x1531   :  { %4250 = vmatmul.mubr.msk.f32.vlgmr.msra.gmra.mrb[40].mxu0 %vm1333_vm0, %v3815_v51 }
0x1604   :  { %v3884_v52 = vpop.f32.mrb[40].mxu0 }
0x1605   :  { %v3885_v21 = vadd.f32 %v4003_v20, %v3884_v52  ;;  %v4251_v53 = vpop.f32.mrb[41].mxu0 }
0x1607   :  { %3889 = vst.msk [vmem:[#allocation26] sm:$0x3] %vm3888_vm9, %v3885_v21 }
0x1608   :  { %4643 = shalt.err (!%p4640_p10)
}
0x1609   :  { %s6095_s4 = sld [smem:[#allocation48_spill]] }
0x160f   :  { %s4644_s11 = scalar_lea.hbm %s6095_s4, 32 }
0x1610   :  { %p4645_p11 = scmp.ne.s32.totalorder %s6095_s4, %s4644_s11  ;;  %p4648_p12 = scmp.lt.u32.totalorder %s4644_s11, %s6095_s4 }
0x1612   :  { %p4650_p13 = pnand %p4648_p12, %p4645_p11 }
0x1614   :  { %4653 = shalt.err (!%p4650_p13)
}
0x1615   :  { %3899 = dma.vmem_to_hbm [thread:$0]  %s3897_s29, 32, %s6095_s4, [#allocation7]  }
0x1616   :  { %4668 = dma.done.wait [#allocation7], 32  }
0x1617   :  { %4669 = vsyncadd [#allocation7], 4294967264 }
0x1618   :  { %3903 = vsyncpa [#allocation6], 1 }
0x1619   :  { %3904 = vsyncpa [#allocation9], 1 }
0x161a   :  { %3905 = vsyncpa [#allocation12], 1 }
0x161b   :  { %3906 = vsyncpa [#allocation15], 1 }
0x161c   :  { %3907 = vsyncpa [#allocation18], 1 }
0x161d   :  { %3908 = vsyncpa [#allocation21], 1 }
0x161e   :  { %3909 = vsyncpa [#allocation24], 1 }
0x161f   :  { %3910 = vsyncpa [#allocation7], 1 }

</bundles_post_ra>
